<compile_context>
chip_gen: v7x
topology: tpu7x:2x2x1
jax: 0.10.0
libtpu: 0.0.40
codegen_flags: <defaults>
</compile_context>

<pallas_src>
import functools
import math

import numpy as np

import jax
import jax.numpy as jnp
from jax.experimental import pallas as pl
from jax.experimental.pallas import tpu as pltpu

# ----------------------------- configuration --------------------------------
B = 2            # batch
S = 8            # sequence length
E = 32           # embed_dim / BERT hidden size
NUM_HEADS = 2
DH = E // NUM_HEADS
INTER = 4 * E    # BERT intermediate size (= 128, already lane-dense)
NUM_LAYERS = 2
VOCAB = 50
TYPE_VOCAB = 2
MAX_POS = 16
FILTER_SIZES = (1, 2, 3)   # opt.filter_sizes, n_filters = 1
OUTPUT_DIM = 3             # opt.output_dim
LANE = 128                 # TPU lane width


# --------------------- SWEM banded constants (numpy, built once) -------------
def _build_band_np(seq, bsz, filter_sizes):
    """Banded ones-matrices turning the all-ones conv into MXU matmuls.

    wsel[b*NW + c, b*S + j] = 1      iff position j is inside window c (batch b)
    trep[b*NW + c, b]       = k      window length (t_pooled feature sum enters
                                     k times per window)
    seg [b*NW + c, b*nf+f]  = 1      window c belongs to filter f of batch b
                                     (used for the per-filter max-pool)
    """
    nw = sum(seq - k + 1 for k in filter_sizes)
    nw_all = bsz * nw
    nf = len(filter_sizes)
    wsel = np.zeros((nw_all, bsz * seq), np.float32)
    trep = np.zeros((nw_all, bsz), np.float32)
    seg = np.zeros((nw_all, bsz * nf), np.float32)
    for b in range(bsz):
        r = b * nw
        for fk, k in enumerate(filter_sizes):
            for i in range(seq - k + 1):
                wsel[r, b * seq + i: b * seq + i + k] = 1.0
                trep[r, b] = float(k)
                seg[r, b * nf + fk] = 1.0
                r += 1
    return wsel, trep, seg


# ----------------------------- Pallas kernel ---------------------------------
def _layer_norm(x, g, b, eps=1e-12):
    mu = jnp.mean(x, axis=-1, keepdims=True)
    var = jnp.mean(jnp.square(x - mu), axis=-1, keepdims=True)
    return (x - mu) * jax.lax.rsqrt(var + eps) * g + b


def _tc_swem_fused_kernel(hsum_ref, mask_ref, w_ref, v_ref, hmat_ref, hvec_ref,
                          seg_ref, out_ref, *, num_heads, n_filters):
    # hsum_ref : [2B*S, E]   word+pos+type embedding sums (pre-LayerNorm)
    # mask_ref : [2B*S,2B*S] block-diagonal additive attention mask (0 / -1e4)
    # w_ref    : [L, 3E+INTER, 128] packed matrices
    #            rows 0:E   -> W_qkv (head-ordered cols, 3E real, zero-padded)
    #            rows E:2E  -> W_o   (cols 0:E)
    #            rows 2E:3E -> W_i   (cols 0:INTER)
    #            rows 3E:   -> W_o2  (cols 0:E)
    # v_ref    : [L, 8, 128] rows: bqkv, bo, ln1_g, ln1_b, bi, bo2, ln2_g, ln2_b
    # hmat_ref : [E+NW_ALL, 128] rows 0:E pool_w; rows E: banded [wsel | trep]
    # hvec_ref : [8, 128]    rows: pool_b, emb_ln_g, emb_ln_b, fc_b, fc_w rows
    # seg_ref  : [NW_ALL, B*n_filters] per-(batch,filter) window membership
    # out_ref  : [B, 128]    lane-padded logits
    e = hsum_ref.shape[1]
    dh = e // num_heads
    num_layers = w_ref.shape[0]
    inter = w_ref.shape[1] - 3 * e
    bsz = out_ref.shape[0]
    lane = out_ref.shape[1]
    seq = hsum_ref.shape[0] // (2 * bsz)
    n_sent = bsz * seq
    nw_all = seg_ref.shape[0]
    scale = 1.0 / math.sqrt(dh)

    # ---- embedding LayerNorm (fused; dropout is identity at inference) ----
    h = _layer_norm(hsum_ref[...], hvec_ref[1:2, 0:e], hvec_ref[2:3, 0:e])
    mask = mask_ref[...]                                          # [R, R]

    # ---- BERT encoder layers, fully unrolled, activations stay in vregs ----
    for l in range(num_layers):
        wqkv = w_ref[l, 0:e, :]                                   # [E, 128]
        qkv = (jnp.dot(h, wqkv, preferred_element_type=jnp.float32)
               + v_ref[l, 0:1, :])                                # [R, 128]

        attn = None
        for hi in range(num_heads):
            base = 3 * dh * hi                                    # contiguous head slab
            q = qkv[:, base:base + dh]
            k = qkv[:, base + dh:base + 2 * dh]
            v = qkv[:, base + 2 * dh:base + 3 * dh]
            sc = jnp.einsum("qd,kd->qk", q, k,
                            preferred_element_type=jnp.float32) * scale + mask
            sc = sc - jnp.max(sc, axis=-1, keepdims=True)
            p = jnp.exp(sc)
            p = p * pl.reciprocal(jnp.sum(p, axis=-1, keepdims=True), approx=True)
            ctx = jnp.dot(p, v, preferred_element_type=jnp.float32)   # [R, dh]
            wo_h = w_ref[l, e + hi * dh: e + (hi + 1) * dh, 0:e]      # [dh, E]
            part = jnp.dot(ctx, wo_h, preferred_element_type=jnp.float32)
            attn = part if attn is None else attn + part
        attn = attn + v_ref[l, 1:2, 0:e]
        h1 = _layer_norm(h + attn, v_ref[l, 2:3, 0:e], v_ref[l, 3:4, 0:e])

        # fused FFN
        wi = w_ref[l, 2 * e:3 * e, :]                             # [E, 128]
        x_i = jnp.dot(h1, wi, preferred_element_type=jnp.float32) + v_ref[l, 4:5, :]
        # TODO(synk): BERT's exact erf-GELU is approximated with tanh-GELU in-kernel.
        x_i = jax.nn.gelu(x_i, approximate=True)
        wo2 = w_ref[l, 3 * e:3 * e + inter, 0:e]                  # [INTER, E]
        ffn = (jnp.dot(x_i[:, :inter], wo2, preferred_element_type=jnp.float32)
               + v_ref[l, 5:6, 0:e])
        h = _layer_norm(h1 + ffn, v_ref[l, 6:7, 0:e], v_ref[l, 7:8, 0:e])

    # ---- SWEM head -----------------------------------------------------------
    h_sent = h[0:n_sent, :]                                       # sentence pass
    # target-pass [CLS] rows (rows n_sent + b*seq), then BERT pooler + tanh
    tcls = jnp.concatenate(
        [h[n_sent + b * seq: n_sent + b * seq + 1, :] for b in range(bsz)], axis=0)
    t_pooled = jnp.tanh(
        jnp.dot(tcls, hmat_ref[0:e, 0:e], preferred_element_type=jnp.float32)
        + hvec_ref[0:1, 0:e])                                     # [B, E]

    # all-ones conv over concat([sentence_embed, t_pooled]) without any reshape:
    #   window feature totals = banded matmul over positions + t_pooled term
    wsel = hmat_ref[e:e + nw_all, 0:n_sent]                       # [NW_ALL, B*S]
    trep = hmat_ref[e:e + nw_all, n_sent:n_sent + bsz]            # [NW_ALL, B]
    total = jnp.dot(wsel, h_sent, preferred_element_type=jnp.float32)
    for b in range(bsz):      # tiny-K contribution done on the VPU (K = B)
        total = total + trep[:, b:b + 1] * t_pooled[b:b + 1, :]
    # lane-broadcast the per-window feature sums via an MXU ones-matmul
    win = jnp.dot(total, jnp.ones((e, lane), jnp.float32),
                  preferred_element_type=jnp.float32)             # [NW_ALL, 128]
    win = jnp.maximum(win, 0.0)                                   # ReLU (>= 0)

    # per-(batch, filter) max-pool over time + final FC, all lane-dense
    fcb = hvec_ref[3:4, :]                                        # [1, 128]
    out_rows = []
    for b in range(bsz):
        row = fcb
        for kf in range(n_filters):
            sel = seg_ref[:, b * n_filters + kf: b * n_filters + kf + 1]  # [NW,1]
            pooled = jnp.max(win * sel, axis=0, keepdims=True)    # [1, 128]
            row = row + pooled * hvec_ref[4 + kf:5 + kf, :]
        out_rows.append(row)
    out_ref[...] = jnp.concatenate(out_rows, axis=0)              # [B, 128]


# ----------------------------- weight packing --------------------------------
def pack_params(params):
    """Coalesce all weights into a few VMEM-friendly slabs (done once)."""
    bp = params["bert"]

    w_layers, v_layers = [], []
    for lp in bp["layers"]:
        qkv_cols, bqkv_parts = [], []
        for hi in range(NUM_HEADS):   # head-ordered columns: q_h | k_h | v_h
            sl = slice(hi * DH, (hi + 1) * DH)
            qkv_cols += [lp["wq"][:, sl], lp["wk"][:, sl], lp["wv"][:, sl]]
            bqkv_parts += [lp["bq"][sl], lp["bk"][sl], lp["bv"][sl]]
        wqkv = jnp.concatenate(qkv_cols, axis=1)                  # [E, 3E]
        bqkv = jnp.concatenate(bqkv_parts)                        # [3E]

        w_layer = jnp.concatenate([
            jnp.pad(wqkv, ((0, 0), (0, LANE - 3 * E))),
            jnp.pad(lp["wo"], ((0, 0), (0, LANE - E))),
            jnp.pad(lp["wi"], ((0, 0), (0, LANE - INTER))),
            jnp.pad(lp["wo2"], ((0, 0), (0, LANE - E))),
        ], axis=0)                                                # [3E+INTER, 128]
        v_layer = jnp.stack([
            jnp.pad(bqkv, (0, LANE - 3 * E)),
            jnp.pad(lp["bo"], (0, LANE - E)),
            jnp.pad(lp["ln1_g"], (0, LANE - E)),
            jnp.pad(lp["ln1_b"], (0, LANE - E)),
            jnp.pad(lp["bi"], (0, LANE - INTER)),
            jnp.pad(lp["bo2"], (0, LANE - E)),
            jnp.pad(lp["ln2_g"], (0, LANE - E)),
            jnp.pad(lp["ln2_b"], (0, LANE - E)),
        ], axis=0)                                                # [8, 128]
        w_layers.append(w_layer)
        v_layers.append(v_layer)

    wsel, trep, seg = _build_band_np(S, B, FILTER_SIZES)
    band = np.concatenate([wsel, trep], axis=1)                   # [NW_ALL, B*S+B]
    band = np.pad(band, ((0, 0), (0, LANE - band.shape[1])))

    head_mat = jnp.concatenate([
        jnp.pad(bp["pool_w"], ((0, 0), (0, LANE - E))),
        jnp.asarray(band),
    ], axis=0)                                                    # [E+NW_ALL, 128]

    nf = len(FILTER_SIZES)
    head_vec = jnp.stack(
        [jnp.pad(bp["pool_b"], (0, LANE - E)),
         jnp.pad(bp["emb_ln_g"], (0, LANE - E)),
         jnp.pad(bp["emb_ln_b"], (0, LANE - E)),
         jnp.pad(params["fc_b"], (0, LANE - OUTPUT_DIM))]
        + [jnp.pad(params["fc_w"][k], (0, LANE - OUTPUT_DIM)) for k in range(nf)]
        + [jnp.zeros((LANE,), jnp.float32)], axis=0)              # [5+nf, 128]

    return dict(
        word_emb=bp["word_emb"], pos_emb=bp["pos_emb"], type_emb=bp["type_emb"],
        w_slab=jnp.stack(w_layers, 0),                            # [L, 224, 128]
        v_slab=jnp.stack(v_layers, 0),                            # [L, 8, 128]
        head_mat=head_mat, head_vec=head_vec,
        seg_sel=jnp.asarray(seg),                                 # [NW_ALL, B*nf]
    )


# ----------------------------- TC_SWEM forward --------------------------------
def tc_swem_forward(packed, input_ids, token_type_ids, attention_mask,
                    input_t_ids, input_t_mask, segment_t_ids):
    bsz, seq = input_ids.shape
    nb = 2 * bsz

    # merge the sentence pass and the target pass into one 2B-sequence batch
    ids = jnp.concatenate([input_ids, input_t_ids], axis=0)       # [2B, S]
    types = jnp.concatenate([token_type_ids, segment_t_ids], axis=0)
    mask = jnp.concatenate([attention_mask, input_t_mask], axis=0)

    # embedding gathers stay in XLA; LayerNorm is fused into the kernel
    pos = jnp.arange(seq)[None, :]
    hsum = (packed["word_emb"][ids] + packed["pos_emb"][pos]
            + packed["type_emb"][types]).reshape(nb * seq, E).astype(jnp.float32)

    # block-diagonal additive attention mask over the merged 2B*S rows
    seq_id = jnp.repeat(jnp.arange(nb), seq)
    same = seq_id[:, None] == seq_id[None, :]
    key_ok = (mask.reshape(-1) > 0)[None, :]
    add_mask = jnp.where(same & key_ok, 0.0, -10000.0).astype(jnp.float32)

    kernel = functools.partial(_tc_swem_fused_kernel,
                               num_heads=NUM_HEADS, n_filters=len(FILTER_SIZES))
    vmem = pl.BlockSpec(memory_space=pltpu.MemorySpace.VMEM)
    logits_pad = pl.pallas_call(
        kernel,
        out_shape=jax.ShapeDtypeStruct((bsz, LANE), jnp.float32),
        in_specs=[vmem] * 7,
        out_specs=vmem,
    )(hsum, add_mask, packed["w_slab"], packed["v_slab"],
      packed["head_mat"], packed["head_vec"], packed["seg_sel"])
    # TODO(synk): labels / CrossEntropyLoss branch not exercised here (logits only).
    return logits_pad[:, :OUTPUT_DIM]


# ----------------------------- param init ------------------------------------
def init_params(key):
    keys = iter(jax.random.split(key, 128))

    def w(shape, scale=0.02):
        return jax.random.normal(next(keys), shape, jnp.float32) * scale

    def layer_params():
        return dict(
            wq=w((E, E)), bq=jnp.zeros((E,), jnp.float32),
            wk=w((E, E)), bk=jnp.zeros((E,), jnp.float32),
            wv=w((E, E)), bv=jnp.zeros((E,), jnp.float32),
            wo=w((E, E)), bo=jnp.zeros((E,), jnp.float32),
            ln1_g=jnp.ones((E,), jnp.float32), ln1_b=jnp.zeros((E,), jnp.float32),
            wi=w((E, INTER)), bi=jnp.zeros((INTER,), jnp.float32),
            wo2=w((INTER, E)), bo2=jnp.zeros((E,), jnp.float32),
            ln2_g=jnp.ones((E,), jnp.float32), ln2_b=jnp.zeros((E,), jnp.float32),
        )

    bert = dict(
        word_emb=w((VOCAB, E)),
        pos_emb=w((MAX_POS, E)),
        type_emb=w((TYPE_VOCAB, E)),
        emb_ln_g=jnp.ones((E,), jnp.float32),
        emb_ln_b=jnp.zeros((E,), jnp.float32),
        layers=[layer_params() for _ in range(NUM_LAYERS)],
        pool_w=w((E, E)),
        pool_b=jnp.zeros((E,), jnp.float32),
    )
    # nn.Linear(len(filter_sizes) * 1, output_dim): stored as [in, out]
    fc_w = w((len(FILTER_SIZES), OUTPUT_DIM), scale=0.1)
    fc_b = jnp.zeros((OUTPUT_DIM,), jnp.float32)
    return dict(bert=bert, fc_w=fc_w, fc_b=fc_b)


# ----------------------------- main -------------------------------------------
if __name__ == "__main__":
    root = jax.random.PRNGKey(0)
    k_param, k_ids, k_tids = jax.random.split(root, 3)

    params = init_params(k_param)
    packed = pack_params(params)     # one-time weight coalescing, outside jit

    input_ids = jax.random.randint(k_ids, (B, S), 0, VOCAB, dtype=jnp.int32)
    token_type_ids = jnp.zeros((B, S), jnp.int32)
    attention_mask = jnp.ones((B, S), jnp.int32)

    input_t_ids = jax.random.randint(k_tids, (B, S), 0, VOCAB, dtype=jnp.int32)
    input_t_mask = jnp.ones((B, S), jnp.int32)
    segment_t_ids = jnp.zeros((B, S), jnp.int32)

    fwd = jax.jit(tc_swem_forward)
    logits = fwd(packed, input_ids, token_type_ids, attention_mask,
                 input_t_ids, input_t_mask, segment_t_ids)
    logits = jax.block_until_ready(logits)

    assert logits.shape == (B, OUTPUT_DIM)
    assert bool(jnp.all(jnp.isfinite(logits)))
    print("KERNEL_OK")
</pallas_src>

<mosaic_0001>
module attributes {stable_mosaic.version = 11 : i64} {
  func.func @_tc_swem_fused_kernel(%arg0: memref<32x32xf32, #tpu.memory_space<vmem>>, %arg1: memref<32x32xf32, #tpu.memory_space<vmem>>, %arg2: memref<2x224x128xf32, #tpu.memory_space<vmem>>, %arg3: memref<2x8x128xf32, #tpu.memory_space<vmem>>, %arg4: memref<74x128xf32, #tpu.memory_space<vmem>>, %arg5: memref<8x128xf32, #tpu.memory_space<vmem>>, %arg6: memref<42x6xf32, #tpu.memory_space<vmem>>, %arg7: memref<2x128xf32, #tpu.memory_space<vmem>>) attributes {dimension_semantics = [], scalar_prefetch = 0 : i64, scratch_operands = 0 : i64, tpu.core_type = #tpu.core_type<tc>} {
    %c0 = arith.constant 0 : index
    %c0_0 = arith.constant 0 : index
    %0 = vector.load %arg0[%c0, %c0_0] : memref<32x32xf32, #tpu.memory_space<vmem>>, vector<32x32xf32>
    %c1 = arith.constant 1 : index
    %c0_1 = arith.constant 0 : index
    %1 = vector.load %arg5[%c1, %c0_1] : memref<8x128xf32, #tpu.memory_space<vmem>>, vector<1x32xf32>
    %c2 = arith.constant 2 : index
    %c0_2 = arith.constant 0 : index
    %2 = vector.load %arg5[%c2, %c0_2] : memref<8x128xf32, #tpu.memory_space<vmem>>, vector<1x32xf32>
    %cst = arith.constant dense<0.000000e+00> : vector<32xf32>
    %3 = vector.multi_reduction <add>, %0, %cst [1] : vector<32x32xf32> to vector<32xf32>
    %4 = vector.shape_cast %3 : vector<32xf32> to vector<32x1xf32>
    %cst_3 = arith.constant 3.200000e+01 : f32
    %5 = vector.broadcast %cst_3 : f32 to vector<32x1xf32>
    %6 = arith.divf %4, %5 : vector<32x1xf32>
    %7 = vector.broadcast %6 : vector<32x1xf32> to vector<32x32xf32>
    %8 = arith.subf %0, %7 : vector<32x32xf32>
    %9 = arith.mulf %8, %8 : vector<32x32xf32>
    %cst_4 = arith.constant dense<0.000000e+00> : vector<32xf32>
    %10 = vector.multi_reduction <add>, %9, %cst_4 [1] : vector<32x32xf32> to vector<32xf32>
    %11 = vector.shape_cast %10 : vector<32xf32> to vector<32x1xf32>
    %cst_5 = arith.constant 3.200000e+01 : f32
    %12 = vector.broadcast %cst_5 : f32 to vector<32x1xf32>
    %13 = arith.divf %11, %12 : vector<32x1xf32>
    %14 = vector.broadcast %6 : vector<32x1xf32> to vector<32x32xf32>
    %15 = arith.subf %0, %14 : vector<32x32xf32>
    %cst_6 = arith.constant 9.99999996E-13 : f32
    %16 = vector.broadcast %cst_6 : f32 to vector<32x1xf32>
    %17 = arith.addf %13, %16 : vector<32x1xf32>
    %18 = math.rsqrt %17 : vector<32x1xf32>
    %19 = vector.broadcast %18 : vector<32x1xf32> to vector<32x32xf32>
    %20 = arith.mulf %15, %19 : vector<32x32xf32>
    %21 = vector.broadcast %1 : vector<1x32xf32> to vector<32x32xf32>
    %22 = arith.mulf %20, %21 : vector<32x32xf32>
    %23 = vector.broadcast %2 : vector<1x32xf32> to vector<32x32xf32>
    %24 = arith.addf %22, %23 : vector<32x32xf32>
    %c0_7 = arith.constant 0 : index
    %c0_8 = arith.constant 0 : index
    %25 = vector.load %arg1[%c0_7, %c0_8] : memref<32x32xf32, #tpu.memory_space<vmem>>, vector<32x32xf32>
    %c0_9 = arith.constant 0 : index
    %c0_10 = arith.constant 0 : index
    %c0_11 = arith.constant 0 : index
    %26 = vector.load %arg2[%c0_9, %c0_10, %c0_11] : memref<2x224x128xf32, #tpu.memory_space<vmem>>, vector<1x32x128xf32>
    %27 = vector.shape_cast %26 : vector<1x32x128xf32> to vector<32x128xf32>
    %cst_12 = arith.constant dense<0.000000e+00> : vector<32x128xf32>
    %28 = tpu.matmul %24, %27, %cst_12 {dimension_numbers = #tpu.dot_dimension_numbers<[1], [0], [0], [1], [0, 0, 1, 1], [], []>} : vector<32x32xf32>, vector<32x128xf32>, vector<32x128xf32> -> vector<32x128xf32>
    %c0_13 = arith.constant 0 : index
    %c0_14 = arith.constant 0 : index
    %c0_15 = arith.constant 0 : index
    %29 = vector.load %arg3[%c0_13, %c0_14, %c0_15] : memref<2x8x128xf32, #tpu.memory_space<vmem>>, vector<1x1x128xf32>
    %30 = vector.shape_cast %29 : vector<1x1x128xf32> to vector<1x128xf32>
    %31 = vector.broadcast %30 : vector<1x128xf32> to vector<32x128xf32>
    %32 = arith.addf %28, %31 : vector<32x128xf32>
    %33 = vector.extract_strided_slice %32 {offsets = [0, 0], sizes = [32, 16], strides = [1, 1]} : vector<32x128xf32> to vector<32x16xf32>
    %34 = vector.extract_strided_slice %32 {offsets = [0, 16], sizes = [32, 16], strides = [1, 1]} : vector<32x128xf32> to vector<32x16xf32>
    %35 = vector.extract_strided_slice %32 {offsets = [0, 32], sizes = [32, 16], strides = [1, 1]} : vector<32x128xf32> to vector<32x16xf32>
    "tpu.trace_start"() <{level = 10 : i32, message = "qd,kd->qk"}> : () -> ()
    %cst_16 = arith.constant dense<0.000000e+00> : vector<32x32xf32>
    %36 = tpu.matmul %33, %34, %cst_16 {dimension_numbers = #tpu.dot_dimension_numbers<[1], [1], [0], [0], [0, 0, 1, 0], [], []>} : vector<32x16xf32>, vector<32x16xf32>, vector<32x32xf32> -> vector<32x32xf32>
    "tpu.trace_stop"() : () -> ()
    %cst_17 = arith.constant 2.500000e-01 : f32
    %37 = vector.broadcast %cst_17 : f32 to vector<32x32xf32>
    %38 = arith.mulf %36, %37 : vector<32x32xf32>
    %39 = arith.addf %38, %25 : vector<32x32xf32>
    %cst_18 = arith.constant dense<0xFF800000> : vector<32xf32>
    %40 = vector.multi_reduction <maximumf>, %39, %cst_18 [1] : vector<32x32xf32> to vector<32xf32>
    %41 = vector.shape_cast %40 : vector<32xf32> to vector<32x1xf32>
    %42 = vector.broadcast %41 : vector<32x1xf32> to vector<32x32xf32>
    %43 = arith.subf %39, %42 : vector<32x32xf32>
    %44 = math.exp %43 : vector<32x32xf32>
    %cst_19 = arith.constant dense<0.000000e+00> : vector<32xf32>
    %45 = vector.multi_reduction <add>, %44, %cst_19 [1] : vector<32x32xf32> to vector<32xf32>
    %46 = vector.shape_cast %45 : vector<32xf32> to vector<32x1xf32>
    %47 = tpu.reciprocal %46 {approx = true} : vector<32x1xf32> -> vector<32x1xf32>
    %48 = vector.broadcast %47 : vector<32x1xf32> to vector<32x32xf32>
    %49 = arith.mulf %44, %48 : vector<32x32xf32>
    %cst_20 = arith.constant dense<0.000000e+00> : vector<32x16xf32>
    %50 = tpu.matmul %49, %35, %cst_20 {dimension_numbers = #tpu.dot_dimension_numbers<[1], [0], [0], [1], [0, 0, 1, 1], [], []>} : vector<32x32xf32>, vector<32x16xf32>, vector<32x16xf32> -> vector<32x16xf32>
    %c0_21 = arith.constant 0 : index
    %c32 = arith.constant 32 : index
    %c0_22 = arith.constant 0 : index
    %51 = vector.load %arg2[%c0_21, %c32, %c0_22] : memref<2x224x128xf32, #tpu.memory_space<vmem>>, vector<1x16x32xf32>
    %52 = vector.shape_cast %51 : vector<1x16x32xf32> to vector<16x32xf32>
    %cst_23 = arith.constant dense<0.000000e+00> : vector<32x32xf32>
    %53 = tpu.matmul %50, %52, %cst_23 {dimension_numbers = #tpu.dot_dimension_numbers<[1], [0], [0], [1], [0, 0, 1, 1], [], []>} : vector<32x16xf32>, vector<16x32xf32>, vector<32x32xf32> -> vector<32x32xf32>
    %54 = vector.extract_strided_slice %32 {offsets = [0, 48], sizes = [32, 16], strides = [1, 1]} : vector<32x128xf32> to vector<32x16xf32>
    %55 = vector.extract_strided_slice %32 {offsets = [0, 64], sizes = [32, 16], strides = [1, 1]} : vector<32x128xf32> to vector<32x16xf32>
    %56 = vector.extract_strided_slice %32 {offsets = [0, 80], sizes = [32, 16], strides = [1, 1]} : vector<32x128xf32> to vector<32x16xf32>
    "tpu.trace_start"() <{level = 10 : i32, message = "qd,kd->qk"}> : () -> ()
    %cst_24 = arith.constant dense<0.000000e+00> : vector<32x32xf32>
    %57 = tpu.matmul %54, %55, %cst_24 {dimension_numbers = #tpu.dot_dimension_numbers<[1], [1], [0], [0], [0, 0, 1, 0], [], []>} : vector<32x16xf32>, vector<32x16xf32>, vector<32x32xf32> -> vector<32x32xf32>
    "tpu.trace_stop"() : () -> ()
    %cst_25 = arith.constant 2.500000e-01 : f32
    %58 = vector.broadcast %cst_25 : f32 to vector<32x32xf32>
    %59 = arith.mulf %57, %58 : vector<32x32xf32>
    %60 = arith.addf %59, %25 : vector<32x32xf32>
    %cst_26 = arith.constant dense<0xFF800000> : vector<32xf32>
    %61 = vector.multi_reduction <maximumf>, %60, %cst_26 [1] : vector<32x32xf32> to vector<32xf32>
    %62 = vector.shape_cast %61 : vector<32xf32> to vector<32x1xf32>
    %63 = vector.broadcast %62 : vector<32x1xf32> to vector<32x32xf32>
    %64 = arith.subf %60, %63 : vector<32x32xf32>
    %65 = math.exp %64 : vector<32x32xf32>
    %cst_27 = arith.constant dense<0.000000e+00> : vector<32xf32>
    %66 = vector.multi_reduction <add>, %65, %cst_27 [1] : vector<32x32xf32> to vector<32xf32>
    %67 = vector.shape_cast %66 : vector<32xf32> to vector<32x1xf32>
    %68 = tpu.reciprocal %67 {approx = true} : vector<32x1xf32> -> vector<32x1xf32>
    %69 = vector.broadcast %68 : vector<32x1xf32> to vector<32x32xf32>
    %70 = arith.mulf %65, %69 : vector<32x32xf32>
    %cst_28 = arith.constant dense<0.000000e+00> : vector<32x16xf32>
    %71 = tpu.matmul %70, %56, %cst_28 {dimension_numbers = #tpu.dot_dimension_numbers<[1], [0], [0], [1], [0, 0, 1, 1], [], []>} : vector<32x32xf32>, vector<32x16xf32>, vector<32x16xf32> -> vector<32x16xf32>
    %c0_29 = arith.constant 0 : index
    %c48 = arith.constant 48 : index
    %c0_30 = arith.constant 0 : index
    %72 = vector.load %arg2[%c0_29, %c48, %c0_30] : memref<2x224x128xf32, #tpu.memory_space<vmem>>, vector<1x16x32xf32>
    %73 = vector.shape_cast %72 : vector<1x16x32xf32> to vector<16x32xf32>
    %cst_31 = arith.constant dense<0.000000e+00> : vector<32x32xf32>
    %74 = tpu.matmul %71, %73, %cst_31 {dimension_numbers = #tpu.dot_dimension_numbers<[1], [0], [0], [1], [0, 0, 1, 1], [], []>} : vector<32x16xf32>, vector<16x32xf32>, vector<32x32xf32> -> vector<32x32xf32>
    %75 = arith.addf %53, %74 : vector<32x32xf32>
    %c0_32 = arith.constant 0 : index
    %c1_33 = arith.constant 1 : index
    %c0_34 = arith.constant 0 : index
    %76 = vector.load %arg3[%c0_32, %c1_33, %c0_34] : memref<2x8x128xf32, #tpu.memory_space<vmem>>, vector<1x1x32xf32>
    %77 = vector.shape_cast %76 : vector<1x1x32xf32> to vector<1x32xf32>
    %78 = vector.broadcast %77 : vector<1x32xf32> to vector<32x32xf32>
    %79 = arith.addf %75, %78 : vector<32x32xf32>
    %80 = arith.addf %24, %79 : vector<32x32xf32>
    %c0_35 = arith.constant 0 : index
    %c2_36 = arith.constant 2 : index
    %c0_37 = arith.constant 0 : index
    %81 = vector.load %arg3[%c0_35, %c2_36, %c0_37] : memref<2x8x128xf32, #tpu.memory_space<vmem>>, vector<1x1x32xf32>
    %82 = vector.shape_cast %81 : vector<1x1x32xf32> to vector<1x32xf32>
    %c0_38 = arith.constant 0 : index
    %c3 = arith.constant 3 : index
    %c0_39 = arith.constant 0 : index
    %83 = vector.load %arg3[%c0_38, %c3, %c0_39] : memref<2x8x128xf32, #tpu.memory_space<vmem>>, vector<1x1x32xf32>
    %84 = vector.shape_cast %83 : vector<1x1x32xf32> to vector<1x32xf32>
    %cst_40 = arith.constant dense<0.000000e+00> : vector<32xf32>
    %85 = vector.multi_reduction <add>, %80, %cst_40 [1] : vector<32x32xf32> to vector<32xf32>
    %86 = vector.shape_cast %85 : vector<32xf32> to vector<32x1xf32>
    %cst_41 = arith.constant 3.200000e+01 : f32
    %87 = vector.broadcast %cst_41 : f32 to vector<32x1xf32>
    %88 = arith.divf %86, %87 : vector<32x1xf32>
    %89 = vector.broadcast %88 : vector<32x1xf32> to vector<32x32xf32>
    %90 = arith.subf %80, %89 : vector<32x32xf32>
    %91 = arith.mulf %90, %90 : vector<32x32xf32>
    %cst_42 = arith.constant dense<0.000000e+00> : vector<32xf32>
    %92 = vector.multi_reduction <add>, %91, %cst_42 [1] : vector<32x32xf32> to vector<32xf32>
    %93 = vector.shape_cast %92 : vector<32xf32> to vector<32x1xf32>
    %cst_43 = arith.constant 3.200000e+01 : f32
    %94 = vector.broadcast %cst_43 : f32 to vector<32x1xf32>
    %95 = arith.divf %93, %94 : vector<32x1xf32>
    %96 = vector.broadcast %88 : vector<32x1xf32> to vector<32x32xf32>
    %97 = arith.subf %80, %96 : vector<32x32xf32>
    %cst_44 = arith.constant 9.99999996E-13 : f32
    %98 = vector.broadcast %cst_44 : f32 to vector<32x1xf32>
    %99 = arith.addf %95, %98 : vector<32x1xf32>
    %100 = math.rsqrt %99 : vector<32x1xf32>
    %101 = vector.broadcast %100 : vector<32x1xf32> to vector<32x32xf32>
    %102 = arith.mulf %97, %101 : vector<32x32xf32>
    %103 = vector.broadcast %82 : vector<1x32xf32> to vector<32x32xf32>
    %104 = arith.mulf %102, %103 : vector<32x32xf32>
    %105 = vector.broadcast %84 : vector<1x32xf32> to vector<32x32xf32>
    %106 = arith.addf %104, %105 : vector<32x32xf32>
    %c0_45 = arith.constant 0 : index
    %c64 = arith.constant 64 : index
    %c0_46 = arith.constant 0 : index
    %107 = vector.load %arg2[%c0_45, %c64, %c0_46] : memref<2x224x128xf32, #tpu.memory_space<vmem>>, vector<1x32x128xf32>
    %108 = vector.shape_cast %107 : vector<1x32x128xf32> to vector<32x128xf32>
    %cst_47 = arith.constant dense<0.000000e+00> : vector<32x128xf32>
    %109 = tpu.matmul %106, %108, %cst_47 {dimension_numbers = #tpu.dot_dimension_numbers<[1], [0], [0], [1], [0, 0, 1, 1], [], []>} : vector<32x32xf32>, vector<32x128xf32>, vector<32x128xf32> -> vector<32x128xf32>
    %c0_48 = arith.constant 0 : index
    %c4 = arith.constant 4 : index
    %c0_49 = arith.constant 0 : index
    %110 = vector.load %arg3[%c0_48, %c4, %c0_49] : memref<2x8x128xf32, #tpu.memory_space<vmem>>, vector<1x1x128xf32>
    %111 = vector.shape_cast %110 : vector<1x1x128xf32> to vector<1x128xf32>
    %112 = vector.broadcast %111 : vector<1x128xf32> to vector<32x128xf32>
    %113 = arith.addf %109, %112 : vector<32x128xf32>
    %114 = arith.mulf %113, %113 : vector<32x128xf32>
    %115 = arith.mulf %113, %114 : vector<32x128xf32>
    %cst_50 = arith.constant 4.471500e-02 : f32
    %116 = vector.broadcast %cst_50 : f32 to vector<32x128xf32>
    %117 = arith.mulf %116, %115 : vector<32x128xf32>
    %118 = arith.addf %113, %117 : vector<32x128xf32>
    %cst_51 = arith.constant 0.797884583 : f32
    %119 = vector.broadcast %cst_51 : f32 to vector<32x128xf32>
    %120 = arith.mulf %119, %118 : vector<32x128xf32>
    %121 = math.tanh %120 : vector<32x128xf32>
    %cst_52 = arith.constant 1.000000e+00 : f32
    %122 = vector.broadcast %cst_52 : f32 to vector<32x128xf32>
    %123 = arith.addf %122, %121 : vector<32x128xf32>
    %cst_53 = arith.constant 5.000000e-01 : f32
    %124 = vector.broadcast %cst_53 : f32 to vector<32x128xf32>
    %125 = arith.mulf %124, %123 : vector<32x128xf32>
    %126 = arith.mulf %113, %125 : vector<32x128xf32>
    %c0_54 = arith.constant 0 : index
    %c96 = arith.constant 96 : index
    %c0_55 = arith.constant 0 : index
    %127 = vector.load %arg2[%c0_54, %c96, %c0_55] : memref<2x224x128xf32, #tpu.memory_space<vmem>>, vector<1x128x32xf32>
    %128 = vector.shape_cast %127 : vector<1x128x32xf32> to vector<128x32xf32>
    %cst_56 = arith.constant dense<0.000000e+00> : vector<32x32xf32>
    %129 = tpu.matmul %126, %128, %cst_56 {dimension_numbers = #tpu.dot_dimension_numbers<[1], [0], [0], [1], [0, 0, 1, 1], [], []>} : vector<32x128xf32>, vector<128x32xf32>, vector<32x32xf32> -> vector<32x32xf32>
    %c0_57 = arith.constant 0 : index
    %c5 = arith.constant 5 : index
    %c0_58 = arith.constant 0 : index
    %130 = vector.load %arg3[%c0_57, %c5, %c0_58] : memref<2x8x128xf32, #tpu.memory_space<vmem>>, vector<1x1x32xf32>
    %131 = vector.shape_cast %130 : vector<1x1x32xf32> to vector<1x32xf32>
    %132 = vector.broadcast %131 : vector<1x32xf32> to vector<32x32xf32>
    %133 = arith.addf %129, %132 : vector<32x32xf32>
    %134 = arith.addf %106, %133 : vector<32x32xf32>
    %c0_59 = arith.constant 0 : index
    %c6 = arith.constant 6 : index
    %c0_60 = arith.constant 0 : index
    %135 = vector.load %arg3[%c0_59, %c6, %c0_60] : memref<2x8x128xf32, #tpu.memory_space<vmem>>, vector<1x1x32xf32>
    %136 = vector.shape_cast %135 : vector<1x1x32xf32> to vector<1x32xf32>
    %c0_61 = arith.constant 0 : index
    %c7 = arith.constant 7 : index
    %c0_62 = arith.constant 0 : index
    %137 = vector.load %arg3[%c0_61, %c7, %c0_62] : memref<2x8x128xf32, #tpu.memory_space<vmem>>, vector<1x1x32xf32>
    %138 = vector.shape_cast %137 : vector<1x1x32xf32> to vector<1x32xf32>
    %cst_63 = arith.constant dense<0.000000e+00> : vector<32xf32>
    %139 = vector.multi_reduction <add>, %134, %cst_63 [1] : vector<32x32xf32> to vector<32xf32>
    %140 = vector.shape_cast %139 : vector<32xf32> to vector<32x1xf32>
    %cst_64 = arith.constant 3.200000e+01 : f32
    %141 = vector.broadcast %cst_64 : f32 to vector<32x1xf32>
    %142 = arith.divf %140, %141 : vector<32x1xf32>
    %143 = vector.broadcast %142 : vector<32x1xf32> to vector<32x32xf32>
    %144 = arith.subf %134, %143 : vector<32x32xf32>
    %145 = arith.mulf %144, %144 : vector<32x32xf32>
    %cst_65 = arith.constant dense<0.000000e+00> : vector<32xf32>
    %146 = vector.multi_reduction <add>, %145, %cst_65 [1] : vector<32x32xf32> to vector<32xf32>
    %147 = vector.shape_cast %146 : vector<32xf32> to vector<32x1xf32>
    %cst_66 = arith.constant 3.200000e+01 : f32
    %148 = vector.broadcast %cst_66 : f32 to vector<32x1xf32>
    %149 = arith.divf %147, %148 : vector<32x1xf32>
    %150 = vector.broadcast %142 : vector<32x1xf32> to vector<32x32xf32>
    %151 = arith.subf %134, %150 : vector<32x32xf32>
    %cst_67 = arith.constant 9.99999996E-13 : f32
    %152 = vector.broadcast %cst_67 : f32 to vector<32x1xf32>
    %153 = arith.addf %149, %152 : vector<32x1xf32>
    %154 = math.rsqrt %153 : vector<32x1xf32>
    %155 = vector.broadcast %154 : vector<32x1xf32> to vector<32x32xf32>
    %156 = arith.mulf %151, %155 : vector<32x32xf32>
    %157 = vector.broadcast %136 : vector<1x32xf32> to vector<32x32xf32>
    %158 = arith.mulf %156, %157 : vector<32x32xf32>
    %159 = vector.broadcast %138 : vector<1x32xf32> to vector<32x32xf32>
    %160 = arith.addf %158, %159 : vector<32x32xf32>
    %c1_68 = arith.constant 1 : index
    %c0_69 = arith.constant 0 : index
    %c0_70 = arith.constant 0 : index
    %161 = vector.load %arg2[%c1_68, %c0_69, %c0_70] : memref<2x224x128xf32, #tpu.memory_space<vmem>>, vector<1x32x128xf32>
    %162 = vector.shape_cast %161 : vector<1x32x128xf32> to vector<32x128xf32>
    %cst_71 = arith.constant dense<0.000000e+00> : vector<32x128xf32>
    %163 = tpu.matmul %160, %162, %cst_71 {dimension_numbers = #tpu.dot_dimension_numbers<[1], [0], [0], [1], [0, 0, 1, 1], [], []>} : vector<32x32xf32>, vector<32x128xf32>, vector<32x128xf32> -> vector<32x128xf32>
    %c1_72 = arith.constant 1 : index
    %c0_73 = arith.constant 0 : index
    %c0_74 = arith.constant 0 : index
    %164 = vector.load %arg3[%c1_72, %c0_73, %c0_74] : memref<2x8x128xf32, #tpu.memory_space<vmem>>, vector<1x1x128xf32>
    %165 = vector.shape_cast %164 : vector<1x1x128xf32> to vector<1x128xf32>
    %166 = vector.broadcast %165 : vector<1x128xf32> to vector<32x128xf32>
    %167 = arith.addf %163, %166 : vector<32x128xf32>
    %168 = vector.extract_strided_slice %167 {offsets = [0, 0], sizes = [32, 16], strides = [1, 1]} : vector<32x128xf32> to vector<32x16xf32>
    %169 = vector.extract_strided_slice %167 {offsets = [0, 16], sizes = [32, 16], strides = [1, 1]} : vector<32x128xf32> to vector<32x16xf32>
    %170 = vector.extract_strided_slice %167 {offsets = [0, 32], sizes = [32, 16], strides = [1, 1]} : vector<32x128xf32> to vector<32x16xf32>
    "tpu.trace_start"() <{level = 10 : i32, message = "qd,kd->qk"}> : () -> ()
    %cst_75 = arith.constant dense<0.000000e+00> : vector<32x32xf32>
    %171 = tpu.matmul %168, %169, %cst_75 {dimension_numbers = #tpu.dot_dimension_numbers<[1], [1], [0], [0], [0, 0, 1, 0], [], []>} : vector<32x16xf32>, vector<32x16xf32>, vector<32x32xf32> -> vector<32x32xf32>
    "tpu.trace_stop"() : () -> ()
    %cst_76 = arith.constant 2.500000e-01 : f32
    %172 = vector.broadcast %cst_76 : f32 to vector<32x32xf32>
    %173 = arith.mulf %171, %172 : vector<32x32xf32>
    %174 = arith.addf %173, %25 : vector<32x32xf32>
    %cst_77 = arith.constant dense<0xFF800000> : vector<32xf32>
    %175 = vector.multi_reduction <maximumf>, %174, %cst_77 [1] : vector<32x32xf32> to vector<32xf32>
    %176 = vector.shape_cast %175 : vector<32xf32> to vector<32x1xf32>
    %177 = vector.broadcast %176 : vector<32x1xf32> to vector<32x32xf32>
    %178 = arith.subf %174, %177 : vector<32x32xf32>
    %179 = math.exp %178 : vector<32x32xf32>
    %cst_78 = arith.constant dense<0.000000e+00> : vector<32xf32>
    %180 = vector.multi_reduction <add>, %179, %cst_78 [1] : vector<32x32xf32> to vector<32xf32>
    %181 = vector.shape_cast %180 : vector<32xf32> to vector<32x1xf32>
    %182 = tpu.reciprocal %181 {approx = true} : vector<32x1xf32> -> vector<32x1xf32>
    %183 = vector.broadcast %182 : vector<32x1xf32> to vector<32x32xf32>
    %184 = arith.mulf %179, %183 : vector<32x32xf32>
    %cst_79 = arith.constant dense<0.000000e+00> : vector<32x16xf32>
    %185 = tpu.matmul %184, %170, %cst_79 {dimension_numbers = #tpu.dot_dimension_numbers<[1], [0], [0], [1], [0, 0, 1, 1], [], []>} : vector<32x32xf32>, vector<32x16xf32>, vector<32x16xf32> -> vector<32x16xf32>
    %c1_80 = arith.constant 1 : index
    %c32_81 = arith.constant 32 : index
    %c0_82 = arith.constant 0 : index
    %186 = vector.load %arg2[%c1_80, %c32_81, %c0_82] : memref<2x224x128xf32, #tpu.memory_space<vmem>>, vector<1x16x32xf32>
    %187 = vector.shape_cast %186 : vector<1x16x32xf32> to vector<16x32xf32>
    %cst_83 = arith.constant dense<0.000000e+00> : vector<32x32xf32>
    %188 = tpu.matmul %185, %187, %cst_83 {dimension_numbers = #tpu.dot_dimension_numbers<[1], [0], [0], [1], [0, 0, 1, 1], [], []>} : vector<32x16xf32>, vector<16x32xf32>, vector<32x32xf32> -> vector<32x32xf32>
    %189 = vector.extract_strided_slice %167 {offsets = [0, 48], sizes = [32, 16], strides = [1, 1]} : vector<32x128xf32> to vector<32x16xf32>
    %190 = vector.extract_strided_slice %167 {offsets = [0, 64], sizes = [32, 16], strides = [1, 1]} : vector<32x128xf32> to vector<32x16xf32>
    %191 = vector.extract_strided_slice %167 {offsets = [0, 80], sizes = [32, 16], strides = [1, 1]} : vector<32x128xf32> to vector<32x16xf32>
    "tpu.trace_start"() <{level = 10 : i32, message = "qd,kd->qk"}> : () -> ()
    %cst_84 = arith.constant dense<0.000000e+00> : vector<32x32xf32>
    %192 = tpu.matmul %189, %190, %cst_84 {dimension_numbers = #tpu.dot_dimension_numbers<[1], [1], [0], [0], [0, 0, 1, 0], [], []>} : vector<32x16xf32>, vector<32x16xf32>, vector<32x32xf32> -> vector<32x32xf32>
    "tpu.trace_stop"() : () -> ()
    %cst_85 = arith.constant 2.500000e-01 : f32
    %193 = vector.broadcast %cst_85 : f32 to vector<32x32xf32>
    %194 = arith.mulf %192, %193 : vector<32x32xf32>
    %195 = arith.addf %194, %25 : vector<32x32xf32>
    %cst_86 = arith.constant dense<0xFF800000> : vector<32xf32>
    %196 = vector.multi_reduction <maximumf>, %195, %cst_86 [1] : vector<32x32xf32> to vector<32xf32>
    %197 = vector.shape_cast %196 : vector<32xf32> to vector<32x1xf32>
    %198 = vector.broadcast %197 : vector<32x1xf32> to vector<32x32xf32>
    %199 = arith.subf %195, %198 : vector<32x32xf32>
    %200 = math.exp %199 : vector<32x32xf32>
    %cst_87 = arith.constant dense<0.000000e+00> : vector<32xf32>
    %201 = vector.multi_reduction <add>, %200, %cst_87 [1] : vector<32x32xf32> to vector<32xf32>
    %202 = vector.shape_cast %201 : vector<32xf32> to vector<32x1xf32>
    %203 = tpu.reciprocal %202 {approx = true} : vector<32x1xf32> -> vector<32x1xf32>
    %204 = vector.broadcast %203 : vector<32x1xf32> to vector<32x32xf32>
    %205 = arith.mulf %200, %204 : vector<32x32xf32>
    %cst_88 = arith.constant dense<0.000000e+00> : vector<32x16xf32>
    %206 = tpu.matmul %205, %191, %cst_88 {dimension_numbers = #tpu.dot_dimension_numbers<[1], [0], [0], [1], [0, 0, 1, 1], [], []>} : vector<32x32xf32>, vector<32x16xf32>, vector<32x16xf32> -> vector<32x16xf32>
    %c1_89 = arith.constant 1 : index
    %c48_90 = arith.constant 48 : index
    %c0_91 = arith.constant 0 : index
    %207 = vector.load %arg2[%c1_89, %c48_90, %c0_91] : memref<2x224x128xf32, #tpu.memory_space<vmem>>, vector<1x16x32xf32>
    %208 = vector.shape_cast %207 : vector<1x16x32xf32> to vector<16x32xf32>
    %cst_92 = arith.constant dense<0.000000e+00> : vector<32x32xf32>
    %209 = tpu.matmul %206, %208, %cst_92 {dimension_numbers = #tpu.dot_dimension_numbers<[1], [0], [0], [1], [0, 0, 1, 1], [], []>} : vector<32x16xf32>, vector<16x32xf32>, vector<32x32xf32> -> vector<32x32xf32>
    %210 = arith.addf %188, %209 : vector<32x32xf32>
    %c1_93 = arith.constant 1 : index
    %c1_94 = arith.constant 1 : index
    %c0_95 = arith.constant 0 : index
    %211 = vector.load %arg3[%c1_93, %c1_94, %c0_95] : memref<2x8x128xf32, #tpu.memory_space<vmem>>, vector<1x1x32xf32>
    %212 = vector.shape_cast %211 : vector<1x1x32xf32> to vector<1x32xf32>
    %213 = vector.broadcast %212 : vector<1x32xf32> to vector<32x32xf32>
    %214 = arith.addf %210, %213 : vector<32x32xf32>
    %215 = arith.addf %160, %214 : vector<32x32xf32>
    %c1_96 = arith.constant 1 : index
    %c2_97 = arith.constant 2 : index
    %c0_98 = arith.constant 0 : index
    %216 = vector.load %arg3[%c1_96, %c2_97, %c0_98] : memref<2x8x128xf32, #tpu.memory_space<vmem>>, vector<1x1x32xf32>
    %217 = vector.shape_cast %216 : vector<1x1x32xf32> to vector<1x32xf32>
    %c1_99 = arith.constant 1 : index
    %c3_100 = arith.constant 3 : index
    %c0_101 = arith.constant 0 : index
    %218 = vector.load %arg3[%c1_99, %c3_100, %c0_101] : memref<2x8x128xf32, #tpu.memory_space<vmem>>, vector<1x1x32xf32>
    %219 = vector.shape_cast %218 : vector<1x1x32xf32> to vector<1x32xf32>
    %cst_102 = arith.constant dense<0.000000e+00> : vector<32xf32>
    %220 = vector.multi_reduction <add>, %215, %cst_102 [1] : vector<32x32xf32> to vector<32xf32>
    %221 = vector.shape_cast %220 : vector<32xf32> to vector<32x1xf32>
    %cst_103 = arith.constant 3.200000e+01 : f32
    %222 = vector.broadcast %cst_103 : f32 to vector<32x1xf32>
    %223 = arith.divf %221, %222 : vector<32x1xf32>
    %224 = vector.broadcast %223 : vector<32x1xf32> to vector<32x32xf32>
    %225 = arith.subf %215, %224 : vector<32x32xf32>
    %226 = arith.mulf %225, %225 : vector<32x32xf32>
    %cst_104 = arith.constant dense<0.000000e+00> : vector<32xf32>
    %227 = vector.multi_reduction <add>, %226, %cst_104 [1] : vector<32x32xf32> to vector<32xf32>
    %228 = vector.shape_cast %227 : vector<32xf32> to vector<32x1xf32>
    %cst_105 = arith.constant 3.200000e+01 : f32
    %229 = vector.broadcast %cst_105 : f32 to vector<32x1xf32>
    %230 = arith.divf %228, %229 : vector<32x1xf32>
    %231 = vector.broadcast %223 : vector<32x1xf32> to vector<32x32xf32>
    %232 = arith.subf %215, %231 : vector<32x32xf32>
    %cst_106 = arith.constant 9.99999996E-13 : f32
    %233 = vector.broadcast %cst_106 : f32 to vector<32x1xf32>
    %234 = arith.addf %230, %233 : vector<32x1xf32>
    %235 = math.rsqrt %234 : vector<32x1xf32>
    %236 = vector.broadcast %235 : vector<32x1xf32> to vector<32x32xf32>
    %237 = arith.mulf %232, %236 : vector<32x32xf32>
    %238 = vector.broadcast %217 : vector<1x32xf32> to vector<32x32xf32>
    %239 = arith.mulf %237, %238 : vector<32x32xf32>
    %240 = vector.broadcast %219 : vector<1x32xf32> to vector<32x32xf32>
    %241 = arith.addf %239, %240 : vector<32x32xf32>
    %c1_107 = arith.constant 1 : index
    %c64_108 = arith.constant 64 : index
    %c0_109 = arith.constant 0 : index
    %242 = vector.load %arg2[%c1_107, %c64_108, %c0_109] : memref<2x224x128xf32, #tpu.memory_space<vmem>>, vector<1x32x128xf32>
    %243 = vector.shape_cast %242 : vector<1x32x128xf32> to vector<32x128xf32>
    %cst_110 = arith.constant dense<0.000000e+00> : vector<32x128xf32>
    %244 = tpu.matmul %241, %243, %cst_110 {dimension_numbers = #tpu.dot_dimension_numbers<[1], [0], [0], [1], [0, 0, 1, 1], [], []>} : vector<32x32xf32>, vector<32x128xf32>, vector<32x128xf32> -> vector<32x128xf32>
    %c1_111 = arith.constant 1 : index
    %c4_112 = arith.constant 4 : index
    %c0_113 = arith.constant 0 : index
    %245 = vector.load %arg3[%c1_111, %c4_112, %c0_113] : memref<2x8x128xf32, #tpu.memory_space<vmem>>, vector<1x1x128xf32>
    %246 = vector.shape_cast %245 : vector<1x1x128xf32> to vector<1x128xf32>
    %247 = vector.broadcast %246 : vector<1x128xf32> to vector<32x128xf32>
    %248 = arith.addf %244, %247 : vector<32x128xf32>
    %249 = arith.mulf %248, %248 : vector<32x128xf32>
    %250 = arith.mulf %248, %249 : vector<32x128xf32>
    %cst_114 = arith.constant 4.471500e-02 : f32
    %251 = vector.broadcast %cst_114 : f32 to vector<32x128xf32>
    %252 = arith.mulf %251, %250 : vector<32x128xf32>
    %253 = arith.addf %248, %252 : vector<32x128xf32>
    %cst_115 = arith.constant 0.797884583 : f32
    %254 = vector.broadcast %cst_115 : f32 to vector<32x128xf32>
    %255 = arith.mulf %254, %253 : vector<32x128xf32>
    %256 = math.tanh %255 : vector<32x128xf32>
    %cst_116 = arith.constant 1.000000e+00 : f32
    %257 = vector.broadcast %cst_116 : f32 to vector<32x128xf32>
    %258 = arith.addf %257, %256 : vector<32x128xf32>
    %cst_117 = arith.constant 5.000000e-01 : f32
    %259 = vector.broadcast %cst_117 : f32 to vector<32x128xf32>
    %260 = arith.mulf %259, %258 : vector<32x128xf32>
    %261 = arith.mulf %248, %260 : vector<32x128xf32>
    %c1_118 = arith.constant 1 : index
    %c96_119 = arith.constant 96 : index
    %c0_120 = arith.constant 0 : index
    %262 = vector.load %arg2[%c1_118, %c96_119, %c0_120] : memref<2x224x128xf32, #tpu.memory_space<vmem>>, vector<1x128x32xf32>
    %263 = vector.shape_cast %262 : vector<1x128x32xf32> to vector<128x32xf32>
    %cst_121 = arith.constant dense<0.000000e+00> : vector<32x32xf32>
    %264 = tpu.matmul %261, %263, %cst_121 {dimension_numbers = #tpu.dot_dimension_numbers<[1], [0], [0], [1], [0, 0, 1, 1], [], []>} : vector<32x128xf32>, vector<128x32xf32>, vector<32x32xf32> -> vector<32x32xf32>
    %c1_122 = arith.constant 1 : index
    %c5_123 = arith.constant 5 : index
    %c0_124 = arith.constant 0 : index
    %265 = vector.load %arg3[%c1_122, %c5_123, %c0_124] : memref<2x8x128xf32, #tpu.memory_space<vmem>>, vector<1x1x32xf32>
    %266 = vector.shape_cast %265 : vector<1x1x32xf32> to vector<1x32xf32>
    %267 = vector.broadcast %266 : vector<1x32xf32> to vector<32x32xf32>
    %268 = arith.addf %264, %267 : vector<32x32xf32>
    %269 = arith.addf %241, %268 : vector<32x32xf32>
    %c1_125 = arith.constant 1 : index
    %c6_126 = arith.constant 6 : index
    %c0_127 = arith.constant 0 : index
    %270 = vector.load %arg3[%c1_125, %c6_126, %c0_127] : memref<2x8x128xf32, #tpu.memory_space<vmem>>, vector<1x1x32xf32>
    %271 = vector.shape_cast %270 : vector<1x1x32xf32> to vector<1x32xf32>
    %c1_128 = arith.constant 1 : index
    %c7_129 = arith.constant 7 : index
    %c0_130 = arith.constant 0 : index
    %272 = vector.load %arg3[%c1_128, %c7_129, %c0_130] : memref<2x8x128xf32, #tpu.memory_space<vmem>>, vector<1x1x32xf32>
    %273 = vector.shape_cast %272 : vector<1x1x32xf32> to vector<1x32xf32>
    %cst_131 = arith.constant dense<0.000000e+00> : vector<32xf32>
    %274 = vector.multi_reduction <add>, %269, %cst_131 [1] : vector<32x32xf32> to vector<32xf32>
    %275 = vector.shape_cast %274 : vector<32xf32> to vector<32x1xf32>
    %cst_132 = arith.constant 3.200000e+01 : f32
    %276 = vector.broadcast %cst_132 : f32 to vector<32x1xf32>
    %277 = arith.divf %275, %276 : vector<32x1xf32>
    %278 = vector.broadcast %277 : vector<32x1xf32> to vector<32x32xf32>
    %279 = arith.subf %269, %278 : vector<32x32xf32>
    %280 = arith.mulf %279, %279 : vector<32x32xf32>
    %cst_133 = arith.constant dense<0.000000e+00> : vector<32xf32>
    %281 = vector.multi_reduction <add>, %280, %cst_133 [1] : vector<32x32xf32> to vector<32xf32>
    %282 = vector.shape_cast %281 : vector<32xf32> to vector<32x1xf32>
    %cst_134 = arith.constant 3.200000e+01 : f32
    %283 = vector.broadcast %cst_134 : f32 to vector<32x1xf32>
    %284 = arith.divf %282, %283 : vector<32x1xf32>
    %285 = vector.broadcast %277 : vector<32x1xf32> to vector<32x32xf32>
    %286 = arith.subf %269, %285 : vector<32x32xf32>
    %cst_135 = arith.constant 9.99999996E-13 : f32
    %287 = vector.broadcast %cst_135 : f32 to vector<32x1xf32>
    %288 = arith.addf %284, %287 : vector<32x1xf32>
    %289 = math.rsqrt %288 : vector<32x1xf32>
    %290 = vector.broadcast %289 : vector<32x1xf32> to vector<32x32xf32>
    %291 = arith.mulf %286, %290 : vector<32x32xf32>
    %292 = vector.broadcast %271 : vector<1x32xf32> to vector<32x32xf32>
    %293 = arith.mulf %291, %292 : vector<32x32xf32>
    %294 = vector.broadcast %273 : vector<1x32xf32> to vector<32x32xf32>
    %295 = arith.addf %293, %294 : vector<32x32xf32>
    %296 = vector.extract_strided_slice %295 {offsets = [0, 0], sizes = [16, 32], strides = [1, 1]} : vector<32x32xf32> to vector<16x32xf32>
    %297 = vector.extract_strided_slice %295 {offsets = [16, 0], sizes = [1, 32], strides = [1, 1]} : vector<32x32xf32> to vector<1x32xf32>
    %298 = vector.extract_strided_slice %295 {offsets = [24, 0], sizes = [1, 32], strides = [1, 1]} : vector<32x32xf32> to vector<1x32xf32>
    %299 = tpu.concatenate %297, %298 in 0 : vector<1x32xf32>, vector<1x32xf32> -> vector<2x32xf32>
    %c0_136 = arith.constant 0 : index
    %c0_137 = arith.constant 0 : index
    %300 = vector.load %arg4[%c0_136, %c0_137] : memref<74x128xf32, #tpu.memory_space<vmem>>, vector<32x32xf32>
    %cst_138 = arith.constant dense<0.000000e+00> : vector<2x32xf32>
    %301 = tpu.matmul %299, %300, %cst_138 {dimension_numbers = #tpu.dot_dimension_numbers<[1], [0], [0], [1], [0, 0, 1, 1], [], []>} : vector<2x32xf32>, vector<32x32xf32>, vector<2x32xf32> -> vector<2x32xf32>
    %c0_139 = arith.constant 0 : index
    %c0_140 = arith.constant 0 : index
    %302 = vector.load %arg5[%c0_139, %c0_140] : memref<8x128xf32, #tpu.memory_space<vmem>>, vector<1x32xf32>
    %303 = vector.broadcast %302 : vector<1x32xf32> to vector<2x32xf32>
    %304 = arith.addf %301, %303 : vector<2x32xf32>
    %305 = math.tanh %304 : vector<2x32xf32>
    %c32_141 = arith.constant 32 : index
    %c0_142 = arith.constant 0 : index
    %306 = vector.load %arg4[%c32_141, %c0_142] : memref<74x128xf32, #tpu.memory_space<vmem>>, vector<42x16xf32>
    %c32_143 = arith.constant 32 : index
    %c16 = arith.constant 16 : index
    %307 = vector.load %arg4[%c32_143, %c16] : memref<74x128xf32, #tpu.memory_space<vmem>>, vector<42x2xf32>
    %cst_144 = arith.constant dense<0.000000e+00> : vector<42x32xf32>
    %308 = tpu.matmul %306, %296, %cst_144 {dimension_numbers = #tpu.dot_dimension_numbers<[1], [0], [0], [1], [0, 0, 1, 1], [], []>} : vector<42x16xf32>, vector<16x32xf32>, vector<42x32xf32> -> vector<42x32xf32>
    %309 = vector.extract_strided_slice %307 {offsets = [0, 0], sizes = [42, 1], strides = [1, 1]} : vector<42x2xf32> to vector<42x1xf32>
    %310 = vector.extract_strided_slice %305 {offsets = [0, 0], sizes = [1, 32], strides = [1, 1]} : vector<2x32xf32> to vector<1x32xf32>
    %311 = vector.broadcast %309 : vector<42x1xf32> to vector<42x32xf32>
    %312 = vector.broadcast %310 : vector<1x32xf32> to vector<42x32xf32>
    %313 = arith.mulf %311, %312 : vector<42x32xf32>
    %314 = arith.addf %308, %313 : vector<42x32xf32>
    %315 = vector.extract_strided_slice %307 {offsets = [0, 1], sizes = [42, 1], strides = [1, 1]} : vector<42x2xf32> to vector<42x1xf32>
    %316 = vector.extract_strided_slice %305 {offsets = [1, 0], sizes = [1, 32], strides = [1, 1]} : vector<2x32xf32> to vector<1x32xf32>
    %317 = vector.broadcast %315 : vector<42x1xf32> to vector<42x32xf32>
    %318 = vector.broadcast %316 : vector<1x32xf32> to vector<42x32xf32>
    %319 = arith.mulf %317, %318 : vector<42x32xf32>
    %320 = arith.addf %314, %319 : vector<42x32xf32>
    %cst_145 = arith.constant 1.000000e+00 : f32
    %321 = vector.broadcast %cst_145 : f32 to vector<32x128xf32>
    %cst_146 = arith.constant dense<0.000000e+00> : vector<42x128xf32>
    %322 = tpu.matmul %320, %321, %cst_146 {dimension_numbers = #tpu.dot_dimension_numbers<[1], [0], [0], [1], [0, 0, 1, 1], [], []>} : vector<42x32xf32>, vector<32x128xf32>, vector<42x128xf32> -> vector<42x128xf32>
    %cst_147 = arith.constant 0.000000e+00 : f32
    %323 = vector.broadcast %cst_147 : f32 to vector<42x128xf32>
    %324 = arith.maximumf %322, %323 : vector<42x128xf32>
    %c3_148 = arith.constant 3 : index
    %c0_149 = arith.constant 0 : index
    %325 = vector.load %arg5[%c3_148, %c0_149] : memref<8x128xf32, #tpu.memory_space<vmem>>, vector<1x128xf32>
    %c0_150 = arith.constant 0 : index
    %c0_151 = arith.constant 0 : index
    %326 = vector.load %arg6[%c0_150, %c0_151] : memref<42x6xf32, #tpu.memory_space<vmem>>, vector<42x1xf32>
    %327 = vector.broadcast %326 : vector<42x1xf32> to vector<42x128xf32>
    %328 = arith.mulf %324, %327 : vector<42x128xf32>
    %cst_152 = arith.constant dense<0xFF800000> : vector<128xf32>
    %329 = vector.multi_reduction <maximumf>, %328, %cst_152 [0] : vector<42x128xf32> to vector<128xf32>
    %330 = vector.shape_cast %329 : vector<128xf32> to vector<1x128xf32>
    %c4_153 = arith.constant 4 : index
    %c0_154 = arith.constant 0 : index
    %331 = vector.load %arg5[%c4_153, %c0_154] : memref<8x128xf32, #tpu.memory_space<vmem>>, vector<1x128xf32>
    %332 = arith.mulf %330, %331 : vector<1x128xf32>
    %333 = arith.addf %325, %332 : vector<1x128xf32>
    %c0_155 = arith.constant 0 : index
    %c1_156 = arith.constant 1 : index
    %334 = vector.load %arg6[%c0_155, %c1_156] : memref<42x6xf32, #tpu.memory_space<vmem>>, vector<42x1xf32>
    %335 = vector.broadcast %334 : vector<42x1xf32> to vector<42x128xf32>
    %336 = arith.mulf %324, %335 : vector<42x128xf32>
    %cst_157 = arith.constant dense<0xFF800000> : vector<128xf32>
    %337 = vector.multi_reduction <maximumf>, %336, %cst_157 [0] : vector<42x128xf32> to vector<128xf32>
    %338 = vector.shape_cast %337 : vector<128xf32> to vector<1x128xf32>
    %c5_158 = arith.constant 5 : index
    %c0_159 = arith.constant 0 : index
    %339 = vector.load %arg5[%c5_158, %c0_159] : memref<8x128xf32, #tpu.memory_space<vmem>>, vector<1x128xf32>
    %340 = arith.mulf %338, %339 : vector<1x128xf32>
    %341 = arith.addf %333, %340 : vector<1x128xf32>
    %c0_160 = arith.constant 0 : index
    %c2_161 = arith.constant 2 : index
    %342 = vector.load %arg6[%c0_160, %c2_161] : memref<42x6xf32, #tpu.memory_space<vmem>>, vector<42x1xf32>
    %343 = vector.broadcast %342 : vector<42x1xf32> to vector<42x128xf32>
    %344 = arith.mulf %324, %343 : vector<42x128xf32>
    %cst_162 = arith.constant dense<0xFF800000> : vector<128xf32>
    %345 = vector.multi_reduction <maximumf>, %344, %cst_162 [0] : vector<42x128xf32> to vector<128xf32>
    %346 = vector.shape_cast %345 : vector<128xf32> to vector<1x128xf32>
    %c6_163 = arith.constant 6 : index
    %c0_164 = arith.constant 0 : index
    %347 = vector.load %arg5[%c6_163, %c0_164] : memref<8x128xf32, #tpu.memory_space<vmem>>, vector<1x128xf32>
    %348 = arith.mulf %346, %347 : vector<1x128xf32>
    %349 = arith.addf %341, %348 : vector<1x128xf32>
    %c0_165 = arith.constant 0 : index
    %c3_166 = arith.constant 3 : index
    %350 = vector.load %arg6[%c0_165, %c3_166] : memref<42x6xf32, #tpu.memory_space<vmem>>, vector<42x1xf32>
    %351 = vector.broadcast %350 : vector<42x1xf32> to vector<42x128xf32>
    %352 = arith.mulf %324, %351 : vector<42x128xf32>
    %cst_167 = arith.constant dense<0xFF800000> : vector<128xf32>
    %353 = vector.multi_reduction <maximumf>, %352, %cst_167 [0] : vector<42x128xf32> to vector<128xf32>
    %354 = vector.shape_cast %353 : vector<128xf32> to vector<1x128xf32>
    %c4_168 = arith.constant 4 : index
    %c0_169 = arith.constant 0 : index
    %355 = vector.load %arg5[%c4_168, %c0_169] : memref<8x128xf32, #tpu.memory_space<vmem>>, vector<1x128xf32>
    %356 = arith.mulf %354, %355 : vector<1x128xf32>
    %357 = arith.addf %325, %356 : vector<1x128xf32>
    %c0_170 = arith.constant 0 : index
    %c4_171 = arith.constant 4 : index
    %358 = vector.load %arg6[%c0_170, %c4_171] : memref<42x6xf32, #tpu.memory_space<vmem>>, vector<42x1xf32>
    %359 = vector.broadcast %358 : vector<42x1xf32> to vector<42x128xf32>
    %360 = arith.mulf %324, %359 : vector<42x128xf32>
    %cst_172 = arith.constant dense<0xFF800000> : vector<128xf32>
    %361 = vector.multi_reduction <maximumf>, %360, %cst_172 [0] : vector<42x128xf32> to vector<128xf32>
    %362 = vector.shape_cast %361 : vector<128xf32> to vector<1x128xf32>
    %c5_173 = arith.constant 5 : index
    %c0_174 = arith.constant 0 : index
    %363 = vector.load %arg5[%c5_173, %c0_174] : memref<8x128xf32, #tpu.memory_space<vmem>>, vector<1x128xf32>
    %364 = arith.mulf %362, %363 : vector<1x128xf32>
    %365 = arith.addf %357, %364 : vector<1x128xf32>
    %c0_175 = arith.constant 0 : index
    %c5_176 = arith.constant 5 : index
    %366 = vector.load %arg6[%c0_175, %c5_176] : memref<42x6xf32, #tpu.memory_space<vmem>>, vector<42x1xf32>
    %367 = vector.broadcast %366 : vector<42x1xf32> to vector<42x128xf32>
    %368 = arith.mulf %324, %367 : vector<42x128xf32>
    %cst_177 = arith.constant dense<0xFF800000> : vector<128xf32>
    %369 = vector.multi_reduction <maximumf>, %368, %cst_177 [0] : vector<42x128xf32> to vector<128xf32>
    %370 = vector.shape_cast %369 : vector<128xf32> to vector<1x128xf32>
    %c6_178 = arith.constant 6 : index
    %c0_179 = arith.constant 0 : index
    %371 = vector.load %arg5[%c6_178, %c0_179] : memref<8x128xf32, #tpu.memory_space<vmem>>, vector<1x128xf32>
    %372 = arith.mulf %370, %371 : vector<1x128xf32>
    %373 = arith.addf %365, %372 : vector<1x128xf32>
    %374 = tpu.concatenate %349, %373 in 0 : vector<1x128xf32>, vector<1x128xf32> -> vector<2x128xf32>
    %c0_180 = arith.constant 0 : index
    %c0_181 = arith.constant 0 : index
    %375 = vector.load %arg7[%c0_180, %c0_181] : memref<2x128xf32, #tpu.memory_space<vmem>>, vector<2x128xf32>
    tpu.vector_store %arg7[%c0_180, %c0_181], %374 {strides = array<i32>} : memref<2x128xf32, #tpu.memory_space<vmem>>, vector<2x128xf32>,
    return
  }
}

</mosaic_0001>

<bundles_post_ra>
// kernel: eq.8
= control target key start
LH: loop header
LB: loop body
LE: loop exit
PB: predicated region body
PF: predicated region fallthrough
CT: control target
= control target key end

     0   :  { %vm7_vm0 = vcmask 64512   ;;  %s37_s8 = smov 8   ;;  %s38_s9 = smov 16   ;;  %vm13_vm1 = vcmask 261312   ;;  %vm19_vm2 = vcmask 195712   ;;  %vm25_vm3 = vcmask 130112   ;;  %s55_s0 = inlined_call_operand.vmem [shape: s32[4,8], index: 0, kind: input, shape index: {}]   ;;  %s56_s1 = inlined_call_operand.vmem [shape: s32[32], index: 1, kind: output, shape index: {}]  }
   0x1   :  { %v4_v0 = vld [vmem:[%s55_s0] sm:$0xf]  ;;  %s36_s0 = smov 24  }
   0x2   :  { %5 = vst [vmem:[#allocation1] sm:$0xf] %v4_v0 }
   0x9   :  { %v10_v1 = vld [vmem:[#allocation1 + $0x3] sm:$0x1]   ;;  %v22_v2 = vld [vmem:[#allocation1 + $0x1] sm:$0x1]   ;;  %v6_v3 = vld [vmem:[#allocation1] sm:$0x1]  }
   0xa   :  { %11 = vrot.lane.b32.xlu0 %v10_v1, %s36_s0  ;;  %23 = vrot.lane.b32.xlu1 %v22_v2, %s37_s8  ;;  %v16_v4 = vld [vmem:[#allocation1 + $0x2] sm:$0x1]   ;;  %8 = vst.msk [vmem:[#allocation0] sm:$0x1] %vm7_vm0, %v6_v3  }
   0xe   :  { %17 = vrot.lane.b32.xlu0 %v16_v4, %s38_s9 }
  0x7c   :  { %v12_v5 = vpop.permute.xlu0 %11   ;;  %v24_v6 = vpop.permute.xlu1 %23  }
  0x7d   :  { %14 = vst.msk [vmem:[#allocation0] sm:$0x1] %vm13_vm1, %v12_v5  }
  0x80   :  { %v18_v7 = vpop.permute.xlu0 %17  }
  0x81   :  { %20 = vst.msk [vmem:[#allocation0] sm:$0x1] %vm19_vm2, %v18_v7  }
  0x82   :  { %26 = vst.msk [vmem:[#allocation0] sm:$0x1] %vm25_vm3, %v24_v6  }
  0x89   :  { %v30_v8 = vld [vmem:[#allocation0] sm:$0x1] }
  0x8a   :  { %32 = vst [vmem:[%s56_s1] sm:$0x1] %v30_v8 }

// kernel: tc_swem_forward.1
= control target key start
LH: loop header
LB: loop body
LE: loop exit
PB: predicated region body
PF: predicated region fallthrough
CT: control target
= control target key end

     0   :  { %vm33_vm0 = vcmask 261120   ;;  %s5334_s0 = inlined_call_operand.vmem [shape: f32[32,32], index: 0, kind: input, shape index: {}]   ;;  %s5335_s1 = inlined_call_operand.vmem [shape: f32[32,32], index: 1, kind: input, shape index: {}]   ;;  %s5336_s2 = inlined_call_operand.vmem [shape: f32[2,224,128], index: 2, kind: input, shape index: {}]   ;;  %s5337_s3 = inlined_call_operand.vmem [shape: f32[2,8,128], index: 3, kind: input, shape index: {}]   ;;  %s5338_s4 = inlined_call_operand.vmem [shape: f32[74,128], index: 4, kind: input, shape index: {}]   ;;  %s5339_s5 = inlined_call_operand.vmem [shape: f32[8,128], index: 5, kind: input, shape index: {}]   ;;  %s5340_s6 = inlined_call_operand.vmem [shape: f32[42,6], index: 6, kind: input, shape index: {}]   ;;  %s5341_s7 = inlined_call_operand.hbm [shape: f32[2,128], index: 7, kind: output, shape index: {}]  }
   0x1   :  { %v27_v0 = vld [vmem:[%s5334_s0] sm:$0xff]  ;;  %v29_v1 = vld [vmem:[%s5334_s0 + $0x10] sm:$0xff]  ;;  %v28_v2 = vld [vmem:[%s5334_s0 + $0x8] sm:$0xff] }
   0x2   :  { %v34_v3 = vsel %vm33_vm0, %v27_v0, 0.0  ;;  %v40_v4 = vsel %vm33_vm0, %v29_v1, 0.0  ;;  %v30_v5 = vld [vmem:[%s5334_s0 + $0x18] sm:$0xff] }
   0x3   :  { %12 = vsyncpa [#allocation3], 0  ;;  %35 = vadd.xlane.f32.xlu0 %v34_v3  ;;  %41 = vadd.xlane.f32.xlu1 %v40_v4  ;;  %v37_v6 = vsel %vm33_vm0, %v28_v2, 0.0  ;;  %v43_v7 = vsel %vm33_vm0, %v30_v5, 0.0  ;;  %v107_v28 = vld [vmem:[%s5336_s2] sm:$0xff]  ;;  %v108_v29 = vld [vmem:[%s5336_s2 + $0x8] sm:$0xff] }
   0x4   :  { %v109_v30 = vld [vmem:[%s5336_s2 + $0x10] sm:$0xff]  ;;  %v3988_v31 = vpack.c.bf16 %v108_v29, %v107_v28  ;;  %v110_v32 = vld [vmem:[%s5336_s2 + $0x18] sm:$0xff]  ;;  %v3332_v47 = vld [vmem:[%s5339_s5 + $0x1] ss:$0 sm:$0xff]  ;;  %vm225_vm1 = vcmask 130048   ;;  %s4472_s22 = smov 112  }
   0x5   :  { %v3992_v33 = vpack.c.bf16 %v110_v32, %v109_v30  ;;  %v3333_v49 = vld [vmem:[%s5339_s5 + $0x2] ss:$0 sm:$0xff]  ;;  %vm4611_vm2 = vmpackc.low %vm225_vm1, %vm225_vm1  ;;  %v4644_v29 = vld [vmem:[%s5335_s1 + $0x18] sm:$0xff]  ;;  %s4473_s8 = smov 96   ;;  %s4474_s0 = smov 64   ;;  %vm4478_vm3 = vmmov 0  }
   0x6   :  { %3989 = vmatprep.subr.bf16.mxu0 %v3988_v31  ;;  %s4475_s9 = smov 80   ;;  %s4476_s10 = smov 48   ;;  %vm2635_vm4 = vcmask 1040384   ;;  %vm3076_vm5 = vcmask 1041408  }
   0x7   :  { %38 = vadd.xlane.f32.xlu0 %v37_v6  ;;  %44 = vadd.xlane.f32.xlu1 %v43_v7  ;;  %s4489_s11 = smov [#allocation2]  }
   0x8   :  { %3991 = vmatpush3.bf16.msra.mxu0 %v3988_v31 }
   0x9   :  { %3993 = vmatprep.subr.bf16.mxu0 %v3992_v33 }
   0xc   :  { %3995 = vmatpush3.bf16.msra.mxu0 %v3992_v33  ;;  %v4650_v33 = vld [vmem:[%s5335_s1 + $0x10] sm:$0xff] }
  0x90   :  { %v36_v8 = vpop.xlane.xlu0 %35  ;;  %v42_v9 = vpop.xlane.xlu1 %41 }
  0x91   :  { %v47_v10 = vmul.f32 0.03125, %v36_v8  ;;  %v49_v11 = vmul.f32 0.03125, %v42_v9 }
  0x93   :  { %v51_v12 = vsub.f32 %v27_v0, %v47_v10  ;;  %v53_v13 = vsub.f32 %v29_v1, %v49_v11  ;;  %v3334_v0 = vld [vmem:[%s5337_s3] ss:$0 sm:$0xff] }
  0x94   :  { %v39_v14 = vpop.xlane.xlu0 %38  ;;  %v45_v15 = vpop.xlane.xlu1 %44 }
  0x95   :  { %v48_v16 = vmul.f32 0.03125, %v39_v14  ;;  %v50_v17 = vmul.f32 0.03125, %v45_v15  ;;  %v55_v18 = vmul.f32 %v51_v12, %v51_v12  ;;  %v57_v19 = vmul.f32 %v53_v13, %v53_v13  ;;  %v4444_v14 = vld [vmem:[%s5335_s1 + $0x8] sm:$0xff] }
  0x97   :  { %v52_v20 = vsub.f32 %v28_v2, %v48_v16  ;;  %v54_v21 = vsub.f32 %v30_v5, %v50_v17  ;;  %v59_v22 = vsel %vm33_vm0, %v55_v18, 0.0  ;;  %v65_v23 = vsel %vm33_vm0, %v57_v19, 0.0 }
  0x98   :  { %60 = vadd.xlane.f32.xlu0 %v59_v22 }
  0x99   :  { %v56_v24 = vmul.f32 %v52_v20, %v52_v20  ;;  %v58_v25 = vmul.f32 %v54_v21, %v54_v21 }
  0x9b   :  { %v62_v26 = vsel %vm33_vm0, %v56_v24, 0.0  ;;  %v68_v27 = vsel %vm33_vm0, %v58_v25, 0.0  ;;  %v4637_v24 = vld [vmem:[%s5335_s1] sm:$0xff] }
  0x9c   :  { %66 = vadd.xlane.f32.xlu0 %v65_v23  ;;  %63 = vadd.xlane.f32.xlu1 %v62_v26 }
  0xa0   :  { %69 = vadd.xlane.f32.xlu1 %v68_v27 }
 0x125   :  { %v61_v34 = vpop.xlane.xlu0 %60 }
 0x126   :  { %v71_v35 = vmul.f32 0.03125, %v61_v34 }
 0x128   :  { %v75_v36 = vadd.f32 1e-12, %v71_v35 }
 0x129   :  { %v64_v37 = vpop.xlane.xlu1 %63  ;;  %v67_v38 = vpop.xlane.xlu0 %66 }
 0x12a   :  { %4322 = vrsqrt.f32 %v75_v36  ;;  %v72_v39 = vmul.f32 0.03125, %v64_v37  ;;  %v73_v40 = vmul.f32 0.03125, %v67_v38 }
 0x12c   :  { %v76_v41 = vadd.f32 1e-12, %v72_v39  ;;  %v77_v42 = vadd.f32 1e-12, %v73_v40 }
 0x12d   :  { %v70_v43 = vpop.xlane.xlu1 %69 }
 0x12e   :  { %4324 = vrsqrt.f32 %v76_v41  ;;  %v74_v44 = vmul.f32 0.03125, %v70_v43 }
 0x12f   :  { %4326 = vrsqrt.f32 %v77_v42 }
 0x130   :  { %v78_v45 = vadd.f32 1e-12, %v74_v44 }
 0x132   :  { %4328 = vrsqrt.f32 %v78_v45 }
 0x134   :  { %v4323_v46 = vpop.eup %4322 }
 0x135   :  { %v83_v48 = vmul.f32 %v4323_v46, %v51_v12 }
 0x137   :  { %v91_v50 = vmul.f32 %v3332_v47, %v83_v48 }
 0x138   :  { %v4325_v51 = vpop.eup %4324 }
 0x139   :  { %v4327_v52 = vpop.eup %4326  ;;  %v4568_v53 = vadd.f32 %v3333_v49, %v91_v50  ;;  %v84_v54 = vmul.f32 %v4325_v51, %v52_v20 }
 0x13a   :  { %v85_v55 = vmul.f32 %v4327_v52, %v53_v13 }
 0x13b   :  { %3671 = vmatprep.mubr.msk.f32.mxu0 %vm33_vm0, %v4568_v53  ;;  %v92_v56 = vmul.f32 %v3332_v47, %v84_v54 }
 0x13c   :  { %v4329_v57 = vpop.eup %4328  ;;  %v93_v58 = vmul.f32 %v3332_v47, %v85_v55 }
 0x13d   :  { %v4572_v59 = vadd.f32 %v3333_v49, %v92_v56  ;;  %v86_v60 = vmul.f32 %v4329_v57, %v54_v21  ;;  %v4632_v21 = vld [vmem:[%s5335_s1 + $0x8] sm:$0xff] }
 0x13e   :  { %v4574_v61 = vadd.f32 %v3333_v49, %v93_v58 }
 0x13f   :  { %3672 = vmatmul.mubr.msk.f32.vlgmr.msra.gmra.mrb[0].mxu0 %vm33_vm0, %v4572_v59  ;;  %v94_v62 = vmul.f32 %v3332_v47, %v86_v60 }
 0x140   :  { %3674 = vmatprep.mubr.msk.f32.mxu0 %vm33_vm0, %v4574_v61 }
 0x141   :  { %v4580_v63 = vadd.f32 %v3333_v49, %v94_v62 }
 0x143   :  { %3675 = vmatmul.mubr.msk.f32.gmra.mrb[2].mxu0 %vm33_vm0, %v4580_v63 }
 0x212   :  { %v3673_v1 = vpop.f32.mrb[0].mxu0 }
 0x213   :  { %v4587_v2 = vadd.f32 %v3673_v1, %v3334_v0  ;;  %v194_v3 = vpop.f32.mrb[1].mxu0 }
 0x214   :  { %v4589_v4 = vadd.f32 %v3334_v0, %v194_v3 }
 0x216   :  { %v3676_v5 = vpop.f32.mrb[2].mxu0  ;;  %3685 = vmatprep.mubr.msk.f32.mxu1 %vm225_vm1, %v4589_v4  ;;  %v4595_v6 = vpack.i.bf16 %v4587_v2, %v4589_v4 }
 0x217   :  { %v4597_v7 = vadd.f32 %v3676_v5, %v3334_v0  ;;  %v204_v8 = vpop.f32.mrb[3].mxu0 }
 0x218   :  { %v4599_v9 = vadd.f32 %v3334_v0, %v204_v8  ;;  %4221 = vrot.lane.b32.xlu0 %v4595_v6, %s4472_s22 }
 0x21a   :  { %v4605_v10 = vpack.i.bf16 %v4597_v7, %v4599_v9 }
 0x21c   :  { %4226 = vrot.lane.b32.xlu1 %v4605_v10, %s4472_s22 }
 0x28a   :  { %v4222_v11 = vpop.permute.xlu0 %4221 }
 0x28b   :  { %v4224_v12 = vunpack.i.h.bf16 %v4222_v11  ;;  %v4223_v13 = vunpack.i.l.bf16 %v4222_v11 }
 0x28d   :  { %v3996_v15 = vpack.c.bf16 %v4224_v12, %v4223_v13 }
 0x28e   :  { %v4227_v16 = vpop.permute.xlu1 %4226 }
 0x28f   :  { %v4229_v17 = vunpack.i.h.bf16 %v4227_v16  ;;  %v4228_v18 = vunpack.i.l.bf16 %v4227_v16  ;;  %3998 = vmatprep.subr.msk.bf16.mxu1 %vm4611_vm2, %v3996_v15 }
 0x290   :  { %4001 = vmatpush3.bf16.xpose.msk.msra.mxu1 %vm4611_vm2, %v3996_v15 }
 0x291   :  { %v4002_v19 = vpack.c.bf16 %v4229_v17, %v4228_v18 }
 0x293   :  { %4004 = vmatprep.subr.msk.bf16.mxu1 %vm4611_vm2, %v4002_v19 }
 0x298   :  { %4007 = vmatpush3.bf16.xpose.msk.msra.mxu1 %vm4611_vm2, %v4002_v19 }
 0x29f   :  { %3686 = vmatmul.mubr.msk.f32.vlgmr.msra.gmra.mrb[0].mxu1 %vm225_vm1, %v4587_v2 }
 0x2a0   :  { %3688 = vmatprep.mubr.msk.f32.mxu1 %vm225_vm1, %v4599_v9 }
 0x2a3   :  { %3689 = vmatmul.mubr.msk.f32.gmra.mrb[2].mxu1 %vm225_vm1, %v4597_v7 }
 0x372   :  { %v3687_v20 = vpop.f32.mrb[0].mxu1 }
 0x373   :  { %v328_v22 = vmul.f32 0.25, %v3687_v20  ;;  %v308_v23 = vpop.f32.mrb[1].mxu1 }
 0x374   :  { %v327_v25 = vmul.f32 0.25, %v308_v23 }
 0x375   :  { %v332_v26 = vadd.f32 %v328_v22, %v4632_v21 }
 0x376   :  { %v3690_v27 = vpop.f32.mrb[2].mxu1  ;;  %v331_v28 = vadd.f32 %v327_v25, %v4637_v24 }
 0x377   :  { %v330_v30 = vmul.f32 0.25, %v3690_v27  ;;  %v318_v31 = vpop.f32.mrb[3].mxu1  ;;  %v338_v32 = vsel %vm33_vm0, %v332_v26, -inf }
 0x378   :  { %v329_v34 = vmul.f32 0.25, %v318_v31  ;;  %339 = vmax.xlane.f32.xlu0 %v338_v32  ;;  %v335_v35 = vsel %vm33_vm0, %v331_v28, -inf }
 0x379   :  { %336 = vmax.xlane.f32.xlu1 %v335_v35  ;;  %v334_v36 = vadd.f32 %v330_v30, %v4644_v29 }
 0x37a   :  { %v333_v37 = vadd.f32 %v329_v34, %v4650_v33 }
 0x37b   :  { %v344_v38 = vsel %vm33_vm0, %v334_v36, -inf }
 0x37c   :  { %v341_v39 = vsel %vm33_vm0, %v333_v37, -inf }
 0x37d   :  { %345 = vmax.xlane.f32.xlu1 %v344_v38  ;;  %342 = vmax.xlane.f32.xlu0 %v341_v39 }
 0x405   :  { %v340_v40 = vpop.xlane.xlu0 %339 }
 0x406   :  { %v348_v41 = vsub.f32 %v332_v26, %v340_v40  ;;  %v337_v42 = vpop.xlane.xlu1 %336 }
 0x407   :  { %v347_v43 = vsub.f32 %v331_v28, %v337_v42 }
 0x408   :  { %v353_v44 = vmul.f32 1.442695, %v348_v41 }
 0x409   :  { %v351_v45 = vmul.f32 1.442695, %v347_v43 }
 0x40a   :  { %4330 = vpow2.f32 %v353_v44  ;;  %v343_v50 = vpop.xlane.xlu0 %342  ;;  %v346_v52 = vpop.xlane.xlu1 %345 }
 0x40b   :  { %4332 = vpow2.f32 %v351_v45  ;;  %v349_v51 = vsub.f32 %v333_v37, %v343_v50  ;;  %v350_v55 = vsub.f32 %v334_v36, %v346_v52 }
 0x40d   :  { %v355_v54 = vmul.f32 1.442695, %v349_v51  ;;  %v357_v56 = vmul.f32 1.442695, %v350_v55 }
 0x40f   :  { %4334 = vpow2.f32 %v355_v54 }
 0x410   :  { %4336 = vpow2.f32 %v357_v56 }
 0x414   :  { %v4331_v46 = vpop.eup %4330 }
 0x415   :  { %v4333_v47 = vpop.eup %4332  ;;  %v362_v48 = vsel %vm33_vm0, %v4331_v46, 0.0 }
 0x416   :  { %363 = vadd.xlane.f32.xlu1 %v362_v48  ;;  %v359_v49 = vsel %vm33_vm0, %v4333_v47, 0.0 }
 0x417   :  { %360 = vadd.xlane.f32.xlu0 %v359_v49 }
 0x419   :  { %v4335_v57 = vpop.eup %4334 }
 0x41a   :  { %v365_v58 = vsel %vm33_vm0, %v4335_v57, 0.0  ;;  %v4337_v60 = vpop.eup %4336 }
 0x41b   :  { %v368_v62 = vsel %vm33_vm0, %v4337_v60, 0.0 }
 0x427   :  { %4236 = vrot.lane.b32.xlu1 %v4605_v10, %s4473_s8 }
 0x42b   :  { %4241 = vrot.lane.b32.xlu1 %v4595_v6, %s4474_s0 }
 0x42d   :  { %4231 = vrot.lane.b32.xlu0 %v4595_v6, %s4473_s8 }
 0x42f   :  { %4246 = vrot.lane.b32.xlu1 %v4605_v10, %s4474_s0 }
 0x44c   :  { %366 = vadd.xlane.f32.xlu0 %v365_v58 }
 0x453   :  { %369 = vadd.xlane.f32.xlu1 %v368_v62 }
 0x462   :  { %490 = vrot.lane.b32.xlu0 %v4589_v4, %s4475_s9 }
 0x464   :  { %492 = vrot.lane.b32.xlu1 %v4587_v2, %s4475_s9 }
 0x466   :  { %494 = vrot.lane.b32.xlu0 %v4599_v9, %s4475_s9 }
 0x468   :  { %496 = vrot.lane.b32.xlu1 %v4597_v7, %s4475_s9 }
 0x4a3   :  { %v364_v0 = vpop.xlane.xlu1 %363 }
 0x4a4   :  { %v361_v1 = vpop.xlane.xlu0 %360 }
 0x4a5   :  { %4338 = vrcp.f32 %v361_v1 }
 0x4a6   :  { %4340 = vrcp.f32 %v364_v0 }
 0x4a7   :  { %v4237_v3 = vpop.permute.xlu1 %4236 }
 0x4a8   :  { %v4232_v5 = vpop.permute.xlu0 %4231  ;;  %v4239_v8 = vunpack.i.h.bf16 %v4237_v3  ;;  %v4238_v11 = vunpack.i.l.bf16 %v4237_v3 }
 0x4a9   :  { %v4234_v12 = vunpack.i.h.bf16 %v4232_v5  ;;  %v4233_v13 = vunpack.i.l.bf16 %v4232_v5 }
 0x4aa   :  { %v4012_v17 = vpack.c.bf16 %v4239_v8, %v4238_v11 }
 0x4ab   :  { %v4242_v4 = vpop.permute.xlu1 %4241  ;;  %v4008_v15 = vpack.c.bf16 %v4234_v12, %v4233_v13 }
 0x4ac   :  { %v4244_v16 = vunpack.i.h.bf16 %v4242_v4  ;;  %v4243_v2 = vunpack.i.l.bf16 %v4242_v4 }
 0x4ad   :  { %4009 = vmatprep.subr.bf16.mxu0 %v4008_v15 }
 0x4ae   :  { %4011 = vmatpush3.bf16.msra.mxu0 %v4008_v15  ;;  %v4016_v19 = vpack.c.bf16 %v4244_v16, %v4243_v2 }
 0x4af   :  { %v4339_v9 = vpop.eup %4338  ;;  %4013 = vmatprep.subr.bf16.mxu0 %v4012_v17  ;;  %v4247_v22 = vpop.permute.xlu1 %4246 }
 0x4b0   :  { %v4341_v7 = vpop.eup %4340  ;;  %v375_v18 = vmul.f32 %v4339_v9, %v4333_v47  ;;  %v4249_v23 = vunpack.i.h.bf16 %v4247_v22  ;;  %v4248_v25 = vunpack.i.l.bf16 %v4247_v22 }
 0x4b1   :  { %v376_v20 = vmul.f32 %v4341_v7, %v4331_v46 }
 0x4b2   :  { %4015 = vmatpush3.bf16.msra.mxu0 %v4012_v17  ;;  %3699 = vmatprep.mubr.msk.f32.mxu0 %vm33_vm0, %v375_v18  ;;  %v4022_v26 = vpack.c.bf16 %v4249_v23, %v4248_v25 }
 0x4b3   :  { %4018 = vmatprep.subr.msk.bf16.mxu0 %vm4611_vm2, %v4016_v19 }
 0x4b5   :  { %3700 = vmatmul.mubr.msk.f32.vlgmr.msra.gmra.mrb[4].mxu0 %vm33_vm0, %v376_v20 }
 0x4bb   :  { %4021 = vmatpush3.bf16.xpose.msk.msra.mxu0 %vm4611_vm2, %v4016_v19 }
 0x4bc   :  { %4024 = vmatprep.subr.msk.bf16.mxu0 %vm4611_vm2, %v4022_v26 }
 0x4c3   :  { %4027 = vmatpush3.bf16.xpose.msk.msra.mxu0 %vm4611_vm2, %v4022_v26 }
 0x4d9   :  { %v367_v27 = vpop.xlane.xlu0 %366 }
 0x4da   :  { %4342 = vrcp.f32 %v367_v27 }
 0x4dd   :  { %v491_v34 = vpop.permute.xlu0 %490 }
 0x4e0   :  { %v370_v28 = vpop.xlane.xlu1 %369 }
 0x4e1   :  { %4344 = vrcp.f32 %v370_v28  ;;  %v495_v37 = vpop.permute.xlu0 %494 }
 0x4e4   :  { %v4343_v30 = vpop.eup %4342  ;;  %v493_v36 = vpop.permute.xlu1 %492 }
 0x4e5   :  { %v377_v31 = vmul.f32 %v4343_v30, %v4335_v57 }
 0x4e7   :  { %3702 = vmatprep.mubr.msk.f32.mxu0 %vm33_vm0, %v377_v31 }
 0x4e8   :  { %v497_v38 = vpop.permute.xlu1 %496 }
 0x4eb   :  { %v4345_v32 = vpop.eup %4344 }
 0x4ec   :  { %v378_v35 = vmul.f32 %v4345_v32, %v4337_v60 }
 0x4ee   :  { %3703 = vmatmul.mubr.msk.f32.gmra.mrb[6].mxu0 %vm33_vm0, %v378_v35 }
 0x4ef   :  { %3713 = vmatprep.mubr.msk.f32.mxu0 %vm225_vm1, %v491_v34 }
 0x4f2   :  { %3714 = vmatmul.mubr.msk.f32.vlgmr.msra.gmra.mrb[8].mxu0 %vm225_vm1, %v493_v36 }
 0x4f3   :  { %3716 = vmatprep.mubr.msk.f32.mxu0 %vm225_vm1, %v495_v37 }
 0x4f6   :  { %3717 = vmatmul.mubr.msk.f32.gmra.mrb[10].mxu0 %vm225_vm1, %v497_v38 }
 0x588   :  { %v4693_v39 = vpop.f32.mrb[4].mxu0 }
 0x589   :  { %v4695_v40 = vpop.f32.mrb[5].mxu0 }
 0x5c1   :  { %v4697_v41 = vpop.f32.mrb[6].mxu0 }
 0x5c2   :  { %v4699_v42 = vpop.f32.mrb[7].mxu0 }
 0x5c5   :  { %v3715_v43 = vpop.f32.mrb[8].mxu0 }
 0x5c6   :  { %v608_v44 = vmul.f32 0.25, %v3715_v43  ;;  %v588_v45 = vpop.f32.mrb[9].mxu0 }
 0x5c7   :  { %v607_v46 = vmul.f32 0.25, %v588_v45 }
 0x5c8   :  { %v612_v47 = vadd.f32 %v608_v44, %v4632_v21 }
 0x5c9   :  { %v3718_v48 = vpop.f32.mrb[10].mxu0  ;;  %v611_v49 = vadd.f32 %v607_v46, %v4637_v24 }
 0x5ca   :  { %v598_v50 = vpop.f32.mrb[11].mxu0  ;;  %v618_v51 = vsel %vm33_vm0, %v612_v47, -inf  ;;  %v610_v52 = vmul.f32 0.25, %v3718_v48  ;;  %v489_v48 = vld [vmem:[%s5336_s2 + $0x28] sm:$0xff] }
 0x5cb   :  { %v609_v54 = vmul.f32 0.25, %v598_v50  ;;  %619 = vmax.xlane.f32.xlu1 %v618_v51  ;;  %v615_v55 = vsel %vm33_vm0, %v611_v49, -inf }
 0x5cc   :  { %616 = vmax.xlane.f32.xlu0 %v615_v55  ;;  %v614_v58 = vadd.f32 %v610_v52, %v4644_v29  ;;  %v3371_v55 = vld [vmem:[%s5337_s3 + $0x1] ss:$0 sm:$0xff] }
 0x5cd   :  { %v613_v56 = vadd.f32 %v609_v54, %v4650_v33 }
 0x5ce   :  { %v624_v21 = vsel %vm33_vm0, %v614_v58, -inf }
 0x5cf   :  { %v621_v57 = vsel %vm33_vm0, %v613_v56, -inf }
 0x5d0   :  { %622 = vmax.xlane.f32.xlu0 %v621_v57 }
 0x5d4   :  { %625 = vmax.xlane.f32.xlu0 %v624_v21 }
 0x658   :  { %v620_v24 = vpop.xlane.xlu1 %619 }
 0x659   :  { %v628_v60 = vsub.f32 %v612_v47, %v620_v24  ;;  %v617_v62 = vpop.xlane.xlu0 %616  ;;  %v488_v47 = vld [vmem:[%s5336_s2 + $0x20] sm:$0xff] }
 0x65a   :  { %v627_v0 = vsub.f32 %v611_v49, %v617_v62  ;;  %v4040_v49 = vpack.c.bf16 %v489_v48, %v488_v47  ;;  %v3372_v47 = vld [vmem:[%s5337_s3 + $0x2] ss:$0 sm:$0xff] }
 0x65b   :  { %v633_v1 = vmul.f32 1.442695, %v628_v60 }
 0x65c   :  { %v631_v3 = vmul.f32 1.442695, %v627_v0 }
 0x65d   :  { %4346 = vpow2.f32 %v633_v1  ;;  %v623_v5 = vpop.xlane.xlu0 %622 }
 0x65e   :  { %4348 = vpow2.f32 %v631_v3  ;;  %v629_v8 = vsub.f32 %v613_v56, %v623_v5 }
 0x660   :  { %v635_v11 = vmul.f32 1.442695, %v629_v8 }
 0x661   :  { %v626_v33 = vpop.xlane.xlu0 %625 }
 0x662   :  { %4350 = vpow2.f32 %v635_v11  ;;  %v630_v12 = vsub.f32 %v614_v58, %v626_v33 }
 0x664   :  { %v637_v13 = vmul.f32 1.442695, %v630_v12 }
 0x666   :  { %4352 = vpow2.f32 %v637_v13 }
 0x667   :  { %v4347_v29 = vpop.eup %4346 }
 0x668   :  { %v4349_v4 = vpop.eup %4348  ;;  %v642_v15 = vsel %vm33_vm0, %v4347_v29, 0.0 }
 0x669   :  { %643 = vadd.xlane.f32.xlu1 %v642_v15  ;;  %v639_v16 = vsel %vm33_vm0, %v4349_v4, 0.0 }
 0x66a   :  { %640 = vadd.xlane.f32.xlu0 %v639_v16 }
 0x66c   :  { %v4351_v2 = vpop.eup %4350 }
 0x66d   :  { %v645_v17 = vsel %vm33_vm0, %v4351_v2, 0.0 }
 0x66e   :  { %646 = vadd.xlane.f32.xlu0 %v645_v17 }
 0x670   :  { %v4353_v9 = vpop.eup %4352 }
 0x671   :  { %v648_v7 = vsel %vm33_vm0, %v4353_v9, 0.0 }
 0x672   :  { %649 = vadd.xlane.f32.xlu1 %v648_v7 }
 0x683   :  { %4256 = vrot.lane.b32.xlu1 %v4605_v10, %s4476_s10  ;;  %v768_v10 = vld [vmem:[%s5336_s2 + $0x30] sm:$0xff] }
 0x684   :  { %4251 = vrot.lane.b32.xlu0 %v4595_v6, %s4476_s10  ;;  %v769_v6 = vld [vmem:[%s5336_s2 + $0x38] sm:$0xff] }
 0x685   :  { %v4036_v36 = vpack.c.bf16 %v769_v6, %v768_v10 }
 0x6f6   :  { %v644_v19 = vpop.xlane.xlu1 %643 }
 0x6f7   :  { %v641_v18 = vpop.xlane.xlu0 %640 }
 0x6f8   :  { %4354 = vrcp.f32 %v641_v18 }
 0x6f9   :  { %4356 = vrcp.f32 %v644_v19 }
 0x6fb   :  { %v647_v20 = vpop.xlane.xlu0 %646 }
 0x6fc   :  { %4358 = vrcp.f32 %v647_v20 }
 0x6ff   :  { %v650_v22 = vpop.xlane.xlu1 %649  ;;  %v4252_v23 = vpop.permute.xlu0 %4251 }
 0x700   :  { %v4254_v25 = vunpack.i.h.bf16 %v4252_v23  ;;  %v4253_v26 = vunpack.i.l.bf16 %v4252_v23  ;;  %4360 = vrcp.f32 %v650_v22  ;;  %v1047_v23 = vld [vmem:[%s5336_s2 + $0x40] sm:$0xff] }
 0x702   :  { %v4355_v27 = vpop.eup %4354  ;;  %v4028_v28 = vpack.c.bf16 %v4254_v25, %v4253_v26  ;;  %v1048_v25 = vld [vmem:[%s5336_s2 + $0x48] sm:$0xff] }
 0x703   :  { %v4257_v30 = vpop.permute.xlu1 %4256  ;;  %v655_v31 = vmul.f32 %v4355_v27, %v4349_v4  ;;  %v4357_v37 = vpop.eup %4356  ;;  %v4044_v26 = vpack.c.bf16 %v1048_v25, %v1047_v23  ;;  %v1049_v27 = vld [vmem:[%s5336_s2 + $0x50] sm:$0xff] }
 0x704   :  { %v4259_v32 = vunpack.i.h.bf16 %v4257_v30  ;;  %v4258_v34 = vunpack.i.l.bf16 %v4257_v30  ;;  %4029 = vmatprep.subr.bf16.mxu1 %v4028_v28  ;;  %v656_v43 = vmul.f32 %v4357_v37, %v4347_v29 }
 0x705   :  { %4031 = vmatpush3.bf16.msra.mxu1 %v4028_v28  ;;  %3727 = vmatprep.mubr.msk.f32.mxu1 %vm33_vm0, %v655_v31  ;;  %v1050_v28 = vld [vmem:[%s5336_s2 + $0x58] sm:$0xff] }
 0x706   :  { %v4032_v35 = vpack.c.bf16 %v4259_v32, %v4258_v34  ;;  %v4359_v38 = vpop.eup %4358  ;;  %4045 = vmatprep.subr.bf16.mxu0 %v4044_v26  ;;  %v4048_v30 = vpack.c.bf16 %v1050_v28, %v1049_v27 }
 0x707   :  { %v657_v45 = vmul.f32 %v4359_v38, %v4351_v2  ;;  %4047 = vmatpush3.bf16.msra.mxu0 %v4044_v26 }
 0x708   :  { %4033 = vmatprep.subr.bf16.mxu1 %v4032_v35  ;;  %4049 = vmatprep.subr.bf16.mxu0 %v4048_v30 }
 0x709   :  { %4035 = vmatpush3.bf16.msra.mxu1 %v4032_v35 }
 0x70a   :  { %4037 = vmatprep.subr.bf16.mxu1 %v4036_v36  ;;  %v4361_v44 = vpop.eup %4360 }
 0x70b   :  { %v658_v46 = vmul.f32 %v4361_v44, %v4353_v9  ;;  %4051 = vmatpush3.bf16.msra.mxu0 %v4048_v30 }
 0x70c   :  { %3728 = vmatmul.mubr.msk.f32.vlgmr.msra.gmra.mrb[4].mxu1 %vm33_vm0, %v656_v43 }
 0x70d   :  { %3730 = vmatprep.mubr.msk.f32.mxu1 %vm33_vm0, %v657_v45  ;;  %4039 = vmatpush3.bf16.msra.mxu1 %v4036_v36 }
 0x70e   :  { %4041 = vmatprep.subr.bf16.mxu1 %v4040_v49 }
 0x710   :  { %3731 = vmatmul.mubr.msk.f32.gmra.mrb[6].mxu1 %vm33_vm0, %v658_v46 }
 0x7df   :  { %v3729_v50 = vpop.f32.mrb[4].mxu1 }
 0x7e0   :  { %v749_v51 = vpop.f32.mrb[5].mxu1 }
 0x7e1   :  { %3737 = vmatprep.mubr.msk.f32.mxu1 %vm225_vm1, %v749_v51  ;;  %v3373_v51 = vld [vmem:[%s5337_s3 + $0x3] ss:$0 sm:$0xff] }
 0x7e2   :  { %3738 = vmatmul.mubr.msk.f32.vlgmr.msra.gmra.mrb[8].mxu1 %vm225_vm1, %v3729_v50 }
 0x7e3   :  { %v3732_v52 = vpop.f32.mrb[6].mxu1  ;;  %4043 = vmatpush3.bf16.msra.mxu1 %v4040_v49 }
 0x7e4   :  { %v759_v54 = vpop.f32.mrb[7].mxu1 }
 0x7e5   :  { %3740 = vmatprep.mubr.msk.f32.mxu1 %vm225_vm1, %v759_v54 }
 0x7e6   :  { %3741 = vmatmul.mubr.msk.f32.gmra.mrb[10].mxu1 %vm225_vm1, %v3732_v52 }
 0x7e7   :  { %3747 = vmatprep.mubr.msk.f32.mxu1 %vm225_vm1, %v4695_v40 }
 0x7ea   :  { %3748 = vmatmul.mubr.msk.f32.vlgmr.msra.gmra.mrb[8].mxu1 %vm225_vm1, %v4693_v39 }
 0x7eb   :  { %3750 = vmatprep.mubr.msk.f32.mxu1 %vm225_vm1, %v4699_v42 }
 0x7ee   :  { %3751 = vmatmul.mubr.msk.f32.gmra.mrb[10].mxu1 %vm225_vm1, %v4697_v41 }
 0x8bd   :  { %v3749_v56 = vpop.f32.mrb[8].mxu1 }
 0x8be   :  { %v970_v57 = vadd.f32 %v3749_v56, %v3371_v55  ;;  %v945_v58 = vpop.f32.mrb[9].mxu1 }
 0x8bf   :  { %v969_v21 = vadd.f32 %v3371_v55, %v945_v58 }
 0x8c0   :  { %v974_v24 = vadd.f32 %v970_v57, %v4572_v59 }
 0x8c1   :  { %v3752_v40 = vpop.f32.mrb[10].mxu1  ;;  %v973_v60 = vadd.f32 %v969_v21, %v4568_v53 }
 0x8c2   :  { %v972_v39 = vadd.f32 %v3752_v40, %v3371_v55  ;;  %v955_v62 = vpop.f32.mrb[11].mxu1  ;;  %v982_v42 = vsel %vm33_vm0, %v974_v24, 0.0 }
 0x8c3   :  { %v971_v0 = vadd.f32 %v3371_v55, %v955_v62  ;;  %983 = vadd.xlane.f32.xlu0 %v982_v42  ;;  %v979_v41 = vsel %vm33_vm0, %v973_v60, 0.0  ;;  %v1189_v42 = vld [vmem:[%s5336_s2 + $0x60] sm:$0xff] }
 0x8c4   :  { %980 = vadd.xlane.f32.xlu1 %v979_v41  ;;  %v976_v1 = vadd.f32 %v972_v39, %v4580_v63 }
 0x8c5   :  { %v975_v3 = vadd.f32 %v971_v0, %v4574_v61  ;;  %v1190_v0 = vld [vmem:[%s5336_s2 + $0x68] sm:$0xff] }
 0x8c6   :  { %v988_v5 = vsel %vm33_vm0, %v976_v1, 0.0  ;;  %v4052_v41 = vpack.c.bf16 %v1190_v0, %v1189_v42 }
 0x8c7   :  { %v985_v59 = vsel %vm33_vm0, %v975_v3, 0.0 }
 0x8c8   :  { %989 = vadd.xlane.f32.xlu1 %v988_v5  ;;  %986 = vadd.xlane.f32.xlu0 %v985_v59  ;;  %v1193_v59 = vld [vmem:[%s5336_s2 + $0x80] sm:$0xff] }
 0x8c9   :  { %4053 = vmatprep.subr.bf16.mxu0 %v4052_v41 }
 0x950   :  { %v984_v53 = vpop.xlane.xlu0 %983 }
 0x951   :  { %v992_v8 = vmul.f32 0.03125, %v984_v53  ;;  %v981_v11 = vpop.xlane.xlu1 %980  ;;  %v1194_v53 = vld [vmem:[%s5336_s2 + $0x88] sm:$0xff] }
 0x952   :  { %v991_v33 = vmul.f32 0.03125, %v981_v11  ;;  %v1195_v11 = vld [vmem:[%s5336_s2 + $0x90] sm:$0xff] }
 0x953   :  { %v996_v12 = vsub.f32 %v974_v24, %v992_v8  ;;  %v4060_v8 = vpack.c.bf16 %v1194_v53, %v1193_v59 }
 0x954   :  { %v995_v13 = vsub.f32 %v973_v60, %v991_v33  ;;  %v1196_v33 = vld [vmem:[%s5336_s2 + $0x98] sm:$0xff] }
 0x955   :  { %v990_v29 = vpop.xlane.xlu1 %989  ;;  %v987_v4 = vpop.xlane.xlu0 %986  ;;  %v1000_v15 = vmul.f32 %v996_v12, %v996_v12 }
 0x956   :  { %v994_v16 = vmul.f32 0.03125, %v990_v29  ;;  %v993_v2 = vmul.f32 0.03125, %v987_v4  ;;  %v999_v63 = vmul.f32 %v995_v13, %v995_v13  ;;  %v1198_v29 = vld [vmem:[%s5336_s2 + $0xa8] sm:$0xff] }
 0x957   :  { %v1006_v61 = vsel %vm33_vm0, %v1000_v15, 0.0  ;;  %v1199_v15 = vld [vmem:[%s5336_s2 + $0xb0] sm:$0xff] }
 0x958   :  { %v998_v17 = vsub.f32 %v976_v1, %v994_v16  ;;  %v997_v9 = vsub.f32 %v975_v3, %v993_v2  ;;  %1007 = vadd.xlane.f32.xlu1 %v1006_v61  ;;  %v1003_v7 = vsel %vm33_vm0, %v999_v63, 0.0  ;;  %v1191_v1 = vld [vmem:[%s5336_s2 + $0x70] sm:$0xff]  ;;  %v1192_v3 = vld [vmem:[%s5336_s2 + $0x78] sm:$0xff]  ;;  %v1201_v63 = vld [vmem:[%s5336_s2 + $0xc0] sm:$0xff] }
 0x959   :  { %1004 = vadd.xlane.f32.xlu0 %v1003_v7  ;;  %v4056_v5 = vpack.c.bf16 %v1192_v3, %v1191_v1  ;;  %v1200_v16 = vld [vmem:[%s5336_s2 + $0xb8] sm:$0xff]  ;;  %v1202_v61 = vld [vmem:[%s5336_s2 + $0xc8] sm:$0xff] }
 0x95a   :  { %v1002_v18 = vmul.f32 %v998_v17, %v998_v17  ;;  %v1001_v19 = vmul.f32 %v997_v9, %v997_v9  ;;  %v4072_v2 = vpack.c.bf16 %v1200_v16, %v1199_v15  ;;  %v1204_v7 = vld [vmem:[%s5336_s2 + $0xd8] sm:$0xff] }
 0x95c   :  { %v1012_v20 = vsel %vm33_vm0, %v1002_v18, 0.0  ;;  %v1009_v22 = vsel %vm33_vm0, %v1001_v19, 0.0  ;;  %v3374_v19 = vld [vmem:[%s5337_s3 + $0x4] ss:$0 sm:$0xff] }
 0x95d   :  { %1013 = vadd.xlane.f32.xlu1 %v1012_v20  ;;  %1010 = vadd.xlane.f32.xlu0 %v1009_v22 }
 0x9e5   :  { %v1008_v31 = vpop.xlane.xlu1 %1007 }
 0x9e6   :  { %v1016_v10 = vmul.f32 0.03125, %v1008_v31  ;;  %v1005_v6 = vpop.xlane.xlu0 %1004 }
 0x9e7   :  { %v1015_v32 = vmul.f32 0.03125, %v1005_v6 }
 0x9e8   :  { %v1020_v34 = vadd.f32 1e-12, %v1016_v10 }
 0x9e9   :  { %v1019_v35 = vadd.f32 1e-12, %v1015_v32 }
 0x9ea   :  { %4362 = vrsqrt.f32 %v1020_v34  ;;  %v1014_v36 = vpop.xlane.xlu1 %1013  ;;  %v1011_v37 = vpop.xlane.xlu0 %1010 }
 0x9eb   :  { %4364 = vrsqrt.f32 %v1019_v35  ;;  %v1018_v38 = vmul.f32 0.03125, %v1014_v36  ;;  %v1017_v43 = vmul.f32 0.03125, %v1011_v37 }
 0x9ed   :  { %v1022_v44 = vadd.f32 1e-12, %v1018_v38  ;;  %v1021_v45 = vadd.f32 1e-12, %v1017_v43 }
 0x9ef   :  { %4366 = vrsqrt.f32 %v1022_v44 }
 0x9f0   :  { %4368 = vrsqrt.f32 %v1021_v45 }
 0x9f4   :  { %v4363_v46 = vpop.eup %4362 }
 0x9f5   :  { %v4365_v48 = vpop.eup %4364  ;;  %v1028_v49 = vmul.f32 %v4363_v46, %v996_v12  ;;  %v4064_v12 = vpack.c.bf16 %v1196_v33, %v1195_v11  ;;  %v3379_v33 = vld [vmem:[%s5337_s3 + $0x5] ss:$0 sm:$0xff] }
 0x9f6   :  { %v1027_v50 = vmul.f32 %v4365_v48, %v995_v13  ;;  %v1197_v13 = vld [vmem:[%s5336_s2 + $0xa0] sm:$0xff] }
 0x9f7   :  { %v1036_v52 = vmul.f32 %v3372_v47, %v1028_v49  ;;  %v4068_v4 = vpack.c.bf16 %v1198_v29, %v1197_v13 }
 0x9f8   :  { %v1035_v54 = vmul.f32 %v3372_v47, %v1027_v50 }
 0x9f9   :  { %v4367_v55 = vpop.eup %4366  ;;  %v4780_v21 = vadd.f32 %v3373_v51, %v1036_v52 }
 0x9fa   :  { %v4369_v56 = vpop.eup %4368  ;;  %v4778_v57 = vadd.f32 %v3373_v51, %v1035_v54  ;;  %v1030_v58 = vmul.f32 %v4367_v55, %v998_v17  ;;  %v4076_v17 = vpack.c.bf16 %v1202_v61, %v1201_v63 }
 0x9fb   :  { %v1029_v24 = vmul.f32 %v4369_v56, %v997_v9  ;;  %v1203_v9 = vld [vmem:[%s5336_s2 + $0xd0] sm:$0xff] }
 0x9fc   :  { %3761 = vmatprep.mubr.msk.f32.mxu0 %vm33_vm0, %v4778_v57  ;;  %v1038_v40 = vmul.f32 %v3372_v47, %v1030_v58  ;;  %v4080_v18 = vpack.c.bf16 %v1204_v7, %v1203_v9 }
 0x9fd   :  { %3762 = vmatmul.mubr.msk.f32.vlgmr.msra.gmra.mrb[12].mxu0 %vm33_vm0, %v4780_v21  ;;  %v1037_v60 = vmul.f32 %v3372_v47, %v1029_v24 }
 0x9fe   :  { %v4786_v39 = vadd.f32 %v3373_v51, %v1038_v40  ;;  %4055 = vmatpush3.bf16.msra.mxu0 %v4052_v41 }
 0x9ff   :  { %v4788_v62 = vadd.f32 %v3373_v51, %v1037_v60  ;;  %4057 = vmatprep.subr.bf16.mxu0 %v4056_v5 }
 0xa01   :  { %3764 = vmatprep.mubr.msk.f32.mxu0 %vm33_vm0, %v4788_v62 }
 0xa02   :  { %3765 = vmatmul.mubr.msk.f32.gmra.mrb[14].mxu0 %vm33_vm0, %v4786_v39 }
 0xa03   :  { %4059 = vmatpush3.bf16.msra.mxu0 %v4056_v5 }
 0xa04   :  { %4061 = vmatprep.subr.bf16.mxu0 %v4060_v8 }
 0xa07   :  { %4063 = vmatpush3.bf16.msra.mxu0 %v4060_v8 }
 0xa08   :  { %4065 = vmatprep.subr.bf16.mxu0 %v4064_v12 }
 0xa0b   :  { %4067 = vmatpush3.bf16.msra.mxu0 %v4064_v12 }
 0xa0c   :  { %4069 = vmatprep.subr.bf16.mxu0 %v4068_v4 }
 0xa0f   :  { %4071 = vmatpush3.bf16.msra.mxu0 %v4068_v4 }
 0xa10   :  { %4073 = vmatprep.subr.bf16.mxu0 %v4072_v2 }
 0xa13   :  { %4075 = vmatpush3.bf16.msra.mxu0 %v4072_v2 }
 0xa14   :  { %4077 = vmatprep.subr.bf16.mxu0 %v4076_v17 }
 0xa17   :  { %4079 = vmatpush3.bf16.msra.mxu0 %v4076_v17 }
 0xa18   :  { %4081 = vmatprep.subr.bf16.mxu0 %v4080_v18 }
 0xa1b   :  { %4083 = vmatpush3.bf16.msra.mxu0 %v4080_v18 }
 0xad0   :  { %v3763_v20 = vpop.f32.mrb[12].mxu0 }
 0xad1   :  { %v1140_v22 = vadd.f32 %v3763_v20, %v3374_v19  ;;  %v1134_v23 = vpop.f32.mrb[13].mxu0 }
 0xad2   :  { %v1135_v25 = vadd.f32 %v3374_v19, %v1134_v23 }
 0xad3   :  { %v1154_v26 = vmul.f32 %v1140_v22, %v1140_v22 }
 0xad4   :  { %v1153_v27 = vmul.f32 %v1135_v25, %v1135_v25 }
 0xad5   :  { %v1158_v28 = vmul.f32 %v1154_v26, %v1140_v22  ;;  %v3766_v30 = vpop.f32.mrb[14].mxu0 }
 0xad6   :  { %v1157_v31 = vmul.f32 %v1153_v27, %v1135_v25  ;;  %v1150_v10 = vadd.f32 %v3766_v30, %v3374_v19  ;;  %v1144_v6 = vpop.f32.mrb[15].mxu0 }
 0xad7   :  { %v1162_v32 = vmul.f32 0.044715, %v1158_v28  ;;  %v1145_v34 = vadd.f32 %v3374_v19, %v1144_v6 }
 0xad8   :  { %v1161_v35 = vmul.f32 0.044715, %v1157_v31  ;;  %v1156_v36 = vmul.f32 %v1150_v10, %v1150_v10 }
 0xad9   :  { %v1166_v37 = vadd.f32 %v1162_v32, %v1140_v22  ;;  %v1155_v38 = vmul.f32 %v1145_v34, %v1145_v34 }
 0xada   :  { %v1165_v43 = vadd.f32 %v1161_v35, %v1135_v25  ;;  %v1160_v44 = vmul.f32 %v1156_v36, %v1150_v10 }
 0xadb   :  { %v1170_v45 = vmul.f32 0.7978846, %v1166_v37  ;;  %v1159_v46 = vmul.f32 %v1155_v38, %v1145_v34 }
 0xadc   :  { %v1169_v47 = vmul.f32 0.7978846, %v1165_v43  ;;  %v1164_v48 = vmul.f32 0.044715, %v1160_v44  ;;  %v3382_v44 = vld [vmem:[%s5336_s2 + $0xe0] sm:$0xff] }
 0xadd   :  { %4370 = vtanh.f32 %v1170_v45  ;;  %v1163_v49 = vmul.f32 0.044715, %v1159_v46  ;;  %v3383_v45 = vld [vmem:[%s5336_s2 + $0xe8] sm:$0xff] }
 0xade   :  { %v1168_v50 = vadd.f32 %v1164_v48, %v1150_v10  ;;  %4372 = vtanh.f32 %v1169_v47  ;;  %v4084_v46 = vpack.c.bf16 %v3383_v45, %v3382_v44  ;;  %v3384_v47 = vld [vmem:[%s5336_s2 + $0xf0] sm:$0xff]  ;;  %v3385_v48 = vld [vmem:[%s5336_s2 + $0xf8] sm:$0xff] }
 0xadf   :  { %v1167_v51 = vadd.f32 %v1163_v49, %v1145_v34  ;;  %v4088_v49 = vpack.c.bf16 %v3385_v48, %v3384_v47 }
 0xae0   :  { %v1172_v52 = vmul.f32 0.7978846, %v1168_v50  ;;  %4085 = vmatprep.subr.bf16.mxu1 %v4084_v46 }
 0xae1   :  { %v1171_v54 = vmul.f32 0.7978846, %v1167_v51  ;;  %4087 = vmatpush3.bf16.msra.mxu1 %v4084_v46 }
 0xae2   :  { %4374 = vtanh.f32 %v1172_v52  ;;  %4089 = vmatprep.subr.bf16.mxu1 %v4088_v49 }
 0xae3   :  { %4376 = vtanh.f32 %v1171_v54 }
 0xae5   :  { %4091 = vmatpush3.bf16.msra.mxu1 %v4088_v49 }
 0xae7   :  { %v4371_v55 = vpop.eup %4370 }
 0xae8   :  { %v4373_v56 = vpop.eup %4372  ;;  %v1178_v58 = vadd.f32 1.0, %v4371_v55 }
 0xae9   :  { %v1177_v24 = vadd.f32 1.0, %v4373_v56 }
 0xaea   :  { %v1182_v40 = vmul.f32 0.5, %v1178_v58 }
 0xaeb   :  { %v1181_v60 = vmul.f32 0.5, %v1177_v24 }
 0xaec   :  { %v4375_v42 = vpop.eup %4374  ;;  %v1186_v3 = vmul.f32 %v1182_v40, %v1140_v22 }
 0xaed   :  { %v4377_v0 = vpop.eup %4376  ;;  %v1185_v41 = vmul.f32 %v1181_v60, %v1135_v25  ;;  %v1180_v1 = vadd.f32 1.0, %v4375_v42 }
 0xaee   :  { %v1179_v5 = vadd.f32 1.0, %v4377_v0 }
 0xaef   :  { %3799 = vmatprep.mubr.f32.mxu0 %v1185_v41  ;;  %v1184_v59 = vmul.f32 0.5, %v1180_v1  ;;  %v3380_v1 = vld [vmem:[%s5337_s3 + $0x6] ss:$0 sm:$0xff] }
 0xaf0   :  { %3800 = vmatmul.mubr.f32.vlgmr.msra.gmra.mrb[16].mxu0 %v1186_v3  ;;  %v1183_v53 = vmul.f32 0.5, %v1179_v5 }
 0xaf1   :  { %v1188_v11 = vmul.f32 %v1184_v59, %v1150_v10 }
 0xaf2   :  { %v1187_v8 = vmul.f32 %v1183_v53, %v1145_v34  ;;  %v3381_v53 = vld [vmem:[%s5337_s3 + $0x7] ss:$0 sm:$0xff] }
 0xaf4   :  { %3802 = vmatprep.mubr.f32.mxu0 %v1187_v8 }
 0xaf5   :  { %3803 = vmatmul.mubr.f32.gmra.mrb[18].mxu0 %v1188_v11 }
 0xbc3   :  { %v3801_v12 = vpop.f32.mrb[16].mxu0 }
 0xbc4   :  { %v1282_v13 = vadd.f32 %v3801_v12, %v3379_v33  ;;  %v1276_v29 = vpop.f32.mrb[17].mxu0 }
 0xbc5   :  { %v1277_v4 = vadd.f32 %v3379_v33, %v1276_v29 }
 0xbc6   :  { %v1296_v15 = vadd.f32 %v1282_v13, %v4780_v21 }
 0xbc7   :  { %v1295_v16 = vadd.f32 %v1277_v4, %v4778_v57 }
 0xbc8   :  { %v3804_v2 = vpop.f32.mrb[18].mxu0  ;;  %v1304_v63 = vsel %vm33_vm0, %v1296_v15, 0.0 }
 0xbc9   :  { %v1292_v61 = vadd.f32 %v3804_v2, %v3379_v33  ;;  %v1286_v17 = vpop.f32.mrb[19].mxu0  ;;  %1305 = vadd.xlane.f32.xlu1 %v1304_v63  ;;  %v1301_v9 = vsel %vm33_vm0, %v1295_v16, 0.0 }
 0xbca   :  { %v1287_v7 = vadd.f32 %v3379_v33, %v1286_v17  ;;  %1302 = vadd.xlane.f32.xlu0 %v1301_v9  ;;  %v3387_v17 = vld [vmem:[%s5337_s3 + $0x8] ss:$0 sm:$0xff] }
 0xbcb   :  { %v1298_v18 = vadd.f32 %v1292_v61, %v4786_v39 }
 0xbcc   :  { %v1297_v19 = vadd.f32 %v1287_v7, %v4788_v62 }
 0xbcd   :  { %v1310_v20 = vsel %vm33_vm0, %v1298_v18, 0.0 }
 0xbce   :  { %1311 = vadd.xlane.f32.xlu1 %v1310_v20  ;;  %v1307_v21 = vsel %vm33_vm0, %v1297_v19, 0.0 }
 0xbcf   :  { %1308 = vadd.xlane.f32.xlu0 %v1307_v21 }
 0xc56   :  { %v1306_v57 = vpop.xlane.xlu1 %1305 }
 0xc57   :  { %v1314_v22 = vmul.f32 0.03125, %v1306_v57  ;;  %v1303_v23 = vpop.xlane.xlu0 %1302 }
 0xc58   :  { %v1313_v25 = vmul.f32 0.03125, %v1303_v23 }
 0xc59   :  { %v1318_v26 = vsub.f32 %v1296_v15, %v1314_v22 }
 0xc5a   :  { %v1317_v27 = vsub.f32 %v1295_v16, %v1313_v25 }
 0xc5b   :  { %v1312_v28 = vpop.xlane.xlu1 %1311  ;;  %v1322_v30 = vmul.f32 %v1318_v26, %v1318_v26 }
 0xc5c   :  { %v1316_v31 = vmul.f32 0.03125, %v1312_v28  ;;  %v1309_v10 = vpop.xlane.xlu0 %1308  ;;  %v1321_v6 = vmul.f32 %v1317_v27, %v1317_v27 }
 0xc5d   :  { %v1315_v39 = vmul.f32 0.03125, %v1309_v10  ;;  %v1328_v62 = vsel %vm33_vm0, %v1322_v30, 0.0 }
 0xc5e   :  { %v1320_v32 = vsub.f32 %v1298_v18, %v1316_v31  ;;  %1329 = vadd.xlane.f32.xlu1 %v1328_v62  ;;  %v1325_v34 = vsel %vm33_vm0, %v1321_v6, 0.0 }
 0xc5f   :  { %v1319_v35 = vsub.f32 %v1297_v19, %v1315_v39  ;;  %1326 = vadd.xlane.f32.xlu0 %v1325_v34 }
 0xc60   :  { %v1324_v36 = vmul.f32 %v1320_v32, %v1320_v32 }
 0xc61   :  { %v1323_v37 = vmul.f32 %v1319_v35, %v1319_v35 }
 0xc62   :  { %v1334_v38 = vsel %vm33_vm0, %v1324_v36, 0.0 }
 0xc63   :  { %1335 = vadd.xlane.f32.xlu1 %v1334_v38  ;;  %v1331_v43 = vsel %vm33_vm0, %v1323_v37, 0.0 }
 0xc64   :  { %1332 = vadd.xlane.f32.xlu0 %v1331_v43 }
 0xceb   :  { %v1330_v50 = vpop.xlane.xlu1 %1329 }
 0xcec   :  { %v1338_v51 = vmul.f32 0.03125, %v1330_v50  ;;  %v1327_v52 = vpop.xlane.xlu0 %1326 }
 0xced   :  { %v1337_v54 = vmul.f32 0.03125, %v1327_v52 }
 0xcee   :  { %v1342_v55 = vadd.f32 1e-12, %v1338_v51 }
 0xcef   :  { %v1341_v56 = vadd.f32 1e-12, %v1337_v54 }
 0xcf0   :  { %4378 = vrsqrt.f32 %v1342_v55  ;;  %v1336_v58 = vpop.xlane.xlu1 %1335  ;;  %v4445_v55 = vld [vmem:[%s5335_s1] sm:$0xff] }
 0xcf1   :  { %4380 = vrsqrt.f32 %v1341_v56  ;;  %v1340_v24 = vmul.f32 0.03125, %v1336_v58  ;;  %v1333_v40 = vpop.xlane.xlu0 %1332 }
 0xcf2   :  { %v1339_v60 = vmul.f32 0.03125, %v1333_v40 }
 0xcf3   :  { %v1344_v42 = vadd.f32 1e-12, %v1340_v24 }
 0xcf4   :  { %v1343_v0 = vadd.f32 1e-12, %v1339_v60 }
 0xcf5   :  { %4382 = vrsqrt.f32 %v1344_v42 }
 0xcf6   :  { %4384 = vrsqrt.f32 %v1343_v0  ;;  %v4446_v0 = vld [vmem:[%s5335_s1 + $0x18] sm:$0xff] }
 0xcfa   :  { %v4379_v41 = vpop.eup %4378 }
 0xcfb   :  { %v4381_v3 = vpop.eup %4380  ;;  %v1350_v5 = vmul.f32 %v4379_v41, %v1318_v26 }
 0xcfc   :  { %v1349_v59 = vmul.f32 %v4381_v3, %v1317_v27 }
 0xcfd   :  { %v1358_v8 = vmul.f32 %v3380_v1, %v1350_v5 }
 0xcfe   :  { %v1357_v11 = vmul.f32 %v3380_v1, %v1349_v59 }
 0xcff   :  { %v4383_v33 = vpop.eup %4382  ;;  %v4880_v4 = vadd.f32 %v3381_v53, %v1358_v8 }
 0xd00   :  { %v4385_v12 = vpop.eup %4384  ;;  %v4878_v13 = vadd.f32 %v3381_v53, %v1357_v11  ;;  %v1352_v29 = vmul.f32 %v4383_v33, %v1320_v32 }
 0xd01   :  { %v1351_v15 = vmul.f32 %v4385_v12, %v1319_v35 }
 0xd02   :  { %3813 = vmatprep.mubr.msk.f32.mxu1 %vm33_vm0, %v4878_v13  ;;  %v1360_v16 = vmul.f32 %v3380_v1, %v1352_v29 }
 0xd03   :  { %3814 = vmatmul.mubr.msk.f32.vlgmr.msra.gmra.mrb[12].mxu1 %vm33_vm0, %v4880_v4  ;;  %v1359_v2 = vmul.f32 %v3380_v1, %v1351_v15 }
 0xd04   :  { %v4888_v61 = vadd.f32 %v3381_v53, %v1360_v16 }
 0xd05   :  { %v4886_v63 = vadd.f32 %v3381_v53, %v1359_v2  ;;  %v4447_v53 = vld [vmem:[%s5335_s1 + $0x10] sm:$0xff]  ;;  %s3324_s1 = sshll.u32 %s4489_s11, 4  ;;  %s3325_s1 = int_to_ptr.vmem [resolvable:$true] %s3324_s1 }
 0xd06   :  { %p4453_p1 = scmp.lt.s32.totalorder %s3325_s1, %s3325_s1 }
 0xd07   :  { %3816 = vmatprep.mubr.msk.f32.mxu1 %vm33_vm0, %v4886_v63 }
 0xd08   :  { %3817 = vmatmul.mubr.msk.f32.gmra.mrb[14].mxu1 %vm33_vm0, %v4888_v61 }
 0xdd6   :  { %v3815_v9 = vpop.f32.mrb[12].mxu1 }
 0xdd7   :  { %v1464_v7 = vadd.f32 %v3815_v9, %v3387_v17  ;;  %v1458_v18 = vpop.f32.mrb[13].mxu1 }
 0xdd8   :  { %v1459_v19 = vadd.f32 %v3387_v17, %v1458_v18 }
 0xdda   :  { %3827 = vmatprep.mubr.msk.f32.mxu1 %vm225_vm1, %v1459_v19  ;;  %v4898_v20 = vpack.i.bf16 %v1464_v7, %v1459_v19 }
 0xddb   :  { %v3818_v21 = vpop.f32.mrb[14].mxu1 }
 0xddc   :  { %v1474_v57 = vadd.f32 %v3818_v21, %v3387_v17  ;;  %v1468_v22 = vpop.f32.mrb[15].mxu1  ;;  %4261 = vrot.lane.b32.xlu0 %v4898_v20, %s4472_s22 }
 0xddd   :  { %v1469_v23 = vadd.f32 %v3387_v17, %v1468_v22 }
 0xddf   :  { %v4902_v25 = vpack.i.bf16 %v1474_v57, %v1469_v23 }
 0xde0   :  { %1753 = vrot.lane.b32.xlu0 %v1459_v19, %s4475_s9 }
 0xde1   :  { %4266 = vrot.lane.b32.xlu1 %v4902_v25, %s4472_s22 }
 0xde4   :  { %1757 = vrot.lane.b32.xlu0 %v1469_v23, %s4475_s9 }
 0xde5   :  { %4271 = vrot.lane.b32.xlu1 %v4898_v20, %s4474_s0 }
 0xde9   :  { %4276 = vrot.lane.b32.xlu1 %v4902_v25, %s4474_s0 }
 0xded   :  { %1755 = vrot.lane.b32.xlu1 %v1464_v7, %s4475_s9 }
 0xdf1   :  { %1759 = vrot.lane.b32.xlu1 %v1474_v57, %s4475_s9 }
 0xe4e   :  { %v4262_v26 = vpop.permute.xlu0 %4261 }
 0xe4f   :  { %v4264_v27 = vunpack.i.h.bf16 %v4262_v26  ;;  %v4263_v28 = vunpack.i.l.bf16 %v4262_v26 }
 0xe51   :  { %v4092_v30 = vpack.c.bf16 %v4264_v27, %v4263_v28 }
 0xe52   :  { %v1754_v31 = vpop.permute.xlu0 %1753 }
 0xe53   :  { %v4267_v10 = vpop.permute.xlu1 %4266  ;;  %4094 = vmatprep.subr.msk.bf16.mxu1 %vm4611_vm2, %v4092_v30  ;;  %3855 = vmatprep.mubr.msk.f32.mxu0 %vm225_vm1, %v1754_v31 }
 0xe54   :  { %v4269_v6 = vunpack.i.h.bf16 %v4267_v10  ;;  %v4268_v39 = vunpack.i.l.bf16 %v4267_v10  ;;  %4097 = vmatpush3.bf16.xpose.msk.msra.mxu1 %vm4611_vm2, %v4092_v30 }
 0xe56   :  { %v4098_v62 = vpack.c.bf16 %v4269_v6, %v4268_v39  ;;  %v1758_v46 = vpop.permute.xlu0 %1757 }
 0xe57   :  { %v4272_v32 = vpop.permute.xlu1 %4271 }
 0xe58   :  { %v4274_v34 = vunpack.i.h.bf16 %v4272_v32  ;;  %v4273_v35 = vunpack.i.l.bf16 %v4272_v32  ;;  %4100 = vmatprep.subr.msk.bf16.mxu1 %vm4611_vm2, %v4098_v62 }
 0xe5a   :  { %v4112_v36 = vpack.c.bf16 %v4274_v34, %v4273_v35 }
 0xe5b   :  { %v4277_v37 = vpop.permute.xlu1 %4276 }
 0xe5c   :  { %v4279_v38 = vunpack.i.h.bf16 %v4277_v37  ;;  %v4278_v43 = vunpack.i.l.bf16 %v4277_v37  ;;  %4114 = vmatprep.subr.msk.bf16.mxu0 %vm4611_vm2, %v4112_v36  ;;  %4103 = vmatpush3.bf16.xpose.msk.msra.mxu1 %vm4611_vm2, %v4098_v62 }
 0xe5d   :  { %4117 = vmatpush3.bf16.xpose.msk.msra.mxu0 %vm4611_vm2, %v4112_v36 }
 0xe5e   :  { %v4118_v44 = vpack.c.bf16 %v4279_v38, %v4278_v43 }
 0xe5f   :  { %v1756_v45 = vpop.permute.xlu1 %1755 }
 0xe60   :  { %4120 = vmatprep.subr.msk.bf16.mxu0 %vm4611_vm2, %v4118_v44 }
 0xe63   :  { %3828 = vmatmul.mubr.msk.f32.vlgmr.msra.gmra.mrb[16].mxu1 %vm225_vm1, %v1464_v7  ;;  %v1760_v47 = vpop.permute.xlu1 %1759 }
 0xe64   :  { %3830 = vmatprep.mubr.msk.f32.mxu1 %vm225_vm1, %v1469_v23 }
 0xe65   :  { %4123 = vmatpush3.bf16.xpose.msk.msra.mxu0 %vm4611_vm2, %v4118_v44 }
 0xe67   :  { %3831 = vmatmul.mubr.msk.f32.gmra.mrb[18].mxu1 %vm225_vm1, %v1474_v57 }
 0xe6c   :  { %3856 = vmatmul.mubr.msk.f32.vlgmr.msra.gmra.mrb[20].mxu0 %vm225_vm1, %v1756_v45 }
 0xe6d   :  { %3858 = vmatprep.mubr.msk.f32.mxu0 %vm225_vm1, %v1758_v46 }
 0xe70   :  { %3859 = vmatmul.mubr.msk.f32.gmra.mrb[22].mxu0 %vm225_vm1, %v1760_v47 }
 0xf36   :  { %v3829_v48 = vpop.f32.mrb[16].mxu1 }
 0xf37   :  { %v1591_v49 = vmul.f32 0.25, %v3829_v48  ;;  %v1571_v50 = vpop.f32.mrb[17].mxu1 }
 0xf38   :  { %v1590_v51 = vmul.f32 0.25, %v1571_v50 }
 0xf39   :  { %v1595_v52 = vadd.f32 %v4444_v14, %v1591_v49 }
 0xf3a   :  { %v3832_v54 = vpop.f32.mrb[18].mxu1  ;;  %v1594_v56 = vadd.f32 %v4445_v55, %v1590_v51 }
 0xf3b   :  { %v1593_v58 = vmul.f32 0.25, %v3832_v54  ;;  %v1581_v24 = vpop.f32.mrb[19].mxu1  ;;  %v1601_v40 = vsel %vm33_vm0, %v1595_v52, -inf }
 0xf3c   :  { %v1592_v60 = vmul.f32 0.25, %v1581_v24  ;;  %1602 = vmax.xlane.f32.xlu1 %v1601_v40  ;;  %v1598_v42 = vsel %vm33_vm0, %v1594_v56, -inf }
 0xf3d   :  { %1599 = vmax.xlane.f32.xlu0 %v1598_v42  ;;  %v1597_v41 = vadd.f32 %v4446_v0, %v1593_v58 }
 0xf3e   :  { %v1596_v8 = vadd.f32 %v4447_v53, %v1592_v60 }
 0xf3f   :  { %v3857_v1 = vpop.f32.mrb[20].mxu0  ;;  %v1607_v3 = vsel %vm33_vm0, %v1597_v41, -inf }
 0xf40   :  { %v1871_v5 = vmul.f32 0.25, %v3857_v1  ;;  %v1851_v59 = vpop.f32.mrb[21].mxu0  ;;  %v1604_v2 = vsel %vm33_vm0, %v1596_v8, -inf }
 0xf41   :  { %v1870_v11 = vmul.f32 0.25, %v1851_v59  ;;  %1608 = vmax.xlane.f32.xlu0 %v1607_v3 }
 0xf42   :  { %v1875_v33 = vadd.f32 %v4444_v14, %v1871_v5 }
 0xf43   :  { %v3860_v12 = vpop.f32.mrb[22].mxu0  ;;  %v1874_v17 = vadd.f32 %v4445_v55, %v1870_v11 }
 0xf44   :  { %v1873_v29 = vmul.f32 0.25, %v3860_v12  ;;  %v1861_v15 = vpop.f32.mrb[23].mxu0  ;;  %v1881_v16 = vsel %vm33_vm0, %v1875_v33, -inf }
 0xf45   :  { %v1872_v9 = vmul.f32 0.25, %v1861_v15  ;;  %1882 = vmax.xlane.f32.xlu1 %v1881_v16  ;;  %1605 = vmax.xlane.f32.xlu0 %v1604_v2  ;;  %v1878_v19 = vsel %vm33_vm0, %v1874_v17, -inf }
 0xf46   :  { %v1877_v7 = vadd.f32 %v4446_v0, %v1873_v29 }
 0xf47   :  { %v1876_v21 = vadd.f32 %v4447_v53, %v1872_v9 }
 0xf48   :  { %v1887_v18 = vsel %vm33_vm0, %v1877_v7, -inf }
 0xf49   :  { %1888 = vmax.xlane.f32.xlu1 %v1887_v18  ;;  %1879 = vmax.xlane.f32.xlu0 %v1878_v19  ;;  %v1884_v57 = vsel %vm33_vm0, %v1876_v21, -inf }
 0xf4d   :  { %1885 = vmax.xlane.f32.xlu0 %v1884_v57 }
 0xfc9   :  { %v1603_v22 = vpop.xlane.xlu1 %1602 }
 0xfca   :  { %v1611_v23 = vsub.f32 %v1595_v52, %v1603_v22  ;;  %v1600_v26 = vpop.xlane.xlu0 %1599 }
 0xfcb   :  { %v1610_v27 = vsub.f32 %v1594_v56, %v1600_v26 }
 0xfcc   :  { %v1616_v28 = vmul.f32 1.442695, %v1611_v23 }
 0xfcd   :  { %v1614_v30 = vmul.f32 1.442695, %v1610_v27 }
 0xfce   :  { %4386 = vpow2.f32 %v1616_v28  ;;  %v1609_v31 = vpop.xlane.xlu0 %1608 }
 0xfcf   :  { %4388 = vpow2.f32 %v1614_v30  ;;  %v1613_v10 = vsub.f32 %v1597_v41, %v1609_v31 }
 0xfd1   :  { %v1620_v32 = vmul.f32 1.442695, %v1613_v10 }
 0xfd2   :  { %v1883_v6 = vpop.xlane.xlu1 %1882  ;;  %v1606_v39 = vpop.xlane.xlu0 %1605 }
 0xfd3   :  { %v1891_v62 = vsub.f32 %v1875_v33, %v1883_v6  ;;  %v1612_v35 = vsub.f32 %v1596_v8, %v1606_v39 }
 0xfd5   :  { %v1896_v34 = vmul.f32 1.442695, %v1891_v62  ;;  %v1618_v49 = vmul.f32 1.442695, %v1612_v35 }
 0xfd6   :  { %v1889_v36 = vpop.xlane.xlu1 %1888  ;;  %v1880_v37 = vpop.xlane.xlu0 %1879 }
 0xfd7   :  { %4390 = vpow2.f32 %v1896_v34  ;;  %v1893_v38 = vsub.f32 %v1877_v7, %v1889_v36  ;;  %v1890_v43 = vsub.f32 %v1874_v17, %v1880_v37 }
 0xfd8   :  { %v4957_v44 = vpop.eup %4386  ;;  %4392 = vpow2.f32 %v1620_v32 }
 0xfd9   :  { %v4389_v45 = vpop.eup %4388  ;;  %v1900_v46 = vmul.f32 1.442695, %v1893_v38  ;;  %v1894_v47 = vmul.f32 1.442695, %v1890_v43  ;;  %v1625_v48 = vsel %vm33_vm0, %v4957_v44, 0.0 }
 0xfda   :  { %1626 = vadd.xlane.f32.xlu1 %v1625_v48  ;;  %v1886_v50 = vpop.xlane.xlu0 %1885  ;;  %v1622_v51 = vsel %vm33_vm0, %v4389_v45, 0.0 }
 0xfdb   :  { %v1892_v14 = vsub.f32 %v1876_v21, %v1886_v50  ;;  %1623 = vadd.xlane.f32.xlu0 %v1622_v51  ;;  %4394 = vpow2.f32 %v1894_v47  ;;  %v3419_v47 = vld [vmem:[%s5336_s2 + $0x118] sm:$0xff]  ;;  %v3405_v50 = vld [vmem:[%s5336_s2 + $0x108] sm:$0xff] }
 0xfdc   :  { %4396 = vpow2.f32 %v1900_v46  ;;  %v3418_v46 = vld [vmem:[%s5336_s2 + $0x110] sm:$0xff] }
 0xfdd   :  { %4398 = vpow2.f32 %v1618_v49  ;;  %v1898_v52 = vmul.f32 1.442695, %v1892_v14  ;;  %v4132_v48 = vpack.c.bf16 %v3419_v47, %v3418_v46  ;;  %v3404_v49 = vld [vmem:[%s5336_s2 + $0x100] sm:$0xff] }
 0xfde   :  { %v4136_v51 = vpack.c.bf16 %v3405_v50, %v3404_v49 }
 0xfdf   :  { %4400 = vpow2.f32 %v1898_v52 }
 0xfe1   :  { %v4962_v54 = vpop.eup %4390 }
 0xfe2   :  { %v1905_v55 = vsel %vm33_vm0, %v4962_v54, 0.0  ;;  %v4966_v56 = vpop.eup %4392 }
 0xfe3   :  { %1906 = vadd.xlane.f32.xlu1 %v1905_v55  ;;  %v1631_v24 = vsel %vm33_vm0, %v4966_v56, 0.0 }
 0xfe5   :  { %v4968_v58 = vpop.eup %4394 }
 0xfe6   :  { %v4972_v40 = vpop.eup %4396  ;;  %v1902_v60 = vsel %vm33_vm0, %v4968_v58, 0.0 }
 0xfe7   :  { %1632 = vadd.xlane.f32.xlu1 %v1631_v24  ;;  %v4399_v42 = vpop.eup %4398  ;;  %1903 = vadd.xlane.f32.xlu0 %v1902_v60  ;;  %v1911_v0 = vsel %vm33_vm0, %v4972_v40, 0.0  ;;  %v3429_v60 = vld [vmem:[%s5337_s3 + $0x9] ss:$0 sm:$0xff] }
 0xfe8   :  { %v1628_v41 = vsel %vm33_vm0, %v4399_v42, 0.0 }
 0xfe9   :  { %v4979_v1 = vpop.eup %4400 }
 0xfea   :  { %v1908_v3 = vsel %vm33_vm0, %v4979_v1, 0.0 }
 0xfeb   :  { %1912 = vadd.xlane.f32.xlu1 %v1911_v0  ;;  %1629 = vadd.xlane.f32.xlu0 %v1628_v41 }
 0xfef   :  { %1909 = vadd.xlane.f32.xlu0 %v1908_v3 }
 0xffc   :  { %4286 = vrot.lane.b32.xlu1 %v4902_v25, %s4473_s8 }
0x1000   :  { %4291 = vrot.lane.b32.xlu1 %v4898_v20, %s4476_s10 }
0x1004   :  { %4296 = vrot.lane.b32.xlu1 %v4902_v25, %s4476_s10 }
0x1005   :  { %4281 = vrot.lane.b32.xlu0 %v4898_v20, %s4473_s8 }
0x1067   :  { %v1627_v59 = vpop.xlane.xlu1 %1626 }
0x1068   :  { %v1624_v5 = vpop.xlane.xlu0 %1623 }
0x1069   :  { %4402 = vrcp.f32 %v1624_v5 }
0x106a   :  { %4404 = vrcp.f32 %v1627_v59 }
0x1070   :  { %v1907_v53 = vpop.xlane.xlu1 %1906 }
0x1073   :  { %v4403_v8 = vpop.eup %4402 }
0x1074   :  { %v1633_v11 = vpop.xlane.xlu1 %1632  ;;  %v1638_v33 = vmul.f32 %v4403_v8, %v4389_v45  ;;  %v1904_v12 = vpop.xlane.xlu0 %1903 }
0x1075   :  { %v4405_v26 = vpop.eup %4404 }
0x1076   :  { %3841 = vmatprep.mubr.msk.f32.mxu1 %vm33_vm0, %v1638_v33  ;;  %v1639_v10 = vmul.f32 %v4405_v26, %v4957_v44 }
0x1078   :  { %v1913_v29 = vpop.xlane.xlu1 %1912  ;;  %v1630_v15 = vpop.xlane.xlu0 %1629 }
0x1079   :  { %4406 = vrcp.f32 %v1630_v15 }
0x107a   :  { %4408 = vrcp.f32 %v1633_v11 }
0x107b   :  { %4410 = vrcp.f32 %v1904_v12 }
0x107c   :  { %v4287_v16 = vpop.permute.xlu1 %4286  ;;  %v1910_v2 = vpop.xlane.xlu0 %1909  ;;  %4412 = vrcp.f32 %v1907_v53 }
0x107d   :  { %v4289_v9 = vunpack.i.h.bf16 %v4287_v16  ;;  %v4288_v20 = vunpack.i.l.bf16 %v4287_v16  ;;  %4414 = vrcp.f32 %v1910_v2 }
0x107e   :  { %4416 = vrcp.f32 %v1913_v29 }
0x107f   :  { %v4108_v21 = vpack.c.bf16 %v4289_v9, %v4288_v20 }
0x1080   :  { %v4292_v25 = vpop.permute.xlu1 %4291  ;;  %v4282_v17 = vpop.permute.xlu0 %4281 }
0x1081   :  { %v4284_v7 = vunpack.i.h.bf16 %v4282_v17  ;;  %v4283_v18 = vunpack.i.l.bf16 %v4282_v17  ;;  %v4294_v57 = vunpack.i.h.bf16 %v4292_v25  ;;  %v4293_v22 = vunpack.i.l.bf16 %v4292_v25 }
0x1083   :  { %v4104_v19 = vpack.c.bf16 %v4284_v7, %v4283_v18  ;;  %v4407_v27 = vpop.eup %4406  ;;  %v4124_v28 = vpack.c.bf16 %v4294_v57, %v4293_v22 }
0x1084   :  { %v4297_v23 = vpop.permute.xlu1 %4296  ;;  %v4409_v6 = vpop.eup %4408  ;;  %v1640_v39 = vmul.f32 %v4407_v27, %v4399_v42 }
0x1085   :  { %4105 = vmatprep.subr.bf16.mxu1 %v4104_v19  ;;  %v4299_v30 = vunpack.i.h.bf16 %v4297_v23  ;;  %v4298_v31 = vunpack.i.l.bf16 %v4297_v23  ;;  %v4411_v62 = vpop.eup %4410  ;;  %v1641_v34 = vmul.f32 %v4409_v6, %v4966_v56  ;;  %v3435_v6 = vld [vmem:[%s5336_s2 + $0x128] sm:$0xff] }
0x1086   :  { %4107 = vmatpush3.bf16.msra.mxu1 %v4104_v19  ;;  %v4413_v35 = vpop.eup %4412  ;;  %v1918_v36 = vmul.f32 %v4411_v62, %v4968_v58  ;;  %v3436_v62 = vld [vmem:[%s5336_s2 + $0x130] sm:$0xff] }
0x1087   :  { %4109 = vmatprep.subr.bf16.mxu1 %v4108_v21  ;;  %v4128_v32 = vpack.c.bf16 %v4299_v30, %v4298_v31  ;;  %v4415_v37 = vpop.eup %4414  ;;  %v1919_v38 = vmul.f32 %v4413_v35, %v4962_v54 }
0x1088   :  { %v4417_v43 = vpop.eup %4416  ;;  %v1920_v44 = vmul.f32 %v4415_v37, %v4979_v1 }
0x1089   :  { %v1921_v45 = vmul.f32 %v4417_v43, %v4972_v40 }
0x108a   :  { %4111 = vmatpush3.bf16.msra.mxu1 %v4108_v21 }
0x108b   :  { %4125 = vmatprep.subr.bf16.mxu1 %v4124_v28 }
0x108d   :  { %3842 = vmatmul.mubr.msk.f32.vlgmr.msra.gmra.mrb[20].mxu1 %vm33_vm0, %v1639_v10  ;;  %v3434_v10 = vld [vmem:[%s5336_s2 + $0x120] sm:$0xff] }
0x108e   :  { %3844 = vmatprep.mubr.msk.f32.mxu1 %vm33_vm0, %v1640_v39  ;;  %4127 = vmatpush3.bf16.msra.mxu1 %v4124_v28  ;;  %v4140_v39 = vpack.c.bf16 %v3435_v6, %v3434_v10 }
0x108f   :  { %4129 = vmatprep.subr.bf16.mxu1 %v4128_v32 }
0x1090   :  { %4141 = vmatprep.subr.bf16.mxu0 %v4140_v39 }
0x1091   :  { %3845 = vmatmul.mubr.msk.f32.gmra.mrb[22].mxu1 %vm33_vm0, %v1641_v34  ;;  %4143 = vmatpush3.bf16.msra.mxu0 %v4140_v39 }
0x1092   :  { %4131 = vmatpush3.bf16.msra.mxu1 %v4128_v32  ;;  %3869 = vmatprep.mubr.msk.f32.mxu1 %vm33_vm0, %v1918_v36  ;;  %v3437_v32 = vld [vmem:[%s5336_s2 + $0x138] sm:$0xff] }
0x1093   :  { %4133 = vmatprep.subr.bf16.mxu1 %v4132_v48  ;;  %v4144_v34 = vpack.c.bf16 %v3437_v32, %v3436_v62 }
0x1095   :  { %3870 = vmatmul.mubr.msk.f32.vlgmr.msra.gmra.mrb[24].mxu1 %vm33_vm0, %v1919_v38  ;;  %4145 = vmatprep.subr.bf16.mxu0 %v4144_v34 }
0x1096   :  { %3872 = vmatprep.mubr.msk.f32.mxu1 %vm33_vm0, %v1920_v44  ;;  %4135 = vmatpush3.bf16.msra.mxu1 %v4132_v48 }
0x1097   :  { %4137 = vmatprep.subr.bf16.mxu1 %v4136_v51  ;;  %4147 = vmatpush3.bf16.msra.mxu0 %v4144_v34 }
0x1099   :  { %3873 = vmatmul.mubr.msk.f32.gmra.mrb[26].mxu1 %vm33_vm0, %v1921_v45 }
0x1160   :  { %v3843_v14 = vpop.f32.mrb[20].mxu1 }
0x1161   :  { %v1732_v52 = vpop.f32.mrb[21].mxu1 }
0x1164   :  { %v3846_v54 = vpop.f32.mrb[22].mxu1 }
0x1165   :  { %v1742_v55 = vpop.f32.mrb[23].mxu1 }
0x1168   :  { %v3871_v56 = vpop.f32.mrb[24].mxu1 }
0x1169   :  { %v2012_v58 = vpop.f32.mrb[25].mxu1 }
0x116a   :  { %3879 = vmatprep.mubr.msk.f32.mxu1 %vm225_vm1, %v2012_v58 }
0x116b   :  { %3880 = vmatmul.mubr.msk.f32.vlgmr.msra.gmra.mrb[28].mxu1 %vm225_vm1, %v3871_v56  ;;  %v3433_v56 = vld [vmem:[%s5337_s3 + $0xb] ss:$0 sm:$0xff] }
0x116c   :  { %v3874_v24 = vpop.f32.mrb[26].mxu1  ;;  %4139 = vmatpush3.bf16.msra.mxu1 %v4136_v51 }
0x116d   :  { %v2022_v40 = vpop.f32.mrb[27].mxu1 }
0x116e   :  { %3882 = vmatprep.mubr.msk.f32.mxu1 %vm225_vm1, %v2022_v40 }
0x116f   :  { %3883 = vmatmul.mubr.msk.f32.gmra.mrb[30].mxu1 %vm225_vm1, %v3874_v24 }
0x1170   :  { %3889 = vmatprep.mubr.msk.f32.mxu1 %vm225_vm1, %v1732_v52 }
0x1173   :  { %3890 = vmatmul.mubr.msk.f32.vlgmr.msra.gmra.mrb[28].mxu1 %vm225_vm1, %v3843_v14  ;;  %v3432_v14 = vld [vmem:[%s5337_s3 + $0xa] ss:$0 sm:$0xff] }
0x1174   :  { %3892 = vmatprep.mubr.msk.f32.mxu1 %vm225_vm1, %v1742_v55 }
0x1177   :  { %3893 = vmatmul.mubr.msk.f32.gmra.mrb[30].mxu1 %vm225_vm1, %v3846_v54 }
0x1246   :  { %v3891_v42 = vpop.f32.mrb[28].mxu1 }
0x1247   :  { %v2233_v0 = vadd.f32 %v3891_v42, %v3429_v60  ;;  %v2208_v41 = vpop.f32.mrb[29].mxu1 }
0x1248   :  { %v2232_v1 = vadd.f32 %v3429_v60, %v2208_v41 }
0x1249   :  { %v2237_v3 = vadd.f32 %v2233_v0, %v4880_v4 }
0x124a   :  { %v3894_v5 = vpop.f32.mrb[30].mxu1  ;;  %v2236_v59 = vadd.f32 %v2232_v1, %v4878_v13 }
0x124b   :  { %v2218_v53 = vpop.f32.mrb[31].mxu1  ;;  %v2245_v8 = vsel %vm33_vm0, %v2237_v3, 0.0  ;;  %v2235_v11 = vadd.f32 %v3894_v5, %v3429_v60 }
0x124c   :  { %v2234_v33 = vadd.f32 %v3429_v60, %v2218_v53  ;;  %2246 = vadd.xlane.f32.xlu1 %v2245_v8  ;;  %v2242_v12 = vsel %vm33_vm0, %v2236_v59, 0.0  ;;  %v3444_v8 = vld [vmem:[%s5336_s2 + $0x140] sm:$0xff] }
0x124d   :  { %2243 = vadd.xlane.f32.xlu0 %v2242_v12  ;;  %v2239_v16 = vadd.f32 %v2235_v11, %v4888_v61  ;;  %v3445_v11 = vld [vmem:[%s5336_s2 + $0x148] sm:$0xff]  ;;  %v3446_v12 = vld [vmem:[%s5336_s2 + $0x150] sm:$0xff] }
0x124e   :  { %v2238_v29 = vadd.f32 %v2234_v33, %v4886_v63  ;;  %v4148_v33 = vpack.c.bf16 %v3445_v11, %v3444_v8 }
0x124f   :  { %v2251_v4 = vsel %vm33_vm0, %v2239_v16, 0.0 }
0x1250   :  { %v2248_v15 = vsel %vm33_vm0, %v2238_v29, 0.0  ;;  %4149 = vmatprep.subr.bf16.mxu0 %v4148_v33 }
0x1251   :  { %2249 = vadd.xlane.f32.xlu0 %v2248_v15 }
0x1255   :  { %2252 = vadd.xlane.f32.xlu0 %v2251_v4  ;;  %v3449_v4 = vld [vmem:[%s5336_s2 + $0x168] sm:$0xff] }
0x12d9   :  { %v2247_v13 = vpop.xlane.xlu1 %2246 }
0x12da   :  { %v2255_v2 = vmul.f32 0.03125, %v2247_v13  ;;  %v2244_v25 = vpop.xlane.xlu0 %2243 }
0x12db   :  { %v2254_v17 = vmul.f32 0.03125, %v2244_v25  ;;  %v3451_v25 = vld [vmem:[%s5336_s2 + $0x178] sm:$0xff] }
0x12dc   :  { %v2259_v9 = vsub.f32 %v2237_v3, %v2255_v2  ;;  %v3450_v2 = vld [vmem:[%s5336_s2 + $0x170] sm:$0xff] }
0x12dd   :  { %v2258_v20 = vsub.f32 %v2236_v59, %v2254_v17  ;;  %v4160_v17 = vpack.c.bf16 %v3451_v25, %v3450_v2 }
0x12de   :  { %v2250_v7 = vpop.xlane.xlu0 %2249  ;;  %v2263_v18 = vmul.f32 %v2259_v9, %v2259_v9 }
0x12df   :  { %v2256_v19 = vmul.f32 0.03125, %v2250_v7  ;;  %v2262_v21 = vmul.f32 %v2258_v20, %v2258_v20 }
0x12e0   :  { %v2269_v63 = vsel %vm33_vm0, %v2263_v18, 0.0  ;;  %v3454_v18 = vld [vmem:[%s5336_s2 + $0x190] sm:$0xff] }
0x12e1   :  { %v2260_v57 = vsub.f32 %v2238_v29, %v2256_v19  ;;  %2270 = vadd.xlane.f32.xlu1 %v2269_v63  ;;  %v2266_v61 = vsel %vm33_vm0, %v2262_v21, 0.0  ;;  %v3447_v29 = vld [vmem:[%s5336_s2 + $0x158] sm:$0xff]  ;;  %v3456_v63 = vld [vmem:[%s5336_s2 + $0x1a0] sm:$0xff] }
0x12e2   :  { %2267 = vadd.xlane.f32.xlu0 %v2266_v61  ;;  %v2253_v22 = vpop.xlane.xlu0 %2252  ;;  %v4152_v15 = vpack.c.bf16 %v3447_v29, %v3446_v12  ;;  %v3455_v19 = vld [vmem:[%s5336_s2 + $0x198] sm:$0xff] }
0x12e3   :  { %v2257_v23 = vmul.f32 0.03125, %v2253_v22  ;;  %v2264_v26 = vmul.f32 %v2260_v57, %v2260_v57  ;;  %v4168_v21 = vpack.c.bf16 %v3455_v19, %v3454_v18  ;;  %v3458_v22 = vld [vmem:[%s5336_s2 + $0x1b0] sm:$0xff] }
0x12e5   :  { %v2261_v27 = vsub.f32 %v2239_v16, %v2257_v23  ;;  %v2272_v28 = vsel %vm33_vm0, %v2264_v26, 0.0  ;;  %v3448_v16 = vld [vmem:[%s5336_s2 + $0x160] sm:$0xff]  ;;  %v3459_v23 = vld [vmem:[%s5336_s2 + $0x1b8] sm:$0xff] }
0x12e6   :  { %2273 = vadd.xlane.f32.xlu0 %v2272_v28  ;;  %v4156_v13 = vpack.c.bf16 %v3449_v4, %v3448_v16  ;;  %v4176_v26 = vpack.c.bf16 %v3459_v23, %v3458_v22 }
0x12e7   :  { %v2265_v30 = vmul.f32 %v2261_v27, %v2261_v27 }
0x12e9   :  { %v2275_v31 = vsel %vm33_vm0, %v2265_v30, 0.0 }
0x12ea   :  { %2276 = vadd.xlane.f32.xlu1 %v2275_v31 }
0x136e   :  { %v2271_v35 = vpop.xlane.xlu1 %2270 }
0x136f   :  { %v2279_v36 = vmul.f32 0.03125, %v2271_v35  ;;  %v2268_v37 = vpop.xlane.xlu0 %2267 }
0x1370   :  { %v2278_v38 = vmul.f32 0.03125, %v2268_v37 }
0x1371   :  { %v2283_v43 = vadd.f32 1e-12, %v2279_v36 }
0x1372   :  { %v2282_v44 = vadd.f32 1e-12, %v2278_v38 }
0x1373   :  { %4418 = vrsqrt.f32 %v2283_v43  ;;  %v2274_v45 = vpop.xlane.xlu0 %2273 }
0x1374   :  { %4420 = vrsqrt.f32 %v2282_v44  ;;  %v2280_v46 = vmul.f32 0.03125, %v2274_v45 }
0x1376   :  { %v2284_v47 = vadd.f32 1e-12, %v2280_v46 }
0x1377   :  { %v2277_v48 = vpop.xlane.xlu1 %2276 }
0x1378   :  { %4422 = vrsqrt.f32 %v2284_v47  ;;  %v2281_v49 = vmul.f32 0.03125, %v2277_v48 }
0x137a   :  { %v2285_v50 = vadd.f32 1e-12, %v2281_v49 }
0x137c   :  { %4424 = vrsqrt.f32 %v2285_v50 }
0x137d   :  { %v4419_v51 = vpop.eup %4418 }
0x137e   :  { %v4421_v52 = vpop.eup %4420  ;;  %v2291_v54 = vmul.f32 %v4419_v51, %v2259_v9  ;;  %v3452_v9 = vld [vmem:[%s5336_s2 + $0x180] sm:$0xff] }
0x137f   :  { %v2290_v55 = vmul.f32 %v4421_v52, %v2258_v20  ;;  %v3453_v20 = vld [vmem:[%s5336_s2 + $0x188] sm:$0xff] }
0x1380   :  { %v2299_v58 = vmul.f32 %v3432_v14, %v2291_v54  ;;  %v4164_v7 = vpack.c.bf16 %v3453_v20, %v3452_v9 }
0x1381   :  { %v2298_v24 = vmul.f32 %v3432_v14, %v2290_v55 }
0x1382   :  { %v4423_v40 = vpop.eup %4422  ;;  %v5060_v0 = vadd.f32 %v3433_v56, %v2299_v58 }
0x1383   :  { %v5058_v60 = vadd.f32 %v3433_v56, %v2298_v24  ;;  %v2292_v42 = vmul.f32 %v4423_v40, %v2260_v57  ;;  %v3457_v57 = vld [vmem:[%s5336_s2 + $0x1a8] sm:$0xff] }
0x1384   :  { %v4172_v61 = vpack.c.bf16 %v3457_v57, %v3456_v63 }
0x1385   :  { %3903 = vmatprep.mubr.msk.f32.mxu0 %vm33_vm0, %v5058_v60  ;;  %v2300_v41 = vmul.f32 %v3432_v14, %v2292_v42 }
0x1386   :  { %v4425_v1 = vpop.eup %4424  ;;  %3904 = vmatmul.mubr.msk.f32.vlgmr.msra.gmra.mrb[24].mxu0 %vm33_vm0, %v5060_v0 }
0x1387   :  { %v5066_v3 = vadd.f32 %v3433_v56, %v2300_v41  ;;  %v2293_v5 = vmul.f32 %v4425_v1, %v2261_v27  ;;  %4151 = vmatpush3.bf16.msra.mxu0 %v4148_v33  ;;  %v3439_v27 = vld [vmem:[%s5337_s3 + $0xc] ss:$0 sm:$0xff] }
0x1388   :  { %4153 = vmatprep.subr.bf16.mxu0 %v4152_v15 }
0x1389   :  { %3906 = vmatprep.mubr.msk.f32.mxu0 %vm33_vm0, %v5066_v3  ;;  %v2301_v59 = vmul.f32 %v3432_v14, %v2293_v5 }
0x138b   :  { %v5070_v53 = vadd.f32 %v3433_v56, %v2301_v59  ;;  %4155 = vmatpush3.bf16.msra.mxu0 %v4152_v15 }
0x138c   :  { %4157 = vmatprep.subr.bf16.mxu0 %v4156_v13 }
0x138d   :  { %3907 = vmatmul.mubr.msk.f32.gmra.mrb[26].mxu0 %vm33_vm0, %v5070_v53 }
0x138f   :  { %4159 = vmatpush3.bf16.msra.mxu0 %v4156_v13 }
0x1390   :  { %4161 = vmatprep.subr.bf16.mxu0 %v4160_v17 }
0x1393   :  { %4163 = vmatpush3.bf16.msra.mxu0 %v4160_v17  ;;  %v3461_v17 = vld [vmem:[%s5337_s3 + $0xd] ss:$0 sm:$0xff] }
0x1394   :  { %4165 = vmatprep.subr.bf16.mxu0 %v4164_v7 }
0x1397   :  { %4167 = vmatpush3.bf16.msra.mxu0 %v4164_v7 }
0x1398   :  { %4169 = vmatprep.subr.bf16.mxu0 %v4168_v21 }
0x139b   :  { %4171 = vmatpush3.bf16.msra.mxu0 %v4168_v21 }
0x139c   :  { %4173 = vmatprep.subr.bf16.mxu0 %v4172_v61 }
0x139f   :  { %4175 = vmatpush3.bf16.msra.mxu0 %v4172_v61 }
0x13a0   :  { %4177 = vmatprep.subr.bf16.mxu0 %v4176_v26 }
0x13a3   :  { %4179 = vmatpush3.bf16.msra.mxu0 %v4176_v26 }
0x1459   :  { %v3905_v28 = vpop.f32.mrb[24].mxu0 }
0x145a   :  { %v2403_v30 = vadd.f32 %v3905_v28, %v3439_v27  ;;  %v2397_v31 = vpop.f32.mrb[25].mxu0 }
0x145b   :  { %v2398_v10 = vadd.f32 %v3439_v27, %v2397_v31 }
0x145c   :  { %v2417_v6 = vmul.f32 %v2403_v30, %v2403_v30 }
0x145d   :  { %v2416_v39 = vmul.f32 %v2398_v10, %v2398_v10 }
0x145e   :  { %v2421_v62 = vmul.f32 %v2417_v6, %v2403_v30 }
0x145f   :  { %v2420_v32 = vmul.f32 %v2416_v39, %v2398_v10 }
0x1460   :  { %v2425_v34 = vmul.f32 0.044715, %v2421_v62  ;;  %v3908_v35 = vpop.f32.mrb[26].mxu0 }
0x1461   :  { %v2424_v36 = vmul.f32 0.044715, %v2420_v32  ;;  %v2413_v37 = vadd.f32 %v3908_v35, %v3439_v27  ;;  %v2407_v38 = vpop.f32.mrb[27].mxu0 }
0x1462   :  { %v2429_v43 = vadd.f32 %v2425_v34, %v2403_v30  ;;  %v2408_v44 = vadd.f32 %v3439_v27, %v2407_v38 }
0x1463   :  { %v2428_v45 = vadd.f32 %v2424_v36, %v2398_v10  ;;  %v2419_v46 = vmul.f32 %v2413_v37, %v2413_v37 }
0x1464   :  { %v2433_v47 = vmul.f32 0.7978846, %v2429_v43  ;;  %v2418_v48 = vmul.f32 %v2408_v44, %v2408_v44 }
0x1465   :  { %v2432_v49 = vmul.f32 0.7978846, %v2428_v45  ;;  %v2423_v50 = vmul.f32 %v2419_v46, %v2413_v37 }
0x1466   :  { %4426 = vtanh.f32 %v2433_v47  ;;  %v2422_v51 = vmul.f32 %v2418_v48, %v2408_v44  ;;  %v2637_v47 = vld [vmem:[%s5338_s4] sm:$0xff]  ;;  %v2638_v48 = vld [vmem:[%s5338_s4 + $0x8] sm:$0xff] }
0x1467   :  { %v2427_v14 = vmul.f32 0.044715, %v2423_v50  ;;  %4428 = vtanh.f32 %v2432_v49  ;;  %v4181_v49 = vpack.c.bf16 %v2638_v48, %v2637_v47  ;;  %v4477_v50 = vmov 0.0|0.0  }
0x1468   :  { %v2426_v52 = vmul.f32 0.044715, %v2422_v51  ;;  %4180 = vmatprep.subr.bf16.mxu1 %v4477_v50  ;;  %v2639_v51 = vld [vmem:[%s5338_s4 + $0x10] sm:$0xff] }
0x1469   :  { %v2431_v54 = vadd.f32 %v2427_v14, %v2413_v37  ;;  %4182 = vmatpush3.bf16.msra.mxu1 %v4181_v49  ;;  %v2640_v14 = vld [vmem:[%s5338_s4 + $0x18] sm:$0xff] }
0x146a   :  { %v2430_v55 = vadd.f32 %v2426_v52, %v2408_v44  ;;  %4183 = vmatprep.subr.bf16.mxu1 %v4477_v50  ;;  %v4184_v52 = vpack.c.bf16 %v2640_v14, %v2639_v51  ;;  %v3466_v50 = vld [vmem:[%s5339_s5] ss:$0 sm:$0xff] }
0x146b   :  { %v2435_v56 = vmul.f32 0.7978846, %v2431_v54  ;;  %v4479_v54 = vmov 0.0  }
0x146c   :  { %v2434_v58 = vmul.f32 0.7978846, %v2430_v55  ;;  %3955 = vmatprep.mubr.msk.f32.mxu1 %vm4478_vm3, %v4479_v54  ;;  %v5171_v55 = vld [vmem:[%s5338_s4 + $0x20] sm:$0xff] }
0x146d   :  { %4430 = vtanh.f32 %v2435_v56  ;;  %4185 = vmatpush3.bf16.msra.mxu1 %v4184_v52  ;;  %v5176_v56 = vld [vmem:[%s5338_s4 + $0x28] sm:$0xff] }
0x146e   :  { %4432 = vtanh.f32 %v2434_v58  ;;  %v4480_v58 = vmov 16  }
0x146f   :  { %4301 = vset.pattern.permute.xlu1 %v4480_v58  ;;  %4300 = vset.pattern.permute.xlu0 %v4480_v58 }
0x1470   :  { %v4427_v24 = vpop.eup %4426 }
0x1471   :  { %v4429_v40 = vpop.eup %4428  ;;  %v2441_v42 = vadd.f32 1.0, %v4427_v24  ;;  %v5183_v24 = vld [vmem:[%s5338_s4 + $0x48] sm:$0x3] }
0x1472   :  { %v2440_v41 = vadd.f32 1.0, %v4429_v40  ;;  %v4481_v40 = vmov 17  }
0x1473   :  { %v2445_v1 = vmul.f32 0.5, %v2441_v42  ;;  %v2722_v42 = vld [vmem:[%s5338_s4 + $0x30] sm:$0xff] }
0x1474   :  { %v2444_v5 = vmul.f32 0.5, %v2440_v41  ;;  %v2723_v41 = vld [vmem:[%s5338_s4 + $0x38] sm:$0xff] }
0x1475   :  { %v2449_v11 = vmul.f32 %v2445_v1, %v2403_v30  ;;  %v2724_v1 = vld [vmem:[%s5338_s4 + $0x40] sm:$0xff] }
0x1476   :  { %v2448_v59 = vmul.f32 %v2444_v5, %v2398_v10 }
0x1477   :  { %v4431_v8 = vpop.eup %4430 }
0x1478   :  { %v4433_v33 = vpop.eup %4432  ;;  %3941 = vmatprep.mubr.f32.mxu0 %v2448_v59  ;;  %v2443_v12 = vadd.f32 1.0, %v4431_v8 }
0x1479   :  { %3942 = vmatmul.mubr.f32.vlgmr.msra.gmra.mrb[28].mxu0 %v2449_v11  ;;  %v2442_v29 = vadd.f32 1.0, %v4433_v33 }
0x147a   :  { %v2447_v15 = vmul.f32 0.5, %v2443_v12 }
0x147b   :  { %v2446_v16 = vmul.f32 0.5, %v2442_v29 }
0x147c   :  { %v2451_v13 = vmul.f32 %v2447_v15, %v2413_v37 }
0x147d   :  { %v2450_v4 = vmul.f32 %v2446_v16, %v2408_v44 }
0x147f   :  { %3944 = vmatprep.mubr.f32.mxu0 %v2450_v4 }
0x1480   :  { %3945 = vmatmul.mubr.f32.gmra.mrb[30].mxu0 %v2451_v13 }
0x154c   :  { %v3943_v2 = vpop.f32.mrb[28].mxu0 }
0x154d   :  { %v2539_v25 = vpop.f32.mrb[29].mxu0  ;;  %v2545_v19 = vadd.f32 %v3943_v2, %v3461_v17 }
0x154e   :  { %v2540_v20 = vadd.f32 %v3461_v17, %v2539_v25 }
0x154f   :  { %v2559_v26 = vadd.f32 %v2545_v19, %v5060_v0 }
0x1550   :  { %v2558_v22 = vadd.f32 %v2540_v20, %v5058_v60 }
0x1551   :  { %v2567_v28 = vsel %vm33_vm0, %v2559_v26, 0.0 }
0x1552   :  { %v2564_v27 = vsel %vm33_vm0, %v2558_v22, 0.0 }
0x1553   :  { %v3946_v9 = vpop.f32.mrb[30].mxu0 }
0x1554   :  { %v2555_v7 = vadd.f32 %v3946_v9, %v3461_v17  ;;  %v2549_v18 = vpop.f32.mrb[31].mxu0 }
0x1555   :  { %v2550_v21 = vadd.f32 %v3461_v17, %v2549_v18  ;;  %v3464_v17 = vld [vmem:[%s5337_s3 + $0xe] ss:$0 sm:$0xff]  ;;  %v3465_v18 = vld [vmem:[%s5337_s3 + $0xf] ss:$0 sm:$0xff] }
0x1556   :  { %v2561_v63 = vadd.f32 %v2555_v7, %v5070_v53 }
0x1557   :  { %v2560_v57 = vadd.f32 %v2550_v21, %v5066_v3 }
0x1558   :  { %v2573_v61 = vsel %vm33_vm0, %v2561_v63, 0.0 }
0x1559   :  { %2574 = vadd.xlane.f32.xlu0 %v2573_v61  ;;  %v2570_v23 = vsel %vm33_vm0, %v2560_v57, 0.0 }
0x155a   :  { %2571 = vadd.xlane.f32.xlu1 %v2570_v23 }
0x155d   :  { %2565 = vadd.xlane.f32.xlu0 %v2564_v27 }
0x155e   :  { %2568 = vadd.xlane.f32.xlu1 %v2567_v28 }
0x15e6   :  { %v2575_v30 = vpop.xlane.xlu0 %2574 }
0x15e7   :  { %v2579_v53 = vmul.f32 0.03125, %v2575_v30  ;;  %v2572_v31 = vpop.xlane.xlu1 %2571 }
0x15e8   :  { %v2578_v3 = vmul.f32 0.03125, %v2572_v31 }
0x15e9   :  { %v5136_v10 = vsub.f32 %v2561_v63, %v2579_v53 }
0x15ea   :  { %v5138_v6 = vsub.f32 %v2560_v57, %v2578_v3  ;;  %v2566_v60 = vpop.xlane.xlu0 %2565 }
0x15eb   :  { %v2576_v39 = vmul.f32 0.03125, %v2566_v60  ;;  %v2569_v62 = vpop.xlane.xlu1 %2568  ;;  %v2587_v0 = vmul.f32 %v5136_v10, %v5136_v10  ;;  %v4483_v60 = vmov 0  }
0x15ec   :  { %v2577_v32 = vmul.f32 0.03125, %v2569_v62  ;;  %v2586_v34 = vmul.f32 %v5138_v6, %v5138_v6  ;;  %v3034_v62 = vld [vmem:[%s5340_s6 + $0x8] sm:$0xff] }
0x15ed   :  { %v5144_v35 = vsub.f32 %v2558_v22, %v2576_v39  ;;  %v2597_v36 = vsel %vm33_vm0, %v2587_v0, 0.0  ;;  %v3033_v39 = vld [vmem:[%s5340_s6] sm:$0xff]  ;;  %v3036_v0 = vld [vmem:[%s5340_s6 + $0x18] sm:$0xff] }
0x15ee   :  { %v5147_v37 = vsub.f32 %v2559_v26, %v2577_v32  ;;  %2598 = vadd.xlane.f32.xlu0 %v2597_v36  ;;  %v2594_v38 = vsel %vm33_vm0, %v2586_v34, 0.0  ;;  %v3037_v32 = vld [vmem:[%s5340_s6 + $0x20] sm:$0xff]  ;;  %v3035_v34 = vld [vmem:[%s5340_s6 + $0x10] sm:$0xff]  ;;  %v4484_v36 = vmov 1  }
0x15ef   :  { %2595 = vadd.xlane.f32.xlu1 %v2594_v38  ;;  %v2584_v43 = vmul.f32 %v5144_v35, %v5144_v35  ;;  %v4486_v38 = vmov 3  }
0x15f0   :  { %v2585_v44 = vmul.f32 %v5147_v37, %v5147_v37 }
0x15f1   :  { %v2588_v45 = vsel %vm33_vm0, %v2584_v43, 0.0  ;;  %v4487_v43 = vmov 4  }
0x15f2   :  { %2589 = vadd.xlane.f32.xlu0 %v2588_v45  ;;  %v2591_v46 = vsel %vm33_vm0, %v2585_v44, 0.0  ;;  %v4488_v44 = vmov 5  }
0x15f3   :  { %2592 = vadd.xlane.f32.xlu1 %v2591_v46 }
0x1604   :  { %2733 = vperm.xlu1 %4301, %v5176_v56  }
0x1608   :  { %2728 = vperm.xlu0 %4300, %v5171_v55   ;;  %4302 = vset.pattern.permute.xlu1 %v4481_v40 }
0x1609   :  { %2874 = vperm.xlu1 %4302, %v5171_v55  }
0x160c   :  { %2753 = vperm.xlu0 %4300, %v5183_v24  }
0x160d   :  { %2878 = vperm.xlu1 %4302, %v5176_v56  }
0x1610   :  { %4307 = vset.pattern.permute.xlu0 %v4481_v40 }
0x1611   :  { %2894 = vperm.xlu0 %4307, %v5183_v24   ;;  %4303 = vset.pattern.permute.xlu1 %v4480_v58 }
0x1612   :  { %2738 = vperm.xlu1 %4303, %v2722_v42  }
0x1615   :  { %4309 = vset.pattern.permute.xlu0 %v4483_v60 }
0x1616   :  { %2743 = vperm.xlu1 %4303, %v2723_v41   ;;  %3051 = vperm.xlu0 %4309, %v3035_v34  }
0x161a   :  { %4304 = vset.pattern.permute.xlu1 %v4481_v40 }
0x161b   :  { %2882 = vperm.xlu1 %4304, %v2722_v42  }
0x161f   :  { %2886 = vperm.xlu1 %4304, %v2723_v41  }
0x1623   :  { %4305 = vset.pattern.permute.xlu1 %v4480_v58 }
0x1624   :  { %2748 = vperm.xlu1 %4305, %v2724_v1  }
0x1628   :  { %4306 = vset.pattern.permute.xlu1 %v4481_v40 }
0x1629   :  { %2890 = vperm.xlu1 %4306, %v2724_v1  }
0x162d   :  { %4308 = vset.pattern.permute.xlu1 %v4483_v60 }
0x162e   :  { %3041 = vperm.xlu1 %4308, %v3033_v39  }
0x1632   :  { %3046 = vperm.xlu1 %4308, %v3034_v62  }
0x1636   :  { %3056 = vperm.xlu1 %4308, %v3036_v0  }
0x163a   :  { %3061 = vperm.xlu1 %4308, %v3037_v32  }
0x163e   :  { %4310 = vset.pattern.permute.xlu1 %v4484_v36 }
0x163f   :  { %3092 = vperm.xlu1 %4310, %v3033_v39  }
0x1643   :  { %3100 = vperm.xlu1 %4310, %v3035_v34  }
0x1647   :  { %3104 = vperm.xlu1 %4310, %v3036_v0  }
0x167b   :  { %v2599_v5 = vpop.xlane.xlu0 %2598 }
0x167c   :  { %v2603_v59 = vmul.f32 0.03125, %v2599_v5  ;;  %v2596_v8 = vpop.xlane.xlu1 %2595 }
0x167d   :  { %v2602_v11 = vmul.f32 0.03125, %v2596_v8 }
0x167e   :  { %v2607_v33 = vadd.f32 1e-12, %v2603_v59 }
0x167f   :  { %v2606_v12 = vadd.f32 1e-12, %v2602_v11  ;;  %v2590_v29 = vpop.xlane.xlu0 %2589 }
0x1680   :  { %4434 = vrsqrt.f32 %v2607_v33  ;;  %v2600_v15 = vmul.f32 0.03125, %v2590_v29  ;;  %v2593_v16 = vpop.xlane.xlu1 %2592 }
0x1681   :  { %4436 = vrsqrt.f32 %v2606_v12  ;;  %v2601_v4 = vmul.f32 0.03125, %v2593_v16 }
0x1682   :  { %v2604_v13 = vadd.f32 1e-12, %v2600_v15 }
0x1683   :  { %v2605_v2 = vadd.f32 1e-12, %v2601_v4 }
0x1684   :  { %4438 = vrsqrt.f32 %v2604_v13  ;;  %v2734_v45 = vpop.permute.xlu1 %2733 }
0x1685   :  { %4440 = vrsqrt.f32 %v2605_v2 }
0x1688   :  { %v2875_v46 = vpop.permute.xlu1 %2874 }
0x168a   :  { %v4435_v25 = vpop.eup %4434 }
0x168b   :  { %v4437_v9 = vpop.eup %4436  ;;  %v2615_v20 = vmul.f32 %v4435_v25, %v5136_v10 }
0x168c   :  { %v2614_v7 = vmul.f32 %v4437_v9, %v5138_v6  ;;  %v4482_v6 = vmov 1.0|1.0   ;;  %v2879_v47 = vpop.permute.xlu1 %2878 }
0x168d   :  { %v2623_v19 = vmul.f32 %v3464_v17, %v2615_v20 }
0x168e   :  { %v4439_v21 = vpop.eup %4438  ;;  %v2622_v63 = vmul.f32 %v3464_v17, %v2614_v7 }
0x168f   :  { %v4441_v57 = vpop.eup %4440  ;;  %v2631_v61 = vadd.f32 %v3465_v18, %v2623_v19  ;;  %v2612_v22 = vmul.f32 %v4439_v21, %v5144_v35  ;;  %v3038_v35 = vld [vmem:[%s5340_s6 + $0x28] sm:$0x3] }
0x1690   :  { %v2630_v23 = vadd.f32 %v3465_v18, %v2622_v63  ;;  %v2613_v26 = vmul.f32 %v4441_v57, %v5147_v37  ;;  %3066 = vperm.xlu0 %4309, %v3038_v35   ;;  %3112 = vperm.xlu1 %4310, %v3038_v35   ;;  %v4485_v37 = vmov 2  }
0x1691   :  { %v2633_v27 = vrot.slane %v2631_v61, 7  ;;  %v2620_v28 = vmul.f32 %v3464_v17, %v2612_v22  ;;  %v2739_v48 = vpop.permute.xlu1 %2738 }
0x1692   :  { %v2621_v30 = vmul.f32 %v3464_v17, %v2613_v26 }
0x1693   :  { %v2636_v53 = vsel %vm2635_vm4, %v2630_v23, %v2633_v27  ;;  %v2628_v31 = vadd.f32 %v3465_v18, %v2620_v28 }
0x1694   :  { %3956 = vmatmul.mubr.msk.f32.vlgmr.msra.gmra.mrb[32].mxu1 %vm33_vm0, %v2636_v53  ;;  %v2629_v3 = vadd.f32 %v3465_v18, %v2621_v30  ;;  %4311 = vset.pattern.permute.xlu0 %v4484_v36 }
0x1695   :  { %3962 = vmatprep.mubr.msk.f32.mxu1 %vm225_vm1, %v5171_v55  ;;  %3096 = vperm.xlu0 %4311, %v3034_v62   ;;  %v2744_v49 = vpop.permute.xlu1 %2743  ;;  %v2756_v55 = vlaneseq }
0x1696   :  { %v4186_v10 = vpack.c.bf16 %v2629_v3, %v2628_v31  ;;  %4313 = vset.pattern.permute.xlu1 %v4485_v37 }
0x1697   :  { %3141 = vperm.xlu1 %4313, %v3034_v62  }
0x1698   :  { %4187 = vmatprep.subr.bf16.mxu1 %v4186_v10 }
0x1699   :  { %4189 = vmatpush3.bf16.msra.mxu1 %v4186_v10  ;;  %3108 = vperm.xlu0 %4311, %v3037_v32  }
0x169a   :  { %4190 = vmatprep.subr.bf16.mxu1 %v4482_v6  ;;  %v2883_v51 = vpop.permute.xlu1 %2882 }
0x169b   :  { %3145 = vperm.xlu1 %4313, %v3035_v34  }
0x169c   :  { %3963 = vmatmul.mubr.msk.f32.vlgmr.msra.gmra.mrb[34].mxu1 %vm225_vm1, %v5176_v56  ;;  %v2729_v56 = vpop.permute.xlu0 %2728 }
0x169d   :  { %3965 = vmatprep.mubr.msk.f32.mxu1 %vm225_vm1, %v2722_v42  ;;  %4191 = vmatpush3.bf16.msra.mxu1 %v4482_v6 }
0x169e   :  { %4192 = vmatprep.subr.bf16.mxu1 %v4482_v6  ;;  %4312 = vset.pattern.permute.xlu0 %v4485_v37  ;;  %v2887_v58 = vpop.permute.xlu1 %2886 }
0x169f   :  { %3137 = vperm.xlu0 %4312, %v3033_v39   ;;  %3153 = vperm.xlu1 %4313, %v3037_v32  }
0x16a0   :  { %3966 = vmatmul.mubr.msk.f32.gmra.mrb[36].mxu1 %vm225_vm1, %v2723_v41  ;;  %v2754_v42 = vpop.permute.xlu0 %2753 }
0x16a1   :  { %3968 = vmatprep.mubr.msk.f32.mxu1 %vm225_vm1, %v2724_v1  ;;  %4193 = vmatpush3.bf16.msra.mxu1 %v4482_v6 }
0x16a3   :  { %3149 = vperm.xlu0 %4312, %v3036_v0   ;;  %4314 = vset.pattern.permute.xlu1 %v4486_v38  ;;  %v2749_v59 = vpop.permute.xlu1 %2748 }
0x16a4   :  { %3969 = vmatmul.mubr.msk.f32.gmra.mrb[38].mxu1 %vm225_vm1, %v5183_v24  ;;  %3202 = vperm.xlu1 %4314, %v3038_v35   ;;  %v2757_v24 = vshrl.u32 %v2756_v55, 7  ;;  %v2895_v15 = vpop.permute.xlu0 %2894 }
0x16a6   :  { %v2758_v1 = vsub.s32 0, %v2757_v24  ;;  %v2899_v5 = vsub.s32 1, %v2757_v24 }
0x16a7   :  { %3157 = vperm.xlu0 %4312, %v3038_v35  }
0x16a8   :  { %3186 = vperm.xlu1 %4314, %v3034_v62   ;;  %v2891_v2 = vpop.permute.xlu1 %2890 }
0x16ab   :  { %4315 = vset.pattern.permute.xlu0 %v4486_v38 }
0x16ac   :  { %3182 = vperm.xlu0 %4315, %v3033_v39   ;;  %3198 = vperm.xlu1 %4314, %v3037_v32  }
0x16b0   :  { %4316 = vset.pattern.permute.xlu0 %v4487_v43  ;;  %3190 = vperm.xlu1 %4314, %v3035_v34  }
0x16b1   :  { %3246 = vperm.xlu0 %4316, %v3038_v35  }
0x16b4   :  { %3194 = vperm.xlu1 %4314, %v3036_v0  }
0x16b5   :  { %3226 = vperm.xlu0 %4316, %v3033_v39  }
0x16b8   :  { %4317 = vset.pattern.permute.xlu1 %v4487_v43 }
0x16b9   :  { %3242 = vperm.xlu0 %4316, %v3037_v32   ;;  %3230 = vperm.xlu1 %4317, %v3034_v62  }
0x16bd   :  { %3234 = vperm.xlu0 %4316, %v3035_v34   ;;  %4318 = vset.pattern.permute.xlu1 %v4488_v44 }
0x16be   :  { %3290 = vperm.xlu1 %4318, %v3038_v35  }
0x16c1   :  { %4320 = vset.pattern.permute.xlu0 %v4488_v44 }
0x16c2   :  { %3270 = vperm.xlu0 %4320, %v3033_v39   ;;  %4319 = vset.pattern.permute.xlu1 %v4487_v43  ;;  %v3042_v39 = vpop.permute.xlu1 %3041  ;;  %v3052_v43 = vpop.permute.xlu0 %3051 }
0x16c3   :  { %3238 = vperm.xlu1 %4319, %v3036_v0  }
0x16c6   :  { %3278 = vperm.xlu0 %4320, %v3035_v34  }
0x16c7   :  { %4321 = vset.pattern.permute.xlu1 %v4488_v44 }
0x16c8   :  { %3274 = vperm.xlu1 %4321, %v3034_v62   ;;  %v3047_v62 = vpop.permute.xlu1 %3046 }
0x16cc   :  { %3286 = vperm.xlu1 %4321, %v3037_v32  }
0x16d0   :  { %3282 = vperm.xlu1 %4321, %v3036_v0   ;;  %v3057_v0 = vpop.permute.xlu1 %3056 }
0x16d4   :  { %v5246_v32 = vpop.permute.xlu1 %3061 }
0x16d8   :  { %v3093_v34 = vpop.permute.xlu1 %3092 }
0x16dc   :  { %v3101_v35 = vpop.permute.xlu1 %3100 }
0x16e0   :  { %v3105_v36 = vpop.permute.xlu1 %3104 }
0x170f   :  { %v5248_v37 = vpop.permute.xlu1 %3112 }
0x1716   :  { %v3142_v38 = vpop.permute.xlu1 %3141 }
0x171a   :  { %v3146_v44 = vpop.permute.xlu1 %3145 }
0x1767   :  { %v2715_v14 = vpop.f32.mrb[32].mxu1 }
0x1768   :  { %v2716_v52 = vadd.f32 %v3466_v50, %v2715_v14  ;;  %v3957_v54 = vpop.f32.mrb[33].mxu1 }
0x176a   :  { %4442 = vtanh.f32 %v2716_v52 }
0x176f   :  { %v3964_v40 = vpop.f32.mrb[34].mxu1 }
0x1770   :  { %v2844_v41 = vpop.f32.mrb[35].mxu1 }
0x1773   :  { %v3967_v8 = vpop.f32.mrb[36].mxu1 }
0x1774   :  { %v4443_v11 = vpop.eup %4442  ;;  %v2854_v33 = vpop.f32.mrb[37].mxu1 }
0x1775   :  { %v2759_v12 = vrot.slane %v4443_v11, %v2758_v1  ;;  %v2900_v29 = vrot.slane %v4443_v11, %v2899_v5 }
0x1777   :  { %v2903_v16 = vmul.f32 %v2900_v29, %v2883_v51  ;;  %v2760_v4 = vmul.f32 %v2759_v12, %v2729_v56  ;;  %v2765_v13 = vmul.f32 %v2759_v12, %v2754_v42  ;;  %v3970_v25 = vpop.f32.mrb[38].mxu1  ;;  %v2764_v17 = vmul.f32 %v2759_v12, %v2749_v59 }
0x1778   :  { %v2761_v9 = vmul.f32 %v2759_v12, %v2734_v45  ;;  %v2902_v20 = vmul.f32 %v2900_v29, %v2879_v47  ;;  %v2901_v7 = vmul.f32 %v2900_v29, %v2875_v46  ;;  %v2864_v18 = vpop.f32.mrb[39].mxu1  ;;  %v2763_v21 = vmul.f32 %v2759_v12, %v2744_v49  ;;  %v5250_v45 = vpop.permute.xlu0 %3066 }
0x1779   :  { %v2845_v19 = vadd.f32 %v2844_v41, %v2760_v4  ;;  %v2906_v63 = vmul.f32 %v2900_v29, %v2895_v15  ;;  %v2762_v57 = vmul.f32 %v2759_v12, %v2739_v48  ;;  %v2905_v22 = vmul.f32 %v2900_v29, %v2891_v2  ;;  %v5252_v46 = vpop.permute.xlu1 %3153 }
0x177a   :  { %v2850_v61 = vadd.f32 %v3964_v40, %v2761_v9  ;;  %v2870_v23 = vadd.f32 %v3970_v25, %v2765_v13  ;;  %v2865_v26 = vadd.f32 %v2864_v18, %v2764_v17  ;;  %v2904_v27 = vmul.f32 %v2900_v29, %v2887_v58 }
0x177b   :  { %v2907_v28 = vadd.f32 %v2901_v7, %v2845_v19  ;;  %v2860_v30 = vadd.f32 %v3967_v8, %v2763_v21  ;;  %v2855_v53 = vadd.f32 %v2854_v33, %v2762_v57 }
0x177c   :  { %v2908_v31 = vadd.f32 %v2902_v20, %v2850_v61  ;;  %v2912_v3 = vadd.f32 %v2906_v63, %v2870_v23  ;;  %v2911_v10 = vadd.f32 %v2905_v22, %v2865_v26  ;;  %v3097_v47 = vpop.permute.xlu0 %3096 }
0x177d   :  { %v2910_v6 = vadd.f32 %v2904_v27, %v2860_v30  ;;  %v2909_v60 = vadd.f32 %v2903_v16, %v2855_v53  ;;  %3979 = vmatprep.mubr.msk.f32.mxu1 %vm33_vm0, %v2907_v28  ;;  %v5254_v48 = vpop.permute.xlu1 %3202 }
0x177e   :  { %3980 = vmatmul.mubr.msk.f32.vlgmr.msra.gmra.mrb[40].mxu1 %vm33_vm0, %v2908_v31 }
0x177f   :  { %3982 = vmatprep.mubr.msk.f32.mxu1 %vm33_vm0, %v2909_v60 }
0x1780   :  { %v5256_v49 = vpop.permute.xlu0 %3108 }
0x1781   :  { %v3187_v50 = vpop.permute.xlu1 %3186 }
0x1782   :  { %3983 = vmatmul.mubr.msk.f32.gmra.mrb[42].mxu1 %vm33_vm0, %v2910_v6 }
0x1783   :  { %3985 = vmatprep.mubr.msk.f32.mxu1 %vm33_vm0, %v2911_v10 }
0x1784   :  { %v3138_v51 = vpop.permute.xlu0 %3137 }
0x1785   :  { %v5258_v14 = vpop.permute.xlu1 %3198 }
0x1786   :  { %3986 = vmatmul.mubr.msk.f32.gmra.mrb[44].mxu1 %vm33_vm0, %v2912_v3 }
0x1788   :  { %v3150_v52 = vpop.permute.xlu0 %3149 }
0x1789   :  { %v3191_v54 = vpop.permute.xlu1 %3190 }
0x178c   :  { %v3158_v55 = vpop.permute.xlu0 %3157 }
0x178d   :  { %v3195_v56 = vpop.permute.xlu1 %3194 }
0x1790   :  { %v3183_v58 = vpop.permute.xlu0 %3182 }
0x1791   :  { %v3231_v24 = vpop.permute.xlu1 %3230 }
0x1794   :  { %v3247_v40 = vpop.permute.xlu0 %3246 }
0x1795   :  { %v3291_v42 = vpop.permute.xlu1 %3290 }
0x1798   :  { %v3227_v41 = vpop.permute.xlu0 %3226 }
0x1799   :  { %v3239_v1 = vpop.permute.xlu1 %3238 }
0x179c   :  { %v5260_v5 = vpop.permute.xlu0 %3242 }
0x179d   :  { %v3275_v59 = vpop.permute.xlu1 %3274 }
0x17a0   :  { %v3235_v8 = vpop.permute.xlu0 %3234 }
0x17a1   :  { %v5262_v33 = vpop.permute.xlu1 %3286 }
0x17a4   :  { %v3271_v15 = vpop.permute.xlu0 %3270 }
0x17a5   :  { %v3283_v26 = vpop.permute.xlu1 %3282 }
0x17a8   :  { %v3279_v27 = vpop.permute.xlu0 %3278 }
0x1851   :  { %v3981_v11 = vpop.f32.mrb[40].mxu1 }
0x1852   :  { %v3027_v12 = vmax.f32 %v3981_v11, 0.0  ;;  %v2997_v29 = vpop.f32.mrb[41].mxu1 }
0x1853   :  { %v3026_v16 = vmax.f32 %v2997_v29, 0.0 }
0x1854   :  { %v5264_v4 = vmul.f32 %v3047_v62, %v3027_v12  ;;  %v5268_v25 = vmul.f32 %v3097_v47, %v3027_v12  ;;  %v5270_v17 = vmul.f32 %v3142_v38, %v3027_v12  ;;  %v5272_v9 = vmul.f32 %v3187_v50, %v3027_v12 }
0x1855   :  { %v5266_v13 = vmul.f32 %v3093_v34, %v3026_v16  ;;  %v3984_v2 = vpop.f32.mrb[42].mxu1  ;;  %v5274_v20 = vmul.f32 %v3231_v24, %v3027_v12  ;;  %v5276_v18 = vmul.f32 %v3275_v59, %v3027_v12  ;;  %v3069_v19 = vmul.f32 %v3042_v39, %v3026_v16 }
0x1856   :  { %v3007_v7 = vpop.f32.mrb[43].mxu1  ;;  %v3029_v21 = vmax.f32 %v3984_v2, 0.0  ;;  %v5278_v57 = vmul.f32 %v3138_v51, %v3026_v16  ;;  %v3205_v61 = vmul.f32 %v3183_v58, %v3026_v16  ;;  %v5280_v22 = vmul.f32 %v3227_v41, %v3026_v16 }
0x1857   :  { %v3028_v63 = vmax.f32 %v3007_v7, 0.0  ;;  %v5282_v23 = vmul.f32 %v3271_v15, %v3026_v16 }
0x1858   :  { %v3072_v28 = vmul.f32 %v3057_v0, %v3029_v21  ;;  %v3118_v30 = vmul.f32 %v3105_v36, %v3029_v21  ;;  %v3163_v53 = vmul.f32 %v3150_v52, %v3029_v21  ;;  %v3208_v31 = vmul.f32 %v3195_v56, %v3029_v21 }
0x1859   :  { %v3987_v3 = vpop.f32.mrb[44].mxu1  ;;  %v3252_v10 = vmul.f32 %v3239_v1, %v3029_v21  ;;  %v3071_v6 = vmul.f32 %v3052_v43, %v3028_v63  ;;  %v3117_v60 = vmul.f32 %v3101_v35, %v3028_v63  ;;  %v3162_v39 = vmul.f32 %v3146_v44, %v3028_v63 }
0x185a   :  { %v3017_v62 = vpop.f32.mrb[45].mxu1  ;;  %v3207_v34 = vmul.f32 %v3191_v54, %v3028_v63  ;;  %v3251_v38 = vmul.f32 %v3235_v8, %v3028_v63  ;;  %v3296_v47 = vmul.f32 %v3283_v26, %v3029_v21  ;;  %v3295_v50 = vmul.f32 %v3279_v27, %v3028_v63 }
0x185b   :  { %v3080_v51 = vmax.f32 %v3071_v6, %v3072_v28  ;;  %v3031_v58 = vmax.f32 %v3987_v3, 0.0  ;;  %v3030_v24 = vmax.f32 %v3017_v62, 0.0  ;;  %v3125_v41 = vmax.f32 %v3117_v60, %v3118_v30 }
0x185c   :  { %v3215_v59 = vmax.f32 %v3207_v34, %v3208_v31  ;;  %v3259_v11 = vmax.f32 %v3251_v38, %v3252_v10  ;;  %v3303_v0 = vmax.f32 %v3295_v50, %v3296_v47  ;;  %v3170_v36 = vmax.f32 %v3162_v39, %v3163_v53 }
0x185d   :  { %v3074_v52 = vmul.f32 %v5250_v45, %v3031_v58  ;;  %v3120_v56 = vmul.f32 %v5248_v37, %v3031_v58  ;;  %v3165_v43 = vmul.f32 %v3158_v55, %v3031_v58  ;;  %v3210_v35 = vmul.f32 %v5254_v48, %v3031_v58 }
0x185e   :  { %v3254_v44 = vmul.f32 %v3247_v40, %v3031_v58  ;;  %v3298_v54 = vmul.f32 %v3291_v42, %v3031_v58  ;;  %v3073_v1 = vmul.f32 %v5246_v32, %v3030_v24  ;;  %v3119_v8 = vmul.f32 %v5256_v49, %v3030_v24 }
0x185f   :  { %v3077_v12 = vsel %vm3076_vm5, %v3074_v52, -inf  ;;  %v3122_v29 = vsel %vm3076_vm5, %v3120_v56, -inf  ;;  %v3167_v15 = vsel %vm3076_vm5, %v3165_v43, -inf  ;;  %v3212_v16 = vsel %vm3076_vm5, %v3210_v35, -inf  ;;  %v3088_v52 = vld [vmem:[%s5339_s5 + $0x4] sm:$0x1] }
0x1860   :  { %v3078_v45 = vmax.f32 %v5264_v4, %v3077_v12  ;;  %v3123_v37 = vmax.f32 %v5268_v25, %v3122_v29  ;;  %v3213_v48 = vmax.f32 %v5272_v9, %v3212_v16  ;;  %v3256_v55 = vsel %vm3076_vm5, %v3254_v44, -inf  ;;  %v3133_v12 = vld [vmem:[%s5339_s5 + $0x5] sm:$0x1] }
0x1861   :  { %v3257_v32 = vmax.f32 %v5274_v20, %v3256_v55  ;;  %v3300_v49 = vsel %vm3076_vm5, %v3298_v54, -inf  ;;  %v3075_v40 = vmax.f32 %v3069_v19, %v3073_v1  ;;  %v3121_v42 = vmax.f32 %v5266_v13, %v3119_v8  ;;  %v3032_v54 = vld [vmem:[%s5339_s5 + $0x3] sm:$0x1]  ;;  %v3178_v55 = vld [vmem:[%s5339_s5 + $0x6] sm:$0x1]  ;;  %s4448_s5 = scalar_lea.vmem %s3325_s1, 32 }
0x1862   :  { %v3164_v2 = vmul.f32 %v5252_v46, %v3030_v24  ;;  %v3209_v7 = vmul.f32 %v5258_v14, %v3030_v24  ;;  %v3253_v21 = vmul.f32 %v5260_v5, %v3030_v24  ;;  %v3297_v4 = vmul.f32 %v5262_v33, %v3030_v24  ;;  %p4449_p0 = scmp.ne.s32.totalorder %s3325_s1, %s4448_s5  ;;  %p4454_p2 = scmp.lt.s32.totalorder %s4448_s5, %s4448_s5 }
0x1863   :  { %v3079_v25 = vmax.f32 %v3075_v40, %v3078_v45  ;;  %v3124_v63 = vmax.f32 %v3121_v42, %v3123_v37  ;;  %v3168_v9 = vmax.f32 %v5270_v17, %v3167_v15  ;;  %v3301_v26 = vmax.f32 %v5276_v18, %v3300_v49 }
0x1864   :  { %v3166_v20 = vmax.f32 %v5278_v57, %v3164_v2  ;;  %v3211_v27 = vmax.f32 %v3205_v61, %v3209_v7  ;;  %v3255_v19 = vmax.f32 %v5280_v22, %v3253_v21  ;;  %v3299_v13 = vmax.f32 %v5282_v23, %v3297_v4  ;;  %p4455_p3 = por %p4454_p2, %p4453_p1 }
0x1865   :  { %v3081_v46 = vmax.f32 %v3079_v25, %v3080_v51  ;;  %v3126_v28 = vmax.f32 %v3124_v63, %v3125_v41 }
0x1866   :  { %v3214_v14 = vmax.f32 %v3211_v27, %v3213_v48  ;;  %v3169_v30 = vmax.f32 %v3166_v20, %v3168_v9  ;;  %v3258_v5 = vmax.f32 %v3255_v19, %v3257_v32  ;;  %v3302_v53 = vmax.f32 %v3299_v13, %v3301_v26  ;;  %p4456_p4 = pnand %p4455_p3, %p4449_p0 }
0x1867   :  { %v3082_v33 = vrot.slane %v3081_v46, 4  ;;  %v3127_v31 = vrot.slane %v3126_v28, 4 }
0x1868   :  { %v3171_v3 = vmax.f32 %v3169_v30, %v3170_v36  ;;  %v3216_v10 = vmax.f32 %v3214_v14, %v3215_v59  ;;  %v3260_v17 = vmax.f32 %v3258_v5, %v3259_v11  ;;  %v3304_v6 = vmax.f32 %v3302_v53, %v3303_v0 }
0x1869   :  { %v3083_v18 = vmax.f32 %v3081_v46, %v3082_v33  ;;  %v3128_v60 = vmax.f32 %v3126_v28, %v3127_v31 }
0x186a   :  { %v3172_v57 = vrot.slane %v3171_v3, 4  ;;  %v3217_v61 = vrot.slane %v3216_v10, 4  ;;  %v3261_v39 = vrot.slane %v3260_v17, 4  ;;  %v3305_v22 = vrot.slane %v3304_v6, 4 }
0x186b   :  { %v3084_v62 = vrot.slane %v3083_v18, 2  ;;  %v3129_v23 = vrot.slane %v3128_v60, 2 }
0x186c   :  { %v3173_v34 = vmax.f32 %v3171_v3, %v3172_v57  ;;  %v3218_v38 = vmax.f32 %v3216_v10, %v3217_v61  ;;  %v3262_v47 = vmax.f32 %v3260_v17, %v3261_v39  ;;  %v3306_v50 = vmax.f32 %v3304_v6, %v3305_v22 }
0x186d   :  { %v3085_v51 = vmax.f32 %v3083_v18, %v3084_v62  ;;  %v3130_v58 = vmax.f32 %v3128_v60, %v3129_v23 }
0x186e   :  { %v3174_v24 = vrot.slane %v3173_v34, 2  ;;  %v3219_v41 = vrot.slane %v3218_v38, 2  ;;  %v3263_v36 = vrot.slane %v3262_v47, 2  ;;  %v3307_v59 = vrot.slane %v3306_v50, 2 }
0x186f   :  { %v3086_v11 = vrot.slane %v3085_v51, 1  ;;  %v3131_v0 = vrot.slane %v3130_v58, 1 }
0x1870   :  { %v3175_v56 = vmax.f32 %v3173_v34, %v3174_v24  ;;  %v3220_v43 = vmax.f32 %v3218_v38, %v3219_v41  ;;  %v3264_v35 = vmax.f32 %v3262_v47, %v3263_v36  ;;  %v3308_v44 = vmax.f32 %v3306_v50, %v3307_v59 }
0x1871   :  { %v3087_v1 = vmax.f32 %v3085_v51, %v3086_v11  ;;  %v3132_v8 = vmax.f32 %v3130_v58, %v3131_v0 }
0x1872   :  { %v3176_v29 = vrot.slane %v3175_v56, 1  ;;  %v3221_v15 = vrot.slane %v3220_v43, 1  ;;  %v3265_v16 = vrot.slane %v3264_v35, 1  ;;  %v3309_v45 = vrot.slane %v3308_v44, 1 }
0x1873   :  { %v3089_v37 = vmul.f32 %v3088_v52, %v3087_v1  ;;  %v3134_v42 = vmul.f32 %v3133_v12, %v3132_v8 }
0x1874   :  { %v3177_v48 = vmax.f32 %v3175_v56, %v3176_v29  ;;  %v3222_v32 = vmax.f32 %v3220_v43, %v3221_v15  ;;  %v3266_v49 = vmax.f32 %v3264_v35, %v3265_v16  ;;  %v3310_v7 = vmax.f32 %v3308_v44, %v3309_v45 }
0x1875   :  { %v3090_v40 = vadd.f32 %v3089_v37, %v3032_v54 }
0x1876   :  { %v3223_v2 = vmul.f32 %v3222_v32, %v3088_v52  ;;  %v3179_v4 = vmul.f32 %v3178_v55, %v3177_v48  ;;  %v3267_v63 = vmul.f32 %v3266_v49, %v3133_v12  ;;  %v3311_v20 = vmul.f32 %v3310_v7, %v3178_v55 }
0x1877   :  { %v3135_v21 = vadd.f32 %v3134_v42, %v3090_v40 }
0x1878   :  { %v3224_v25 = vadd.f32 %v3223_v2, %v3032_v54 }
0x1879   :  { %v3180_v9 = vadd.f32 %v3179_v4, %v3135_v21 }
0x187a   :  { %v3268_v26 = vadd.f32 %v3267_v63, %v3224_v25 }
0x187c   :  { %v3312_v27 = vadd.f32 %v3311_v20, %v3268_v26 }
0x187e   :  { %v3314_v19 = vrot.slane %v3312_v27, 7 }
0x1880   :  { %v3316_v13 = vsel %vm2635_vm4, %v3180_v9, %v3314_v19 }
0x1881   :  { %3317 = vst [vmem:[#allocation2] sm:$0x3] %v3316_v13 }
0x1882   :  { %4459 = shalt.err (!%p4456_p4)
}
0x1883   :  { %s4460_s10 = scalar_lea.hbm %s5341_s7, 32 }
0x1884   :  { %p4461_p5 = scmp.ne.s32.totalorder %s5341_s7, %s4460_s10  ;;  %p4464_p6 = scmp.lt.u32.totalorder %s4460_s10, %s5341_s7 }
0x1886   :  { %p4466_p7 = pnand %p4464_p6, %p4461_p5 }
0x1888   :  { %4469 = shalt.err (!%p4466_p7)
}
0x1889   :  { %3327 = dma.vmem_to_hbm [thread:$0]  %s3325_s1, 32, %s5341_s7, [#allocation3]  }
0x188a   :  { %4470 = dma.done.wait [#allocation3], 32  }
0x188b   :  { %4471 = vsyncadd [#allocation3], 4294967264 }
0x188c   :  { %3331 = vsyncpa [#allocation3], 1 }

</bundles_post_ra>
